<compile_context>
chip_gen: v6e
topology: v6e:2x2x1
jax: 0.10.0
libtpu: 0.0.40
codegen_flags: <defaults>
</compile_context>

<pallas_src>
import functools
import math

import jax
import jax.numpy as jnp
from jax.experimental import pallas as pl
from jax.experimental.pallas import tpu as pltpu


_DOT_DTYPE = jnp.bfloat16   # MXU operand dtype (accumulation stays float32)
_ROW_TILE = 256             # pixel-row tile (v7x-safe; sweep 256/512 on v5e/v6e)


# ---------------------------------------------------------------------------
# Fused decoder kernel (one grid step = one tile of N*H*W pixel rows)
# ---------------------------------------------------------------------------
def _decoder_kernel(x_ref, p4_ref, p3_ref,
                    w1_ref, b1_ref, w2_ref, b2_ref,
                    wu1_ref, bu1_ref,
                    wu2a_ref, wu2p_ref, bu2_ref,
                    wu3a_ref, wu3p_ref, bu3_ref,
                    o_ref, *, k1, co1, out_blk):
    f32 = jnp.float32

    def mm(a, b):
        # MXU matmul: bf16 operands, f32 accumulation.
        return jnp.dot(a.astype(_DOT_DTYPE), b, preferred_element_type=f32)

    # conv_8_column: Conv2d(1x1) -> ReLU -> Dropout(0.8) [identity at
    # inference] -> Conv2d(1x1)
    x = x_ref[...]                                          # (TP, 256) bf16
    h = jnp.maximum(mm(x, w1_ref[...]) + b1_ref[...], 0.0)  # f32
    h = mm(h, w2_ref[...]) + b2_ref[...]                    # f32

    # upsample_1_column: columns ordered (a, b, co1)
    u1 = mm(h, wu1_ref[...]) + bu1_ref[...]                 # (TP, k1*k1*co1)

    wu2a, wu2p, bu2 = wu2a_ref[...], wu2p_ref[...], bu2_ref[...]
    wu3a, wu3p, bu3 = wu3a_ref[...], wu3p_ref[...], bu3_ref[...]

    for q1 in range(k1 * k1):                               # up1 sub-position
        u1_q = u1[:, q1 * co1:(q1 + 1) * co1]               # (TP, co1)
        # cat([up1, pool4]) @ Wu2  ==  up1 @ Wu2a + pool4 @ Wu2p
        u2 = mm(u1_q, wu2a) + mm(p4_ref[q1], wu2p) + bu2    # (TP, k2*k2*co2)
        # up3 for all k2*k2 sub-positions in one MXU call via block-diagonal
        # weights (same MXU cycles, lane-dense result, aligned wide store).
        # cat([up2, pool3]) @ Wu3  ==  up2 @ Wu3a_bd + pool3_packed @ Wu3p_bd
        u3 = mm(u2, wu3a) + mm(p3_ref[q1], wu3p) + bu3      # (TP, k2*k2*npatch)
        o_ref[:, q1 * out_blk:(q1 + 1) * out_blk] = u3.astype(o_ref.dtype)


# ---------------------------------------------------------------------------
# Weight flattening helpers
# ---------------------------------------------------------------------------
def _flatten_convT(w, b):
    """(Ci, Co, k, k) -> (Ci, k*k*Co) with columns ordered (row, col, out-ch).

    Valid for ConvTranspose2d with kernel_size == stride (TableNet's config).
    """
    ci, co, kh, kw = w.shape
    wf = jnp.transpose(w, (0, 2, 3, 1)).reshape(ci, kh * kw * co)
    bf = jnp.tile(b, kh * kw).reshape(1, kh * kw * co)
    return wf, bf


def _block_diag(w, reps):
    """(Ci, Co) -> block-diagonal (reps*Ci, reps*Co) with `w` on the diagonal."""
    return jnp.kron(jnp.eye(reps, dtype=w.dtype), w)


# ---------------------------------------------------------------------------
# ColumnDecoder forward (wrapper: layout plumbing only, one pallas_call)
# ---------------------------------------------------------------------------
def column_decoder_forward(params, x, pool3_out, pool4_out):
    f32 = jnp.float32
    n, c_in, hh, ww = x.shape
    p = hh * ww
    r = n * p                       # batch folded into the pixel-row axis

    # --- conv_8_column weights (1x1 convs -> plain matmuls) ---
    w1, b1 = params["c8_w1"], params["c8_b1"]
    w2, b2 = params["c8_w2"], params["c8_b2"]
    # TODO(synk): general Conv2d (kernel != 1 / padding) is not implemented;
    # TableNet's ColumnDecoder always uses 1x1 convs with stride 1 here.
    assert w1.shape[2:] == (1, 1) and w2.shape[2:] == (1, 1)
    wm1 = jnp.transpose(w1[:, :, 0, 0]).astype(_DOT_DTYPE)     # (Ci, Co)
    wm2 = jnp.transpose(w2[:, :, 0, 0]).astype(_DOT_DTYPE)
    bm1 = b1.reshape(1, -1).astype(f32)
    bm2 = b2.reshape(1, -1).astype(f32)

    # --- transposed-conv weights (kernel_size == stride, as in TableNet) ---
    # TODO(synk): ConvTranspose2d with stride != kernel_size (overlapping taps)
    # has no non-overlapping matmul form and is not implemented.
    wu1, bu1 = params["up1_w"], params["up1_b"]
    wu2, bu2 = params["up2_w"], params["up2_b"]
    wu3, bu3 = params["up3_w"], params["up3_b"]
    k1, k2, k3 = wu1.shape[2], wu2.shape[2], wu3.shape[2]
    co1, co2, co3 = wu1.shape[1], wu2.shape[1], wu3.shape[1]
    c4, c3 = pool4_out.shape[1], pool3_out.shape[1]
    assert wu2.shape[0] == co1 + c4 and wu3.shape[0] == co2 + c3

    wu1f, bu1f = _flatten_convT(wu1, bu1)            # (256, k1*k1*co1)
    wu2af, bu2f = _flatten_convT(wu2[:co1], bu2)     # (co1, k2*k2*co2)
    wu2pf, _ = _flatten_convT(wu2[co1:], bu2)        # (c4,  k2*k2*co2)
    wu3af, bu3f = _flatten_convT(wu3[:co2], bu3)     # (co2, npatch)
    wu3pf, _ = _flatten_convT(wu3[co2:], bu3)        # (c3,  npatch)

    npatch = k3 * k3 * co3
    nq2 = k2 * k2
    out_blk = nq2 * npatch
    ncols = (k1 * k1) * out_blk

    # Block-diagonal up3 weights: fuse the k2*k2 sub-positions of each q1 into
    # one matmul -> lane-dense (TP, k2*k2*npatch) result per store.
    wu3a_bd = _block_diag(wu3af, nq2).astype(_DOT_DTYPE)   # (nq2*co2, nq2*npatch)
    wu3p_bd = _block_diag(wu3pf, nq2).astype(_DOT_DTYPE)   # (nq2*c3,  nq2*npatch)
    bu3_bd = jnp.tile(bu3f, (1, nq2)).astype(f32)

    wu1f = wu1f.astype(_DOT_DTYPE)
    wu2af = wu2af.astype(_DOT_DTYPE)
    wu2pf = wu2pf.astype(_DOT_DTYPE)
    bu1f = bu1f.astype(f32)
    bu2f = bu2f.astype(f32)

    # --- activations: NCHW -> pixel-major channels-last, batch folded in ---
    xp = jnp.transpose(x, (0, 2, 3, 1)).reshape(r, c_in).astype(_DOT_DTYPE)

    # pool4[n, c, k1*h + a, k1*w + b] -> p4[a*k1 + b, n*P + h*W + w, c]
    p4 = jnp.transpose(pool4_out, (0, 2, 3, 1)).reshape(n, hh, k1, ww, k1, c4)
    p4 = jnp.transpose(p4, (2, 4, 0, 1, 3, 5)).reshape(k1 * k1, r, c4)
    p4 = p4.astype(_DOT_DTYPE)

    # pool3[n, c, k1*k2*h + k2*a + cc, k1*k2*w + k2*b + d]
    #   -> p3[a*k1 + b, n*P + h*W + w, (cc*k2 + d)*c3 + c]
    # (up2 sub-position packed into the lane dim -> one K=k2*k2*c3 matmul per q1)
    p3 = jnp.transpose(pool3_out, (0, 2, 3, 1)).reshape(
        n, hh, k1, k2, ww, k1, k2, c3)
    p3 = jnp.transpose(p3, (2, 5, 0, 1, 4, 3, 6, 7)).reshape(
        k1 * k1, r, nq2 * c3)
    p3 = p3.astype(_DOT_DTYPE)

    # --- pixel-row tiling: pad rows up to the tile (never assert) ---
    tp = _ROW_TILE if r >= _ROW_TILE else ((r + 7) // 8) * 8
    r_pad = pl.cdiv(r, tp) * tp
    if r_pad != r:
        pad = r_pad - r
        xp = jnp.pad(xp, ((0, pad), (0, 0)))
        p4 = jnp.pad(p4, ((0, 0), (0, pad), (0, 0)))
        p3 = jnp.pad(p3, ((0, 0), (0, pad), (0, 0)))

    # --- explicit VMEM budget (double-buffered tiles + weights + headroom) ---
    def nbytes(shape, dtype):
        return math.prod(shape) * jnp.dtype(dtype).itemsize

    tile_bytes = (nbytes((tp, c_in), _DOT_DTYPE)
                  + nbytes((k1 * k1, tp, c4), _DOT_DTYPE)
                  + nbytes((k1 * k1, tp, nq2 * c3), _DOT_DTYPE)
                  + nbytes((tp, ncols), f32))
    weight_bytes = sum(nbytes(a.shape, a.dtype) for a in
                       (wm1, bm1, wm2, bm2, wu1f, bu1f, wu2af, wu2pf, bu2f,
                        wu3a_bd, wu3p_bd, bu3_bd))
    interm_bytes = nbytes(
        (tp, 2 * c_in + k1 * k1 * co1 + nq2 * co2 + out_blk), f32)
    budget = 2 * (tile_bytes + weight_bytes) + interm_bytes + (4 << 20)
    vmem_limit = int(min(max(budget, 32 << 20), 56 << 20))   # v7x-safe ceiling

    kernel = functools.partial(_decoder_kernel, k1=k1, co1=co1, out_blk=out_blk)
    wconst = lambda t: (0, 0)

    out = pl.pallas_call(
        kernel,
        out_shape=jax.ShapeDtypeStruct((r_pad, ncols), f32),
        grid=(r_pad // tp,),
        in_specs=[
            pl.BlockSpec((tp, c_in), lambda t: (t, 0)),
            pl.BlockSpec((k1 * k1, tp, c4), lambda t: (0, t, 0)),
            pl.BlockSpec((k1 * k1, tp, nq2 * c3), lambda t: (0, t, 0)),
            pl.BlockSpec(wm1.shape, wconst),
            pl.BlockSpec(bm1.shape, wconst),
            pl.BlockSpec(wm2.shape, wconst),
            pl.BlockSpec(bm2.shape, wconst),
            pl.BlockSpec(wu1f.shape, wconst),
            pl.BlockSpec(bu1f.shape, wconst),
            pl.BlockSpec(wu2af.shape, wconst),
            pl.BlockSpec(wu2pf.shape, wconst),
            pl.BlockSpec(bu2f.shape, wconst),
            pl.BlockSpec(wu3a_bd.shape, wconst),
            pl.BlockSpec(wu3p_bd.shape, wconst),
            pl.BlockSpec(bu3_bd.shape, wconst),
        ],
        out_specs=pl.BlockSpec((tp, ncols), lambda t: (t, 0)),
        compiler_params=pltpu.CompilerParams(
            dimension_semantics=("parallel",),
            vmem_limit_bytes=vmem_limit),
    )(xp, p4, p3, wm1, bm1, wm2, bm2, wu1f, bu1f,
      wu2af, wu2pf, bu2f, wu3a_bd, wu3p_bd, bu3_bd)

    # --- single interleave back to NCHW at the exit (module contract) ---
    # (If the consumer accepted the channels-last (r, ncols) layout or bf16,
    #  this transpose / the f32 output width could be dropped for extra HBM
    #  bandwidth; kept for exact module parity.)
    out = out[:r]
    out = out.reshape(n, hh, ww, k1, k1, k2, k2, k3, k3, co3)
    out = jnp.transpose(out, (0, 9, 1, 3, 5, 7, 2, 4, 6, 8))
    return out.reshape(n, co3, hh * k1 * k2 * k3, ww * k1 * k2 * k3)


# ---------------------------------------------------------------------------
# Pure-JAX reference (float32) mirroring the PyTorch module
# ---------------------------------------------------------------------------
def _ref_conv1x1(x, w, b, relu=False):
    y = jnp.einsum("nchw,oc->nohw", x, w[:, :, 0, 0]) + b[None, :, None, None]
    return jnp.maximum(y, 0.0) if relu else y


def _ref_convT(x, w, b):
    n, _, hh, ww = x.shape
    _, co, k, _ = w.shape
    y = jnp.einsum("nchw,coab->nohawb", x, w).reshape(n, co, hh * k, ww * k)
    return y + b[None, :, None, None]


def column_decoder_reference(params, x, pool3_out, pool4_out):
    h = _ref_conv1x1(x, params["c8_w1"], params["c8_b1"], relu=True)
    h = _ref_conv1x1(h, params["c8_w2"], params["c8_b2"])       # dropout = id
    o = _ref_convT(h, params["up1_w"], params["up1_b"])
    o = jnp.concatenate([o, pool4_out], axis=1)
    o = _ref_convT(o, params["up2_w"], params["up2_b"])
    o = jnp.concatenate([o, pool3_out], axis=1)
    o = _ref_convT(o, params["up3_w"], params["up3_b"])
    return o


# ---------------------------------------------------------------------------
# Deterministic parameter construction
# ---------------------------------------------------------------------------
def make_params(key, channels, kernels):
    ks = jax.random.split(key, 10)
    s = 0.05

    def rnd(k, shape):
        return jax.random.normal(k, shape, dtype=jnp.float32) * s

    return {
        "c8_w1": rnd(ks[0], (256, 256, kernels[0], kernels[0])),
        "c8_b1": rnd(ks[1], (256,)),
        "c8_w2": rnd(ks[2], (256, 256, kernels[0], kernels[0])),
        "c8_b2": rnd(ks[3], (256,)),
        "up1_w": rnd(ks[4], (256, 128, kernels[1], kernels[1])),
        "up1_b": rnd(ks[5], (128,)),
        "up2_w": rnd(ks[6], (128 + channels[0], 256, kernels[2], kernels[2])),
        "up2_b": rnd(ks[7], (256,)),
        "up3_w": rnd(ks[8], (256 + channels[1], 1, kernels[3], kernels[3])),
        "up3_b": rnd(ks[9], (1,)),
    }


if __name__ == "__main__":
    # TableNet-style hyperparameters (kernel_size == stride for every layer);
    # small skip-connection channel counts and spatial sizes for the demo.
    channels = (8, 4)          # (pool4 channels, pool3 channels)
    kernels = (1, 2, 2, 8)     # == strides

    key = jax.random.PRNGKey(0)
    kp, kx, kp4, kp3 = jax.random.split(key, 4)
    params = make_params(kp, channels, kernels)

    batch = 2
    x = jax.random.normal(kx, (batch, 256, 2, 2), dtype=jnp.float32)
    pool4_out = jax.random.normal(kp4, (batch, channels[0], 4, 4), dtype=jnp.float32)
    pool3_out = jax.random.normal(kp3, (batch, channels[1], 8, 8), dtype=jnp.float32)

    out = jax.jit(column_decoder_forward)(params, x, pool3_out, pool4_out)
    out = jax.block_until_ready(out)

    # Shape check: x(2x2) -> up1(4x4) -> up2(8x8) -> up3(64x64), 1 channel.
    assert out.shape == (batch, 1, 64, 64), out.shape
    assert out.dtype == jnp.float32

    # Numerical check vs. a float32 pure-JAX reference (bf16 MXU operands in
    # the kernel => loose-but-meaningful relative-L2 tolerance).
    ref = jax.block_until_ready(
        jax.jit(column_decoder_reference)(params, x, pool3_out, pool4_out))
    rel = float(jnp.linalg.norm((out - ref).ravel())
                / (jnp.linalg.norm(ref.ravel()) + 1e-12))
    assert rel < 5e-2, f"relative L2 error too large: {rel}"

    print("KERNEL_OK")
</pallas_src>

<mosaic_0001>
module attributes {stable_mosaic.version = 11 : i64} {
  func.func @_decoder_kernel(%arg0: i32, %arg1: memref<8x256xbf16, #tpu.memory_space<vmem>>, %arg2: memref<4x8x8xbf16, #tpu.memory_space<vmem>>, %arg3: memref<4x8x16xbf16, #tpu.memory_space<vmem>>, %arg4: memref<256x256xbf16, #tpu.memory_space<vmem>>, %arg5: memref<1x256xf32, #tpu.memory_space<vmem>>, %arg6: memref<256x256xbf16, #tpu.memory_space<vmem>>, %arg7: memref<1x256xf32, #tpu.memory_space<vmem>>, %arg8: memref<256x512xbf16, #tpu.memory_space<vmem>>, %arg9: memref<1x512xf32, #tpu.memory_space<vmem>>, %arg10: memref<128x1024xbf16, #tpu.memory_space<vmem>>, %arg11: memref<8x1024xbf16, #tpu.memory_space<vmem>>, %arg12: memref<1x1024xf32, #tpu.memory_space<vmem>>, %arg13: memref<1024x256xbf16, #tpu.memory_space<vmem>>, %arg14: memref<16x256xbf16, #tpu.memory_space<vmem>>, %arg15: memref<1x256xf32, #tpu.memory_space<vmem>>, %arg16: memref<8x1024xf32, #tpu.memory_space<vmem>>) attributes {dimension_semantics = [#tpu.dimension_semantics<parallel>], iteration_bounds = array<i64: 1>, scalar_prefetch = 0 : i64, scratch_operands = 0 : i64, tpu.core_type = #tpu.core_type<tc>, window_params = [{transform_indices = @transform_0, window_bounds = array<i64: 8, 256>}, {transform_indices = @transform_1, window_bounds = array<i64: 4, 8, 8>}, {transform_indices = @transform_2, window_bounds = array<i64: 4, 8, 16>}, {pipeline_mode = #tpu.pipeline_mode<synchronous>, transform_indices = @transform_3, window_bounds = array<i64: 256, 256>}, {pipeline_mode = #tpu.pipeline_mode<synchronous>, transform_indices = @transform_4, window_bounds = array<i64: 1, 256>}, {pipeline_mode = #tpu.pipeline_mode<synchronous>, transform_indices = @transform_5, window_bounds = array<i64: 256, 256>}, {pipeline_mode = #tpu.pipeline_mode<synchronous>, transform_indices = @transform_6, window_bounds = array<i64: 1, 256>}, {pipeline_mode = #tpu.pipeline_mode<synchronous>, transform_indices = @transform_7, window_bounds = array<i64: 256, 512>}, {pipeline_mode = #tpu.pipeline_mode<synchronous>, transform_indices = @transform_8, window_bounds = array<i64: 1, 512>}, {pipeline_mode = #tpu.pipeline_mode<synchronous>, transform_indices = @transform_9, window_bounds = array<i64: 128, 1024>}, {pipeline_mode = #tpu.pipeline_mode<synchronous>, transform_indices = @transform_10, window_bounds = array<i64: 8, 1024>}, {pipeline_mode = #tpu.pipeline_mode<synchronous>, transform_indices = @transform_11, window_bounds = array<i64: 1, 1024>}, {pipeline_mode = #tpu.pipeline_mode<synchronous>, transform_indices = @transform_12, window_bounds = array<i64: 1024, 256>}, {pipeline_mode = #tpu.pipeline_mode<synchronous>, transform_indices = @transform_13, window_bounds = array<i64: 16, 256>}, {pipeline_mode = #tpu.pipeline_mode<synchronous>, transform_indices = @transform_14, window_bounds = array<i64: 1, 256>}, {transform_indices = @transform_15, window_bounds = array<i64: 8, 1024>}]} {
    %c0 = arith.constant 0 : index
    %c0_0 = arith.constant 0 : index
    %0 = vector.load %arg1[%c0, %c0_0] : memref<8x256xbf16, #tpu.memory_space<vmem>>, vector<8x256xbf16>
    %c0_1 = arith.constant 0 : index
    %c0_2 = arith.constant 0 : index
    %1 = vector.load %arg4[%c0_1, %c0_2] : memref<256x256xbf16, #tpu.memory_space<vmem>>, vector<256x256xbf16>
    %cst = arith.constant dense<0.000000e+00> : vector<8x256xf32>
    %2 = tpu.matmul %0, %1, %cst {dimension_numbers = #tpu.dot_dimension_numbers<[1], [0], [0], [1], [0, 0, 1, 1], [], []>} : vector<8x256xbf16>, vector<256x256xbf16>, vector<8x256xf32> -> vector<8x256xf32>
    %c0_3 = arith.constant 0 : index
    %c0_4 = arith.constant 0 : index
    %3 = vector.load %arg5[%c0_3, %c0_4] : memref<1x256xf32, #tpu.memory_space<vmem>>, vector<1x256xf32>
    %4 = vector.broadcast %3 : vector<1x256xf32> to vector<8x256xf32>
    %5 = arith.addf %2, %4 : vector<8x256xf32>
    %cst_5 = arith.constant 0.000000e+00 : f32
    %6 = vector.broadcast %cst_5 : f32 to vector<8x256xf32>
    %7 = arith.maximumf %5, %6 : vector<8x256xf32>
    %c0_6 = arith.constant 0 : index
    %c0_7 = arith.constant 0 : index
    %8 = vector.load %arg6[%c0_6, %c0_7] : memref<256x256xbf16, #tpu.memory_space<vmem>>, vector<256x256xbf16>
    %9 = arith.truncf %7 : vector<8x256xf32> to vector<8x256xbf16>
    %cst_8 = arith.constant dense<0.000000e+00> : vector<8x256xf32>
    %10 = tpu.matmul %9, %8, %cst_8 {dimension_numbers = #tpu.dot_dimension_numbers<[1], [0], [0], [1], [0, 0, 1, 1], [], []>} : vector<8x256xbf16>, vector<256x256xbf16>, vector<8x256xf32> -> vector<8x256xf32>
    %c0_9 = arith.constant 0 : index
    %c0_10 = arith.constant 0 : index
    %11 = vector.load %arg7[%c0_9, %c0_10] : memref<1x256xf32, #tpu.memory_space<vmem>>, vector<1x256xf32>
    %12 = vector.broadcast %11 : vector<1x256xf32> to vector<8x256xf32>
    %13 = arith.addf %10, %12 : vector<8x256xf32>
    %c0_11 = arith.constant 0 : index
    %c0_12 = arith.constant 0 : index
    %14 = vector.load %arg8[%c0_11, %c0_12] : memref<256x512xbf16, #tpu.memory_space<vmem>>, vector<256x512xbf16>
    %15 = arith.truncf %13 : vector<8x256xf32> to vector<8x256xbf16>
    %cst_13 = arith.constant dense<0.000000e+00> : vector<8x512xf32>
    %16 = tpu.matmul %15, %14, %cst_13 {dimension_numbers = #tpu.dot_dimension_numbers<[1], [0], [0], [1], [0, 0, 1, 1], [], []>} : vector<8x256xbf16>, vector<256x512xbf16>, vector<8x512xf32> -> vector<8x512xf32>
    %c0_14 = arith.constant 0 : index
    %c0_15 = arith.constant 0 : index
    %17 = vector.load %arg9[%c0_14, %c0_15] : memref<1x512xf32, #tpu.memory_space<vmem>>, vector<1x512xf32>
    %18 = vector.broadcast %17 : vector<1x512xf32> to vector<8x512xf32>
    %19 = arith.addf %16, %18 : vector<8x512xf32>
    %c0_16 = arith.constant 0 : index
    %c0_17 = arith.constant 0 : index
    %20 = vector.load %arg10[%c0_16, %c0_17] : memref<128x1024xbf16, #tpu.memory_space<vmem>>, vector<128x1024xbf16>
    %c0_18 = arith.constant 0 : index
    %c0_19 = arith.constant 0 : index
    %21 = vector.load %arg11[%c0_18, %c0_19] : memref<8x1024xbf16, #tpu.memory_space<vmem>>, vector<8x1024xbf16>
    %c0_20 = arith.constant 0 : index
    %c0_21 = arith.constant 0 : index
    %22 = vector.load %arg12[%c0_20, %c0_21] : memref<1x1024xf32, #tpu.memory_space<vmem>>, vector<1x1024xf32>
    %c0_22 = arith.constant 0 : index
    %c0_23 = arith.constant 0 : index
    %23 = vector.load %arg13[%c0_22, %c0_23] : memref<1024x256xbf16, #tpu.memory_space<vmem>>, vector<1024x256xbf16>
    %c0_24 = arith.constant 0 : index
    %c0_25 = arith.constant 0 : index
    %24 = vector.load %arg14[%c0_24, %c0_25] : memref<16x256xbf16, #tpu.memory_space<vmem>>, vector<16x256xbf16>
    %c0_26 = arith.constant 0 : index
    %c0_27 = arith.constant 0 : index
    %25 = vector.load %arg15[%c0_26, %c0_27] : memref<1x256xf32, #tpu.memory_space<vmem>>, vector<1x256xf32>
    %26 = vector.extract_strided_slice %19 {offsets = [0, 0], sizes = [8, 128], strides = [1, 1]} : vector<8x512xf32> to vector<8x128xf32>
    %27 = arith.truncf %26 : vector<8x128xf32> to vector<8x128xbf16>
    %cst_28 = arith.constant dense<0.000000e+00> : vector<8x1024xf32>
    %28 = tpu.matmul %27, %20, %cst_28 {dimension_numbers = #tpu.dot_dimension_numbers<[1], [0], [0], [1], [0, 0, 1, 1], [], []>} : vector<8x128xbf16>, vector<128x1024xbf16>, vector<8x1024xf32> -> vector<8x1024xf32>
    %c0_29 = arith.constant 0 : index
    %c0_30 = arith.constant 0 : index
    %c0_31 = arith.constant 0 : index
    %29 = vector.load %arg2[%c0_29, %c0_30, %c0_31] : memref<4x8x8xbf16, #tpu.memory_space<vmem>>, vector<1x8x8xbf16>
    %30 = vector.shape_cast %29 : vector<1x8x8xbf16> to vector<8x8xbf16>
    %cst_32 = arith.constant dense<0.000000e+00> : vector<8x1024xf32>
    %31 = tpu.matmul %30, %21, %cst_32 {dimension_numbers = #tpu.dot_dimension_numbers<[1], [0], [0], [1], [0, 0, 1, 1], [], []>} : vector<8x8xbf16>, vector<8x1024xbf16>, vector<8x1024xf32> -> vector<8x1024xf32>
    %32 = arith.addf %28, %31 : vector<8x1024xf32>
    %33 = vector.broadcast %22 : vector<1x1024xf32> to vector<8x1024xf32>
    %34 = arith.addf %32, %33 : vector<8x1024xf32>
    %35 = arith.truncf %34 : vector<8x1024xf32> to vector<8x1024xbf16>
    %cst_33 = arith.constant dense<0.000000e+00> : vector<8x256xf32>
    %36 = tpu.matmul %35, %23, %cst_33 {dimension_numbers = #tpu.dot_dimension_numbers<[1], [0], [0], [1], [0, 0, 1, 1], [], []>} : vector<8x1024xbf16>, vector<1024x256xbf16>, vector<8x256xf32> -> vector<8x256xf32>
    %c0_34 = arith.constant 0 : index
    %c0_35 = arith.constant 0 : index
    %c0_36 = arith.constant 0 : index
    %37 = vector.load %arg3[%c0_34, %c0_35, %c0_36] : memref<4x8x16xbf16, #tpu.memory_space<vmem>>, vector<1x8x16xbf16>
    %38 = vector.shape_cast %37 : vector<1x8x16xbf16> to vector<8x16xbf16>
    %cst_37 = arith.constant dense<0.000000e+00> : vector<8x256xf32>
    %39 = tpu.matmul %38, %24, %cst_37 {dimension_numbers = #tpu.dot_dimension_numbers<[1], [0], [0], [1], [0, 0, 1, 1], [], []>} : vector<8x16xbf16>, vector<16x256xbf16>, vector<8x256xf32> -> vector<8x256xf32>
    %40 = arith.addf %36, %39 : vector<8x256xf32>
    %41 = vector.broadcast %25 : vector<1x256xf32> to vector<8x256xf32>
    %42 = arith.addf %40, %41 : vector<8x256xf32>
    %c0_38 = arith.constant 0 : index
    %c0_39 = arith.constant 0 : index
    %43 = vector.load %arg16[%c0_38, %c0_39] : memref<8x1024xf32, #tpu.memory_space<vmem>>, vector<8x256xf32>
    tpu.vector_store %arg16[%c0_38, %c0_39], %42 {strides = array<i32>} : memref<8x1024xf32, #tpu.memory_space<vmem>>, vector<8x256xf32>,
    %44 = vector.extract_strided_slice %19 {offsets = [0, 128], sizes = [8, 128], strides = [1, 1]} : vector<8x512xf32> to vector<8x128xf32>
    %45 = arith.truncf %44 : vector<8x128xf32> to vector<8x128xbf16>
    %cst_40 = arith.constant dense<0.000000e+00> : vector<8x1024xf32>
    %46 = tpu.matmul %45, %20, %cst_40 {dimension_numbers = #tpu.dot_dimension_numbers<[1], [0], [0], [1], [0, 0, 1, 1], [], []>} : vector<8x128xbf16>, vector<128x1024xbf16>, vector<8x1024xf32> -> vector<8x1024xf32>
    %c1 = arith.constant 1 : index
    %c0_41 = arith.constant 0 : index
    %c0_42 = arith.constant 0 : index
    %47 = vector.load %arg2[%c1, %c0_41, %c0_42] : memref<4x8x8xbf16, #tpu.memory_space<vmem>>, vector<1x8x8xbf16>
    %48 = vector.shape_cast %47 : vector<1x8x8xbf16> to vector<8x8xbf16>
    %cst_43 = arith.constant dense<0.000000e+00> : vector<8x1024xf32>
    %49 = tpu.matmul %48, %21, %cst_43 {dimension_numbers = #tpu.dot_dimension_numbers<[1], [0], [0], [1], [0, 0, 1, 1], [], []>} : vector<8x8xbf16>, vector<8x1024xbf16>, vector<8x1024xf32> -> vector<8x1024xf32>
    %50 = arith.addf %46, %49 : vector<8x1024xf32>
    %51 = vector.broadcast %22 : vector<1x1024xf32> to vector<8x1024xf32>
    %52 = arith.addf %50, %51 : vector<8x1024xf32>
    %53 = arith.truncf %52 : vector<8x1024xf32> to vector<8x1024xbf16>
    %cst_44 = arith.constant dense<0.000000e+00> : vector<8x256xf32>
    %54 = tpu.matmul %53, %23, %cst_44 {dimension_numbers = #tpu.dot_dimension_numbers<[1], [0], [0], [1], [0, 0, 1, 1], [], []>} : vector<8x1024xbf16>, vector<1024x256xbf16>, vector<8x256xf32> -> vector<8x256xf32>
    %c1_45 = arith.constant 1 : index
    %c0_46 = arith.constant 0 : index
    %c0_47 = arith.constant 0 : index
    %55 = vector.load %arg3[%c1_45, %c0_46, %c0_47] : memref<4x8x16xbf16, #tpu.memory_space<vmem>>, vector<1x8x16xbf16>
    %56 = vector.shape_cast %55 : vector<1x8x16xbf16> to vector<8x16xbf16>
    %cst_48 = arith.constant dense<0.000000e+00> : vector<8x256xf32>
    %57 = tpu.matmul %56, %24, %cst_48 {dimension_numbers = #tpu.dot_dimension_numbers<[1], [0], [0], [1], [0, 0, 1, 1], [], []>} : vector<8x16xbf16>, vector<16x256xbf16>, vector<8x256xf32> -> vector<8x256xf32>
    %58 = arith.addf %54, %57 : vector<8x256xf32>
    %59 = vector.broadcast %25 : vector<1x256xf32> to vector<8x256xf32>
    %60 = arith.addf %58, %59 : vector<8x256xf32>
    %c0_49 = arith.constant 0 : index
    %c256 = arith.constant 256 : index
    %61 = vector.load %arg16[%c0_49, %c256] : memref<8x1024xf32, #tpu.memory_space<vmem>>, vector<8x256xf32>
    tpu.vector_store %arg16[%c0_49, %c256], %60 {strides = array<i32>} : memref<8x1024xf32, #tpu.memory_space<vmem>>, vector<8x256xf32>,
    %62 = vector.extract_strided_slice %19 {offsets = [0, 256], sizes = [8, 128], strides = [1, 1]} : vector<8x512xf32> to vector<8x128xf32>
    %63 = arith.truncf %62 : vector<8x128xf32> to vector<8x128xbf16>
    %cst_50 = arith.constant dense<0.000000e+00> : vector<8x1024xf32>
    %64 = tpu.matmul %63, %20, %cst_50 {dimension_numbers = #tpu.dot_dimension_numbers<[1], [0], [0], [1], [0, 0, 1, 1], [], []>} : vector<8x128xbf16>, vector<128x1024xbf16>, vector<8x1024xf32> -> vector<8x1024xf32>
    %c2 = arith.constant 2 : index
    %c0_51 = arith.constant 0 : index
    %c0_52 = arith.constant 0 : index
    %65 = vector.load %arg2[%c2, %c0_51, %c0_52] : memref<4x8x8xbf16, #tpu.memory_space<vmem>>, vector<1x8x8xbf16>
    %66 = vector.shape_cast %65 : vector<1x8x8xbf16> to vector<8x8xbf16>
    %cst_53 = arith.constant dense<0.000000e+00> : vector<8x1024xf32>
    %67 = tpu.matmul %66, %21, %cst_53 {dimension_numbers = #tpu.dot_dimension_numbers<[1], [0], [0], [1], [0, 0, 1, 1], [], []>} : vector<8x8xbf16>, vector<8x1024xbf16>, vector<8x1024xf32> -> vector<8x1024xf32>
    %68 = arith.addf %64, %67 : vector<8x1024xf32>
    %69 = vector.broadcast %22 : vector<1x1024xf32> to vector<8x1024xf32>
    %70 = arith.addf %68, %69 : vector<8x1024xf32>
    %71 = arith.truncf %70 : vector<8x1024xf32> to vector<8x1024xbf16>
    %cst_54 = arith.constant dense<0.000000e+00> : vector<8x256xf32>
    %72 = tpu.matmul %71, %23, %cst_54 {dimension_numbers = #tpu.dot_dimension_numbers<[1], [0], [0], [1], [0, 0, 1, 1], [], []>} : vector<8x1024xbf16>, vector<1024x256xbf16>, vector<8x256xf32> -> vector<8x256xf32>
    %c2_55 = arith.constant 2 : index
    %c0_56 = arith.constant 0 : index
    %c0_57 = arith.constant 0 : index
    %73 = vector.load %arg3[%c2_55, %c0_56, %c0_57] : memref<4x8x16xbf16, #tpu.memory_space<vmem>>, vector<1x8x16xbf16>
    %74 = vector.shape_cast %73 : vector<1x8x16xbf16> to vector<8x16xbf16>
    %cst_58 = arith.constant dense<0.000000e+00> : vector<8x256xf32>
    %75 = tpu.matmul %74, %24, %cst_58 {dimension_numbers = #tpu.dot_dimension_numbers<[1], [0], [0], [1], [0, 0, 1, 1], [], []>} : vector<8x16xbf16>, vector<16x256xbf16>, vector<8x256xf32> -> vector<8x256xf32>
    %76 = arith.addf %72, %75 : vector<8x256xf32>
    %77 = vector.broadcast %25 : vector<1x256xf32> to vector<8x256xf32>
    %78 = arith.addf %76, %77 : vector<8x256xf32>
    %c0_59 = arith.constant 0 : index
    %c512 = arith.constant 512 : index
    %79 = vector.load %arg16[%c0_59, %c512] : memref<8x1024xf32, #tpu.memory_space<vmem>>, vector<8x256xf32>
    tpu.vector_store %arg16[%c0_59, %c512], %78 {strides = array<i32>} : memref<8x1024xf32, #tpu.memory_space<vmem>>, vector<8x256xf32>,
    %80 = vector.extract_strided_slice %19 {offsets = [0, 384], sizes = [8, 128], strides = [1, 1]} : vector<8x512xf32> to vector<8x128xf32>
    %81 = arith.truncf %80 : vector<8x128xf32> to vector<8x128xbf16>
    %cst_60 = arith.constant dense<0.000000e+00> : vector<8x1024xf32>
    %82 = tpu.matmul %81, %20, %cst_60 {dimension_numbers = #tpu.dot_dimension_numbers<[1], [0], [0], [1], [0, 0, 1, 1], [], []>} : vector<8x128xbf16>, vector<128x1024xbf16>, vector<8x1024xf32> -> vector<8x1024xf32>
    %c3 = arith.constant 3 : index
    %c0_61 = arith.constant 0 : index
    %c0_62 = arith.constant 0 : index
    %83 = vector.load %arg2[%c3, %c0_61, %c0_62] : memref<4x8x8xbf16, #tpu.memory_space<vmem>>, vector<1x8x8xbf16>
    %84 = vector.shape_cast %83 : vector<1x8x8xbf16> to vector<8x8xbf16>
    %cst_63 = arith.constant dense<0.000000e+00> : vector<8x1024xf32>
    %85 = tpu.matmul %84, %21, %cst_63 {dimension_numbers = #tpu.dot_dimension_numbers<[1], [0], [0], [1], [0, 0, 1, 1], [], []>} : vector<8x8xbf16>, vector<8x1024xbf16>, vector<8x1024xf32> -> vector<8x1024xf32>
    %86 = arith.addf %82, %85 : vector<8x1024xf32>
    %87 = vector.broadcast %22 : vector<1x1024xf32> to vector<8x1024xf32>
    %88 = arith.addf %86, %87 : vector<8x1024xf32>
    %89 = arith.truncf %88 : vector<8x1024xf32> to vector<8x1024xbf16>
    %cst_64 = arith.constant dense<0.000000e+00> : vector<8x256xf32>
    %90 = tpu.matmul %89, %23, %cst_64 {dimension_numbers = #tpu.dot_dimension_numbers<[1], [0], [0], [1], [0, 0, 1, 1], [], []>} : vector<8x1024xbf16>, vector<1024x256xbf16>, vector<8x256xf32> -> vector<8x256xf32>
    %c3_65 = arith.constant 3 : index
    %c0_66 = arith.constant 0 : index
    %c0_67 = arith.constant 0 : index
    %91 = vector.load %arg3[%c3_65, %c0_66, %c0_67] : memref<4x8x16xbf16, #tpu.memory_space<vmem>>, vector<1x8x16xbf16>
    %92 = vector.shape_cast %91 : vector<1x8x16xbf16> to vector<8x16xbf16>
    %cst_68 = arith.constant dense<0.000000e+00> : vector<8x256xf32>
    %93 = tpu.matmul %92, %24, %cst_68 {dimension_numbers = #tpu.dot_dimension_numbers<[1], [0], [0], [1], [0, 0, 1, 1], [], []>} : vector<8x16xbf16>, vector<16x256xbf16>, vector<8x256xf32> -> vector<8x256xf32>
    %94 = arith.addf %90, %93 : vector<8x256xf32>
    %95 = vector.broadcast %25 : vector<1x256xf32> to vector<8x256xf32>
    %96 = arith.addf %94, %95 : vector<8x256xf32>
    %c0_69 = arith.constant 0 : index
    %c768 = arith.constant 768 : index
    %97 = vector.load %arg16[%c0_69, %c768] : memref<8x1024xf32, #tpu.memory_space<vmem>>, vector<8x256xf32>
    tpu.vector_store %arg16[%c0_69, %c768], %96 {strides = array<i32>} : memref<8x1024xf32, #tpu.memory_space<vmem>>, vector<8x256xf32>,
    return
  }
  func.func @transform_0(%arg0: i32) -> (i32, i32) {
    %c0_i32 = arith.constant 0 : i32
    %c0_i32_0 = arith.constant 0 : i32
    return %arg0, %c0_i32 : i32, i32
  }
  func.func @transform_1(%arg0: i32) -> (i32, i32, i32) {
    %c0_i32 = arith.constant 0 : i32
    %c0_i32_0 = arith.constant 0 : i32
    %c0_i32_1 = arith.constant 0 : i32
    return %c0_i32, %arg0, %c0_i32_0 : i32, i32, i32
  }
  func.func @transform_2(%arg0: i32) -> (i32, i32, i32) {
    %c0_i32 = arith.constant 0 : i32
    %c0_i32_0 = arith.constant 0 : i32
    %c0_i32_1 = arith.constant 0 : i32
    return %c0_i32, %arg0, %c0_i32_0 : i32, i32, i32
  }
  func.func @transform_3(%arg0: i32) -> (i32, i32) {
    %c0_i32 = arith.constant 0 : i32
    %c0_i32_0 = arith.constant 0 : i32
    %c0_i32_1 = arith.constant 0 : i32
    return %c0_i32, %c0_i32_0 : i32, i32
  }
  func.func @transform_4(%arg0: i32) -> (i32, i32) {
    %c0_i32 = arith.constant 0 : i32
    %c0_i32_0 = arith.constant 0 : i32
    %c0_i32_1 = arith.constant 0 : i32
    return %c0_i32, %c0_i32_0 : i32, i32
  }
  func.func @transform_5(%arg0: i32) -> (i32, i32) {
    %c0_i32 = arith.constant 0 : i32
    %c0_i32_0 = arith.constant 0 : i32
    %c0_i32_1 = arith.constant 0 : i32
    return %c0_i32, %c0_i32_0 : i32, i32
  }
  func.func @transform_6(%arg0: i32) -> (i32, i32) {
    %c0_i32 = arith.constant 0 : i32
    %c0_i32_0 = arith.constant 0 : i32
    %c0_i32_1 = arith.constant 0 : i32
    return %c0_i32, %c0_i32_0 : i32, i32
  }
  func.func @transform_7(%arg0: i32) -> (i32, i32) {
    %c0_i32 = arith.constant 0 : i32
    %c0_i32_0 = arith.constant 0 : i32
    %c0_i32_1 = arith.constant 0 : i32
    return %c0_i32, %c0_i32_0 : i32, i32
  }
  func.func @transform_8(%arg0: i32) -> (i32, i32) {
    %c0_i32 = arith.constant 0 : i32
    %c0_i32_0 = arith.constant 0 : i32
    %c0_i32_1 = arith.constant 0 : i32
    return %c0_i32, %c0_i32_0 : i32, i32
  }
  func.func @transform_9(%arg0: i32) -> (i32, i32) {
    %c0_i32 = arith.constant 0 : i32
    %c0_i32_0 = arith.constant 0 : i32
    %c0_i32_1 = arith.constant 0 : i32
    return %c0_i32, %c0_i32_0 : i32, i32
  }
  func.func @transform_10(%arg0: i32) -> (i32, i32) {
    %c0_i32 = arith.constant 0 : i32
    %c0_i32_0 = arith.constant 0 : i32
    %c0_i32_1 = arith.constant 0 : i32
    return %c0_i32, %c0_i32_0 : i32, i32
  }
  func.func @transform_11(%arg0: i32) -> (i32, i32) {
    %c0_i32 = arith.constant 0 : i32
    %c0_i32_0 = arith.constant 0 : i32
    %c0_i32_1 = arith.constant 0 : i32
    return %c0_i32, %c0_i32_0 : i32, i32
  }
  func.func @transform_12(%arg0: i32) -> (i32, i32) {
    %c0_i32 = arith.constant 0 : i32
    %c0_i32_0 = arith.constant 0 : i32
    %c0_i32_1 = arith.constant 0 : i32
    return %c0_i32, %c0_i32_0 : i32, i32
  }
  func.func @transform_13(%arg0: i32) -> (i32, i32) {
    %c0_i32 = arith.constant 0 : i32
    %c0_i32_0 = arith.constant 0 : i32
    %c0_i32_1 = arith.constant 0 : i32
    return %c0_i32, %c0_i32_0 : i32, i32
  }
  func.func @transform_14(%arg0: i32) -> (i32, i32) {
    %c0_i32 = arith.constant 0 : i32
    %c0_i32_0 = arith.constant 0 : i32
    %c0_i32_1 = arith.constant 0 : i32
    return %c0_i32, %c0_i32_0 : i32, i32
  }
  func.func @transform_15(%arg0: i32) -> (i32, i32) {
    %c0_i32 = arith.constant 0 : i32
    %c0_i32_0 = arith.constant 0 : i32
    return %arg0, %c0_i32 : i32, i32
  }
}

</mosaic_0001>

<bundles_post_ra>
// kernel: tile.22
= control target key start
LH: loop header
LB: loop body
LE: loop exit
PB: predicated region body
PF: predicated region fallthrough
CT: control target
= control target key end

     0   :  { %s22_s0 = inlined_call_operand.vmem [shape: f32[128], index: 0, kind: input, shape index: {}]   ;;  %s23_s1 = inlined_call_operand.vmem [shape: f32[4,128], index: 1, kind: output, shape index: {}]  }
   0x1   :  { %v4_v0 = vld [vmem:[%s22_s0] ss:$0 sm:$0xff] }
   0x2   :  { %5 = vst [vmem:[%s23_s1] sm:$0xf] %v4_v0 }

// kernel: column_decoder_forward.1
= control target key start
LH: loop header
LB: loop body
LE: loop exit
PB: predicated region body
PF: predicated region fallthrough
CT: control target
= control target key end

     0   :  { %vm1269_vm0 = vcmask 1043456   ;;  %vm1265_vm1 = vcmask 64512   ;;  %vm2010_vm2 = vcmask 130048   ;;  %s8744_s3 = inlined_call_operand.vmem [shape: bf16[256,256], index: 3, kind: input, shape index: {}]   ;;  %s8745_s0 = inlined_call_operand.vmem [shape: bf16[8,256], index: 0, kind: input, shape index: {}]   ;;  %s8746_s5 = inlined_call_operand.vmem [shape: bf16[256,256], index: 5, kind: input, shape index: {}]   ;;  %s8747_s7 = inlined_call_operand.vmem [shape: bf16[256,512], index: 7, kind: input, shape index: {}]   ;;  %s8748_s4 = inlined_call_operand.vmem [shape: f32[1,256], index: 4, kind: input, shape index: {}]   ;;  %s8749_s10 = inlined_call_operand.vmem [shape: bf16[8,1024], index: 10, kind: input, shape index: {}]   ;;  %s8750_s6 = inlined_call_operand.vmem [shape: f32[1,256], index: 6, kind: input, shape index: {}]   ;;  %s8751_s9 = inlined_call_operand.vmem [shape: bf16[128,1024], index: 9, kind: input, shape index: {}]   ;;  %s8752_s1 = inlined_call_operand.vmem [shape: bf16[4,8,8], index: 1, kind: input, shape index: {}]   ;;  %s8753_s13 = inlined_call_operand.vmem [shape: bf16[16,256], index: 13, kind: input, shape index: {}]   ;;  %s8754_s12 = inlined_call_operand.vmem [shape: bf16[1024,256], index: 12, kind: input, shape index: {}]   ;;  %s8755_s8 = inlined_call_operand.vmem [shape: f32[1,512], index: 8, kind: input, shape index: {}]   ;;  %s8756_s2 = inlined_call_operand.vmem [shape: bf16[4,8,16], index: 2, kind: input, shape index: {}]   ;;  %s8757_s11 = inlined_call_operand.vmem [shape: f32[1,1024], index: 11, kind: input, shape index: {}]   ;;  %s8758_s14 = inlined_call_operand.vmem [shape: f32[1,256], index: 14, kind: input, shape index: {}]   ;;  %s8759_s15 = inlined_call_operand.vmem [shape: f32[8,1024], index: 15, kind: output, shape index: {}]  }
   0x1   :  { %v4945_v0 = vld [vmem:[%s8744_s3 + $0x74] ss:$8 sps:$4 sm:$0xff]   ;;  %v4947_v1 = vld [vmem:[%s8744_s3 + $0x70] ss:$8 sps:$4 sm:$0xff]   ;;  %v4948_v2 = vld [vmem:[%s8744_s3 + $0x64] ss:$8 sps:$4 sm:$0xff]  }
   0x2   :  { %263 = vmatprep.subr.bf16.mxu0 %v4945_v0  ;;  %v4950_v3 = vld [vmem:[%s8744_s3 + $0x60] ss:$8 sps:$4 sm:$0xff]   ;;  %v4951_v4 = vld [vmem:[%s8744_s3 + $0x54] ss:$8 sps:$4 sm:$0xff]   ;;  %v4953_v5 = vld [vmem:[%s8744_s3 + $0x50] ss:$8 sps:$4 sm:$0xff]  }
   0x3   :  { %264 = vmatpush1.bf16.msra.mxu0 %v4947_v1  ;;  %v4954_v6 = vld [vmem:[%s8744_s3 + $0x44] ss:$8 sps:$4 sm:$0xff]   ;;  %v4956_v7 = vld [vmem:[%s8744_s3 + $0x40] ss:$8 sps:$4 sm:$0xff]   ;;  %v4957_v8 = vld [vmem:[%s8744_s3 + $0x34] ss:$8 sps:$4 sm:$0xff]  }
   0x4   :  { %265 = vmatprep.subr.bf16.mxu0 %v4948_v2  ;;  %v4959_v9 = vld [vmem:[%s8744_s3 + $0x30] ss:$8 sps:$4 sm:$0xff]   ;;  %v4960_v10 = vld [vmem:[%s8744_s3 + $0x24] ss:$8 sps:$4 sm:$0xff]   ;;  %v4962_v11 = vld [vmem:[%s8744_s3 + $0x20] ss:$8 sps:$4 sm:$0xff]  }
   0x5   :  { %v4963_v12 = vld [vmem:[%s8744_s3 + $0x14] ss:$8 sps:$4 sm:$0xff]   ;;  %v4965_v13 = vld [vmem:[%s8744_s3 + $0x10] ss:$8 sps:$4 sm:$0xff]   ;;  %v5598_v14 = vld [vmem:[%s8745_s0] sm:$0xff] }
   0x6   :  { %v4571_v15 = vcombine.high %v5598_v14, %v5598_v14  ;;  %v4995_v16 = vld [vmem:[%s8746_s5 + $0x74] ss:$8 sps:$4 sm:$0xff]   ;;  %v4997_v17 = vld [vmem:[%s8746_s5 + $0x70] ss:$8 sps:$4 sm:$0xff]   ;;  %v4998_v18 = vld [vmem:[%s8746_s5 + $0x64] ss:$8 sps:$4 sm:$0xff]   ;;  %v4570_v55 = vcombine.low %v5598_v14, %v5598_v14 }
   0x7   :  { %266 = vmatpush1.bf16.msra.mxu0 %v4950_v3  ;;  %v4966_v19 = vld [vmem:[%s8744_s3 + $0x4] ss:$8 sps:$4 sm:$0xff]   ;;  %512 = vmatprep.subr.bf16.mxu1 %v4995_v16  ;;  %v4968_v20 = vld [vmem:[%s8744_s3] ss:$8 sps:$4 sm:$0xff]   ;;  %v5001_v22 = vld [vmem:[%s8746_s5 + $0x54] ss:$8 sps:$4 sm:$0xff]  }
   0x8   :  { %267 = vmatprep.subr.bf16.mxu0 %v4951_v4  ;;  %295 = vmatprep.mubr.bf16.mxu0 %v4571_v15  ;;  %v5000_v21 = vld [vmem:[%s8746_s5 + $0x60] ss:$8 sps:$4 sm:$0xff]   ;;  %v4969_v23 = vld [vmem:[%s8744_s3 + $0xf4] ss:$8 sps:$4 sm:$0xff]   ;;  %v4971_v24 = vld [vmem:[%s8744_s3 + $0xf0] ss:$8 sps:$4 sm:$0xff]  }
   0x9   :  { %513 = vmatpush1.bf16.msra.mxu1 %v4997_v17  ;;  %v5003_v25 = vld [vmem:[%s8746_s5 + $0x50] ss:$8 sps:$4 sm:$0xff]   ;;  %v5004_v26 = vld [vmem:[%s8746_s5 + $0x44] ss:$8 sps:$4 sm:$0xff]   ;;  %v4974_v28 = vld [vmem:[%s8744_s3 + $0xe0] ss:$8 sps:$4 sm:$0xff]  }
   0xa   :  { %514 = vmatprep.subr.bf16.mxu1 %v4998_v18  ;;  %v4972_v27 = vld [vmem:[%s8744_s3 + $0xe4] ss:$8 sps:$4 sm:$0xff]   ;;  %v5006_v29 = vld [vmem:[%s8746_s5 + $0x40] ss:$8 sps:$4 sm:$0xff]   ;;  %v5007_v30 = vld [vmem:[%s8746_s5 + $0x34] ss:$8 sps:$4 sm:$0xff]  }
   0xb   :  { %268 = vmatpush1.bf16.msra.mxu0 %v4953_v5  ;;  %v4975_v31 = vld [vmem:[%s8744_s3 + $0xd4] ss:$8 sps:$4 sm:$0xff]   ;;  %v4977_v32 = vld [vmem:[%s8744_s3 + $0xd0] ss:$8 sps:$4 sm:$0xff]   ;;  %v5010_v34 = vld [vmem:[%s8746_s5 + $0x24] ss:$8 sps:$4 sm:$0xff]  }
   0xc   :  { %269 = vmatprep.subr.bf16.mxu0 %v4954_v6  ;;  %v5009_v33 = vld [vmem:[%s8746_s5 + $0x30] ss:$8 sps:$4 sm:$0xff]   ;;  %v4978_v35 = vld [vmem:[%s8744_s3 + $0xc4] ss:$8 sps:$4 sm:$0xff]   ;;  %v5012_v36 = vld [vmem:[%s8746_s5 + $0x20] ss:$8 sps:$4 sm:$0xff]  }
   0xd   :  { %515 = vmatpush1.bf16.msra.mxu1 %v5000_v21  ;;  %v4980_v37 = vld [vmem:[%s8744_s3 + $0xc0] ss:$8 sps:$4 sm:$0xff]   ;;  %v5013_v38 = vld [vmem:[%s8746_s5 + $0x14] ss:$8 sps:$4 sm:$0xff]   ;;  %v5015_v40 = vld [vmem:[%s8746_s5 + $0x10] ss:$8 sps:$4 sm:$0xff]  }
   0xe   :  { %516 = vmatprep.subr.bf16.mxu1 %v5001_v22  ;;  %v4981_v39 = vld [vmem:[%s8744_s3 + $0xb4] ss:$8 sps:$4 sm:$0xff]   ;;  %v4983_v41 = vld [vmem:[%s8744_s3 + $0xb0] ss:$8 sps:$4 sm:$0xff]   ;;  %v5016_v42 = vld [vmem:[%s8746_s5 + $0x4] ss:$8 sps:$4 sm:$0xff]  }
   0xf   :  { %270 = vmatpush1.bf16.msra.mxu0 %v4956_v7  ;;  %v4984_v43 = vld [vmem:[%s8744_s3 + $0xa4] ss:$8 sps:$4 sm:$0xff]   ;;  %v5018_v44 = vld [vmem:[%s8746_s5] ss:$8 sps:$4 sm:$0xff]   ;;  %v5019_v46 = vld [vmem:[%s8746_s5 + $0xf4] ss:$8 sps:$4 sm:$0xff]  }
  0x10   :  { %271 = vmatprep.subr.bf16.mxu0 %v4957_v8  ;;  %v4986_v45 = vld [vmem:[%s8744_s3 + $0xa0] ss:$8 sps:$4 sm:$0xff]   ;;  %v4987_v47 = vld [vmem:[%s8744_s3 + $0x94] ss:$8 sps:$4 sm:$0xff]   ;;  %v5021_v48 = vld [vmem:[%s8746_s5 + $0xf0] ss:$8 sps:$4 sm:$0xff]  }
  0x11   :  { %517 = vmatpush1.bf16.msra.mxu1 %v5003_v25  ;;  %v4989_v49 = vld [vmem:[%s8744_s3 + $0x90] ss:$8 sps:$4 sm:$0xff]   ;;  %v5022_v50 = vld [vmem:[%s8746_s5 + $0xe4] ss:$8 sps:$4 sm:$0xff]   ;;  %v5024_v52 = vld [vmem:[%s8746_s5 + $0xe0] ss:$8 sps:$4 sm:$0xff]  }
  0x12   :  { %518 = vmatprep.subr.bf16.mxu1 %v5004_v26  ;;  %v4990_v51 = vld [vmem:[%s8744_s3 + $0x84] ss:$8 sps:$4 sm:$0xff]   ;;  %v4992_v53 = vld [vmem:[%s8744_s3 + $0x80] ss:$8 sps:$4 sm:$0xff]   ;;  %v5025_v54 = vld [vmem:[%s8746_s5 + $0xd4] ss:$8 sps:$4 sm:$0xff]  }
  0x13   :  { %272 = vmatpush1.bf16.msra.mxu0 %v4959_v9  ;;  %v5027_v56 = vld [vmem:[%s8746_s5 + $0xd0] ss:$8 sps:$4 sm:$0xff]   ;;  %v5028_v57 = vld [vmem:[%s8746_s5 + $0xc4] ss:$8 sps:$4 sm:$0xff]   ;;  %v5030_v58 = vld [vmem:[%s8746_s5 + $0xc0] ss:$8 sps:$4 sm:$0xff]  }
  0x14   :  { %273 = vmatprep.subr.bf16.mxu0 %v4960_v10  ;;  %v5031_v59 = vld [vmem:[%s8746_s5 + $0xb4] ss:$8 sps:$4 sm:$0xff]   ;;  %v5033_v60 = vld [vmem:[%s8746_s5 + $0xb0] ss:$8 sps:$4 sm:$0xff]   ;;  %v5034_v61 = vld [vmem:[%s8746_s5 + $0xa4] ss:$8 sps:$4 sm:$0xff]  }
  0x15   :  { %519 = vmatpush1.bf16.msra.mxu1 %v5006_v29  ;;  %v5036_v62 = vld [vmem:[%s8746_s5 + $0xa0] ss:$8 sps:$4 sm:$0xff]   ;;  %v5037_v63 = vld [vmem:[%s8746_s5 + $0x94] ss:$8 sps:$4 sm:$0xff]   ;;  %v5039_v0 = vld [vmem:[%s8746_s5 + $0x90] ss:$8 sps:$4 sm:$0xff]  }
  0x16   :  { %520 = vmatprep.subr.bf16.mxu1 %v5007_v30  ;;  %v5040_v1 = vld [vmem:[%s8746_s5 + $0x84] ss:$8 sps:$4 sm:$0xff]   ;;  %v5042_v2 = vld [vmem:[%s8746_s5 + $0x80] ss:$8 sps:$4 sm:$0xff]  }
  0x17   :  { %274 = vmatpush1.bf16.msra.mxu0 %v4962_v11  ;;  %v5043_v3 = vld [vmem:[%s8747_s7 + $0xe0] ss:$16 sps:$4 sm:$0xff]   ;;  %v5045_v4 = vld [vmem:[%s8747_s7 + $0xe4] ss:$16 sps:$4 sm:$0xff]   ;;  %v5048_v5 = vld [vmem:[%s8747_s7 + $0xec] ss:$16 sps:$4 sm:$0xff]  }
  0x18   :  { %275 = vmatprep.subr.bf16.mxu0 %v4963_v12  ;;  %v5051_v6 = vld [vmem:[%s8747_s7 + $0xc4] ss:$16 sps:$4 sm:$0xff]   ;;  %v5049_v7 = vld [vmem:[%s8747_s7 + $0xc0] ss:$16 sps:$4 sm:$0xff]  }
  0x19   :  { %521 = vmatpush1.bf16.msra.mxu1 %v5009_v33  ;;  %v5057_v8 = vld [vmem:[%s8747_s7 + $0xa4] ss:$16 sps:$4 sm:$0xff]   ;;  %v5055_v9 = vld [vmem:[%s8747_s7 + $0xa0] ss:$16 sps:$4 sm:$0xff]  }
  0x1a   :  { %522 = vmatprep.subr.bf16.mxu1 %v5010_v34  ;;  %v5063_v10 = vld [vmem:[%s8747_s7 + $0x84] ss:$16 sps:$4 sm:$0xff]   ;;  %v5061_v11 = vld [vmem:[%s8747_s7 + $0x80] ss:$16 sps:$4 sm:$0xff]  }
  0x1b   :  { %276 = vmatpush1.bf16.msra.mxu0 %v4965_v13  ;;  %v5069_v12 = vld [vmem:[%s8747_s7 + $0x64] ss:$16 sps:$4 sm:$0xff]   ;;  %v5067_v13 = vld [vmem:[%s8747_s7 + $0x60] ss:$16 sps:$4 sm:$0xff]  }
  0x1c   :  { %277 = vmatprep.subr.bf16.mxu0 %v4966_v19  ;;  %v5075_v14 = vld [vmem:[%s8747_s7 + $0x44] ss:$16 sps:$4 sm:$0xff]   ;;  %v5073_v15 = vld [vmem:[%s8747_s7 + $0x40] ss:$16 sps:$4 sm:$0xff]  }
  0x1d   :  { %523 = vmatpush1.bf16.msra.mxu1 %v5012_v36  ;;  %v5081_v16 = vld [vmem:[%s8747_s7 + $0x24] ss:$16 sps:$4 sm:$0xff]   ;;  %v5079_v17 = vld [vmem:[%s8747_s7 + $0x20] ss:$16 sps:$4 sm:$0xff]  }
  0x1e   :  { %524 = vmatprep.subr.bf16.mxu1 %v5013_v38  ;;  %v5087_v18 = vld [vmem:[%s8747_s7 + $0x4] ss:$16 sps:$4 sm:$0xff]   ;;  %v5085_v19 = vld [vmem:[%s8747_s7] ss:$16 sps:$4 sm:$0xff]  }
  0x1f   :  { %278 = vmatpush1.bf16.msra.mxu0 %v4968_v20  ;;  %v5093_v20 = vld [vmem:[%s8747_s7 + $0x1e4] ss:$16 sps:$4 sm:$0xff]   ;;  %v5091_v21 = vld [vmem:[%s8747_s7 + $0x1e0] ss:$16 sps:$4 sm:$0xff]  }
  0x20   :  { %279 = vmatprep.subr.bf16.mxu0 %v4969_v23  ;;  %v5099_v22 = vld [vmem:[%s8747_s7 + $0x1c4] ss:$16 sps:$4 sm:$0xff]   ;;  %v5097_v23 = vld [vmem:[%s8747_s7 + $0x1c0] ss:$16 sps:$4 sm:$0xff]  }
  0x21   :  { %525 = vmatpush1.bf16.msra.mxu1 %v5015_v40  ;;  %v5103_v25 = vld [vmem:[%s8747_s7 + $0x1a0] ss:$16 sps:$4 sm:$0xff]   ;;  %v5111_v26 = vld [vmem:[%s8747_s7 + $0x184] ss:$16 sps:$4 sm:$0xff]  }
  0x22   :  { %526 = vmatprep.subr.bf16.mxu1 %v5016_v42  ;;  %v5115_v29 = vld [vmem:[%s8747_s7 + $0x160] ss:$16 sps:$4 sm:$0xff]   ;;  %v5123_v30 = vld [vmem:[%s8747_s7 + $0x144] ss:$16 sps:$4 sm:$0xff]  }
  0x23   :  { %280 = vmatpush2.bf16.msra.mxu0 %v4971_v24  ;;  %v5105_v24 = vld [vmem:[%s8747_s7 + $0x1a4] ss:$16 sps:$4 sm:$0xff]  }
  0x24   :  { %281 = vmatprep.subr.bf16.mxu0 %v4972_v27  ;;  %v5109_v27 = vld [vmem:[%s8747_s7 + $0x180] ss:$16 sps:$4 sm:$0xff]  }
  0x25   :  { %527 = vmatpush1.bf16.msra.mxu1 %v5018_v44 }
  0x26   :  { %528 = vmatprep.subr.bf16.mxu1 %v5019_v46 }
  0x27   :  { %282 = vmatpush2.bf16.msra.mxu0 %v4974_v28  ;;  %v5117_v28 = vld [vmem:[%s8747_s7 + $0x164] ss:$16 sps:$4 sm:$0xff]  }
  0x28   :  { %283 = vmatprep.subr.bf16.mxu0 %v4975_v31  ;;  %v5121_v31 = vld [vmem:[%s8747_s7 + $0x140] ss:$16 sps:$4 sm:$0xff]  }
  0x29   :  { %529 = vmatpush2.bf16.msra.mxu1 %v5021_v48  ;;  %v5046_v48 = vld [vmem:[%s8747_s7 + $0xe8] ss:$16 sps:$4 sm:$0xff]  }
  0x2a   :  { %530 = vmatprep.subr.bf16.mxu1 %v5022_v50  ;;  %v5054_v50 = vld [vmem:[%s8747_s7 + $0xcc] ss:$16 sps:$4 sm:$0xff]  }
  0x2b   :  { %284 = vmatpush2.bf16.msra.mxu0 %v4977_v32  ;;  %v86_v32 = vlaneseq }
  0x2c   :  { %285 = vmatprep.subr.bf16.mxu0 %v4978_v35  ;;  %v84_v35 = vld [vmem:[%s8748_s4] sm:$0x3] }
  0x2d   :  { %531 = vmatpush2.bf16.msra.mxu1 %v5024_v52  ;;  %v5841_v33 = vshrl.u32 %v86_v32, 7  ;;  %v5060_v52 = vld [vmem:[%s8747_s7 + $0xac] ss:$16 sps:$4 sm:$0xff]  }
  0x2e   :  { %532 = vmatprep.subr.bf16.mxu1 %v5025_v54  ;;  %v5066_v54 = vld [vmem:[%s8747_s7 + $0x8c] ss:$16 sps:$4 sm:$0xff]  }
  0x2f   :  { %286 = vmatpush2.bf16.msra.mxu0 %v4980_v37  ;;  %v5844_v34 = vsub.s32 0, %v5841_v33  ;;  %v5850_v36 = vsub.s32 1, %v5841_v33 }
  0x30   :  { %287 = vmatprep.subr.bf16.mxu0 %v4981_v39 }
  0x31   :  { %533 = vmatpush2.bf16.msra.mxu1 %v5027_v56  ;;  %9107 = vst [vmem:[#allocation2_spill] sm:$0xff] %v5844_v34  ;;  %v89_v37 = vrot.slane %v84_v35, %v5844_v34  ;;  %v93_v38 = vrot.slane %v84_v35, %v5850_v36  ;;  %v5072_v56 = vld [vmem:[%s8747_s7 + $0x6c] ss:$16 sps:$4 sm:$0xff]  }
  0x32   :  { %534 = vmatprep.subr.bf16.mxu1 %v5028_v57  ;;  %v5070_v57 = vld [vmem:[%s8747_s7 + $0x68] ss:$16 sps:$4 sm:$0xff]  }
  0x33   :  { %288 = vmatpush2.bf16.msra.mxu0 %v4983_v41 }
  0x34   :  { %289 = vmatprep.subr.bf16.mxu0 %v4984_v43 }
  0x35   :  { %535 = vmatpush2.bf16.msra.mxu1 %v5030_v58  ;;  %v5078_v58 = vld [vmem:[%s8747_s7 + $0x4c] ss:$16 sps:$4 sm:$0xff]  }
  0x36   :  { %536 = vmatprep.subr.bf16.mxu1 %v5031_v59  ;;  %v5076_v59 = vld [vmem:[%s8747_s7 + $0x48] ss:$16 sps:$4 sm:$0xff]  }
  0x37   :  { %290 = vmatpush2.bf16.msra.mxu0 %v4986_v45 }
  0x38   :  { %291 = vmatprep.subr.bf16.mxu0 %v4987_v47 }
  0x39   :  { %537 = vmatpush2.bf16.msra.mxu1 %v5033_v60  ;;  %v5084_v60 = vld [vmem:[%s8747_s7 + $0x2c] ss:$16 sps:$4 sm:$0xff]  }
  0x3a   :  { %538 = vmatprep.subr.bf16.mxu1 %v5034_v61  ;;  %v5082_v61 = vld [vmem:[%s8747_s7 + $0x28] ss:$16 sps:$4 sm:$0xff]  }
  0x3b   :  { %292 = vmatpush2.bf16.msra.mxu0 %v4989_v49 }
  0x3c   :  { %293 = vmatprep.subr.bf16.mxu0 %v4990_v51  ;;  %v5052_v51 = vld [vmem:[%s8747_s7 + $0xc8] ss:$16 sps:$4 sm:$0xff]  }
  0x3d   :  { %539 = vmatpush2.bf16.msra.mxu1 %v5036_v62  ;;  %v5090_v62 = vld [vmem:[%s8747_s7 + $0xc] ss:$16 sps:$4 sm:$0xff]  }
  0x3e   :  { %540 = vmatprep.subr.bf16.mxu1 %v5037_v63  ;;  %v5088_v63 = vld [vmem:[%s8747_s7 + $0x8] ss:$16 sps:$4 sm:$0xff]  }
  0x3f   :  { %294 = vmatpush2.bf16.msra.mxu0 %v4992_v53  ;;  %v5058_v53 = vld [vmem:[%s8747_s7 + $0xa8] ss:$16 sps:$4 sm:$0xff]  }
  0x40   :  { %961 = vmatprep.subr.bf16.mxu0 %v5045_v4  ;;  %v5108_v4 = vld [vmem:[%s8747_s7 + $0x1ac] ss:$16 sps:$4 sm:$0xff]  }
  0x41   :  { %541 = vmatpush2.bf16.msra.mxu1 %v5039_v0  ;;  %v5096_v0 = vld [vmem:[%s8747_s7 + $0x1ec] ss:$16 sps:$4 sm:$0xff]  }
  0x42   :  { %296 = vmatmul.mubr.bf16.vlgmr.msra.gmra.mxu0 %v4570_v55  ;;  %542 = vmatprep.subr.bf16.mxu1 %v5040_v1  ;;  %v5064_v55 = vld [vmem:[%s8747_s7 + $0x88] ss:$16 sps:$4 sm:$0xff]  }
  0x43   :  { %962 = vmatpush1.bf16.msra.mxu0 %v5043_v3  ;;  %v5094_v1 = vld [vmem:[%s8747_s7 + $0x1e8] ss:$16 sps:$4 sm:$0xff]  }
  0x44   :  { %963 = vmatprep.subr.bf16.mxu0 %v5051_v6  ;;  %v5100_v3 = vld [vmem:[%s8747_s7 + $0x1c8] ss:$16 sps:$4 sm:$0xff]   ;;  %v5114_v6 = vld [vmem:[%s8747_s7 + $0x18c] ss:$16 sps:$4 sm:$0xff]  }
  0x45   :  { %543 = vmatpush2.bf16.msra.mxu1 %v5042_v2  ;;  %v5102_v2 = vld [vmem:[%s8747_s7 + $0x1cc] ss:$16 sps:$4 sm:$0xff]  }
  0x46   :  { %1002 = vmatprep.subr.bf16.mxu1 %v5048_v5  ;;  %v5106_v5 = vld [vmem:[%s8747_s7 + $0x1a8] ss:$16 sps:$4 sm:$0xff]  }
  0x47   :  { %964 = vmatpush1.bf16.msra.mxu0 %v5049_v7  ;;  %v5112_v7 = vld [vmem:[%s8747_s7 + $0x188] ss:$16 sps:$4 sm:$0xff]  }
  0x48   :  { %965 = vmatprep.subr.bf16.mxu0 %v5057_v8  ;;  %v5120_v8 = vld [vmem:[%s8747_s7 + $0x16c] ss:$16 sps:$4 sm:$0xff]  }
  0x4b   :  { %966 = vmatpush1.bf16.msra.mxu0 %v5055_v9  ;;  %v5118_v9 = vld [vmem:[%s8747_s7 + $0x168] ss:$16 sps:$4 sm:$0xff]  }
  0x4c   :  { %967 = vmatprep.subr.bf16.mxu0 %v5063_v10  ;;  %v5126_v10 = vld [vmem:[%s8747_s7 + $0x14c] ss:$16 sps:$4 sm:$0xff]  }
  0x4f   :  { %968 = vmatpush1.bf16.msra.mxu0 %v5061_v11  ;;  %v5124_v11 = vld [vmem:[%s8747_s7 + $0x148] ss:$16 sps:$4 sm:$0xff]  }
  0x50   :  { %969 = vmatprep.subr.bf16.mxu0 %v5069_v12  ;;  %v5129_v12 = vld [vmem:[%s8747_s7 + $0x124] ss:$16 sps:$4 sm:$0xff]  }
  0x53   :  { %970 = vmatpush1.bf16.msra.mxu0 %v5067_v13  ;;  %v5132_v13 = vld [vmem:[%s8747_s7 + $0x12c] ss:$16 sps:$4 sm:$0xff]  }
  0x54   :  { %971 = vmatprep.subr.bf16.mxu0 %v5075_v14  ;;  %v5127_v14 = vld [vmem:[%s8747_s7 + $0x120] ss:$16 sps:$4 sm:$0xff]  }
  0x57   :  { %972 = vmatpush1.bf16.msra.mxu0 %v5073_v15  ;;  %v5130_v15 = vld [vmem:[%s8747_s7 + $0x128] ss:$16 sps:$4 sm:$0xff]  }
  0x58   :  { %973 = vmatprep.subr.bf16.mxu0 %v5081_v16  ;;  %v5135_v16 = vld [vmem:[%s8747_s7 + $0x104] ss:$16 sps:$4 sm:$0xff]  }
  0x5b   :  { %974 = vmatpush1.bf16.msra.mxu0 %v5079_v17  ;;  %v5138_v17 = vld [vmem:[%s8747_s7 + $0x10c] ss:$16 sps:$4 sm:$0xff]  }
  0x5c   :  { %975 = vmatprep.subr.bf16.mxu0 %v5087_v18  ;;  %v5133_v18 = vld [vmem:[%s8747_s7 + $0x100] ss:$16 sps:$4 sm:$0xff]  }
  0x5f   :  { %976 = vmatpush1.bf16.msra.mxu0 %v5085_v19  ;;  %v5136_v19 = vld [vmem:[%s8747_s7 + $0x108] ss:$16 sps:$4 sm:$0xff]  }
  0x60   :  { %977 = vmatprep.subr.bf16.mxu0 %v5093_v20  ;;  %v1107_v20 = vld [vmem:[%s8749_s10] sm:$0xff] }
  0x63   :  { %978 = vmatpush2.bf16.msra.mxu0 %v5091_v21  ;;  %v1108_v21 = vld [vmem:[%s8749_s10 + $0x8] sm:$0xff] }
  0x64   :  { %979 = vmatprep.subr.bf16.mxu0 %v5099_v22  ;;  %v5965_v22 = vcombine.high %v1107_v20, %v1107_v20  ;;  %v4702_v32 = vcombine.low %v1108_v21, %v1108_v21 }
  0x67   :  { %980 = vmatpush2.bf16.msra.mxu0 %v5097_v23  ;;  %v5967_v23 = vcombine.high %v1108_v21, %v1108_v21  ;;  %v1072_v21 = vld [vmem:[%s8751_s9 + $0xe8] sm:$0xff] }
  0x68   :  { %981 = vmatprep.subr.bf16.mxu0 %v5105_v24  ;;  %v340_v24 = vld [vmem:[%s8750_s6] sm:$0x3] }
  0x6b   :  { %982 = vmatpush2.bf16.msra.mxu0 %v5103_v25  ;;  %v345_v25 = vrot.slane %v340_v24, %v5844_v34 }
  0x6c   :  { %983 = vmatprep.subr.bf16.mxu0 %v5111_v26  ;;  %v349_v26 = vrot.slane %v340_v24, %v5850_v36 }
  0x6f   :  { %984 = vmatpush2.bf16.msra.mxu0 %v5109_v27 }
  0x70   :  { %985 = vmatprep.subr.bf16.mxu0 %v5117_v28 }
  0x73   :  { %986 = vmatpush2.bf16.msra.mxu0 %v5115_v29 }
  0x74   :  { %987 = vmatprep.subr.bf16.mxu0 %v5123_v30  ;;  %v4700_v30 = vcombine.low %v1107_v20, %v1107_v20  ;;  %v1068_v20 = vld [vmem:[%s8751_s9 + $0xc8] sm:$0xff] }
  0x77   :  { %988 = vmatpush2.bf16.msra.mxu0 %v5121_v31 }
  0x78   :  { %989 = vmatprep.subr.bf16.mxu0 %v5129_v12  ;;  %v1076_v12 = vld [vmem:[%s8751_s9 + $0x108] sm:$0xff] }
  0x7b   :  { %990 = vmatpush2.bf16.msra.mxu0 %v5127_v14 }
  0x7c   :  { %991 = vmatprep.subr.bf16.mxu0 %v5135_v16 }
  0x7f   :  { %992 = vmatpush2.bf16.msra.mxu0 %v5133_v18  ;;  %v1067_v18 = vld [vmem:[%s8751_s9 + $0xc0] sm:$0xff] }
  0x80   :  { %4708 = vmatprep.subr.msk.bf16.mxu0 %vm1269_vm0, %v5965_v22 }
 0x102   :  { %v297_v39 = vpop.f32.mrf.mxu0 }
 0x103   :  { %v298_v40 = vadd.f32 %v297_v39, %v89_v37  ;;  %v1109_v37 = vld [vmem:[%s8749_s10 + $0x10] sm:$0xff] }
 0x104   :  { %v299_v41 = vpop.f32.mrf.mxu0 }
 0x105   :  { %v300_v42 = vadd.f32 %v299_v41, %v93_v38  ;;  %v304_v43 = vmax.f32 %v298_v40, 0.0  ;;  %v1110_v38 = vld [vmem:[%s8749_s10 + $0x18] sm:$0xff] }
 0x106   :  { %v301_v44 = vpop.f32.mrf.mxu0 }
 0x107   :  { %v305_v45 = vmax.f32 %v300_v42, 0.0  ;;  %v338_v49 = vpack.c.bf16 %v304_v43, %v304_v43  ;;  %v5985_v42 = vsel %vm1269_vm0, %v4700_v30, 0  ;;  %v5988_v43 = vsel %vm1269_vm0, %v4702_v32, 0  ;;  %v1060_v30 = vld [vmem:[%s8751_s9 + $0x88] sm:$0xff] }
 0x108   :  { %v302_v46 = vpop.f32.mrf.mxu0  ;;  %v5990_v44 = vcombine.high %v1109_v37, %v1109_v37 }
 0x109   :  { %v339_v47 = vpack.c.bf16 %v305_v45, %v305_v45  ;;  %v5992_v45 = vcombine.high %v1110_v38, %v1110_v38  ;;  %v8762_v46 = vmov 0  }
 0x10b   :  { %544 = vmatprep.mubr.bf16.mxu1 %v339_v47  ;;  %v4704_v47 = vcombine.low %v1109_v37, %v1109_v37 }
 0x10c   :  { %545 = vmatmul.mubr.bf16.vlgmr.msra.gmra.mxu1 %v338_v49  ;;  %v1099_v49 = vld [vmem:[%s8751_s9 + $0x1c0] sm:$0xff] }
 0x10d   :  { %1003 = vmatpush1.bf16.msra.mxu1 %v5046_v48  ;;  %v4706_v48 = vcombine.low %v1110_v38, %v1110_v38 }
 0x10e   :  { %1004 = vmatprep.subr.bf16.mxu1 %v5054_v50  ;;  %v1103_v50 = vld [vmem:[%s8751_s9 + $0x1e0] sm:$0xff] }
 0x111   :  { %1005 = vmatpush1.bf16.msra.mxu1 %v5052_v51  ;;  %v1100_v51 = vld [vmem:[%s8751_s9 + $0x1c8] sm:$0xff] }
 0x112   :  { %1006 = vmatprep.subr.bf16.mxu1 %v5060_v52  ;;  %v1104_v52 = vld [vmem:[%s8751_s9 + $0x1e8] sm:$0xff] }
 0x115   :  { %1007 = vmatpush1.bf16.msra.mxu1 %v5058_v53  ;;  %v1244_v53 = vld [vmem:[%s8752_s1] sm:$0xf] }
 0x116   :  { %1008 = vmatprep.subr.bf16.mxu1 %v5066_v54  ;;  %v6018_v54 = vsel %vm1269_vm0, %v4704_v47, 0  ;;  %v1056_v47 = vld [vmem:[%s8751_s9 + $0x68] sm:$0xff] }
 0x119   :  { %1009 = vmatpush1.bf16.msra.mxu1 %v5064_v55  ;;  %v6021_v55 = vsel %vm1269_vm0, %v4706_v48, 0 }
 0x11a   :  { %1010 = vmatprep.subr.bf16.mxu1 %v5072_v56  ;;  %v6023_v56 = vcombine.high %v1099_v49, %v1103_v50 }
 0x11d   :  { %1011 = vmatpush1.bf16.msra.mxu1 %v5070_v57  ;;  %v6025_v57 = vcombine.high %v1100_v51, %v1104_v52 }
 0x11e   :  { %1012 = vmatprep.subr.bf16.mxu1 %v5078_v58  ;;  %v1091_v58 = vld [vmem:[%s8751_s9 + $0x180] sm:$0xff] }
 0x121   :  { %1013 = vmatpush1.bf16.msra.mxu1 %v5076_v59  ;;  %v1095_v59 = vld [vmem:[%s8751_s9 + $0x1a0] sm:$0xff] }
 0x122   :  { %1014 = vmatprep.subr.bf16.mxu1 %v5084_v60  ;;  %v1092_v60 = vld [vmem:[%s8751_s9 + $0x188] sm:$0xff] }
 0x125   :  { %1015 = vmatpush1.bf16.msra.mxu1 %v5082_v61  ;;  %v1096_v61 = vld [vmem:[%s8751_s9 + $0x1a8] sm:$0xff] }
 0x126   :  { %1016 = vmatprep.subr.bf16.mxu1 %v5090_v62  ;;  %v6047_v62 = vcombine.low %v1099_v49, %v1103_v50 }
 0x129   :  { %1017 = vmatpush1.bf16.msra.mxu1 %v5088_v63  ;;  %v6049_v63 = vcombine.low %v1100_v51, %v1104_v52 }
 0x12a   :  { %1018 = vmatprep.subr.bf16.mxu1 %v5096_v0  ;;  %v6051_v0 = vcombine.high %v1091_v58, %v1095_v59 }
 0x12d   :  { %1019 = vmatpush2.bf16.msra.mxu1 %v5094_v1  ;;  %v6053_v1 = vcombine.high %v1092_v60, %v1096_v61 }
 0x12e   :  { %1020 = vmatprep.subr.bf16.mxu1 %v5102_v2  ;;  %v1083_v2 = vld [vmem:[%s8751_s9 + $0x140] sm:$0xff] }
 0x131   :  { %1021 = vmatpush2.bf16.msra.mxu1 %v5100_v3  ;;  %v1087_v3 = vld [vmem:[%s8751_s9 + $0x160] sm:$0xff] }
 0x132   :  { %1022 = vmatprep.subr.bf16.mxu1 %v5108_v4  ;;  %v1084_v4 = vld [vmem:[%s8751_s9 + $0x148] sm:$0xff]  ;;  %v6097_v14 = vcombine.low %v1083_v2, %v1087_v3 }
 0x134   :  { %9108 = vst [vmem:[#allocation3_spill] sm:$0xff] %v6097_v14 }
 0x135   :  { %1023 = vmatpush2.bf16.msra.mxu1 %v5106_v5  ;;  %v1088_v5 = vld [vmem:[%s8751_s9 + $0x168] sm:$0xff] }
 0x136   :  { %1024 = vmatprep.subr.bf16.mxu1 %v5114_v6  ;;  %v6071_v6 = vcombine.low %v1091_v58, %v1095_v59  ;;  %v1043_v58 = vld [vmem:[%s8751_s9] sm:$0xff] }
 0x137   :  { %v1047_v59 = vld [vmem:[%s8751_s9 + $0x20] sm:$0xff] }
 0x139   :  { %1025 = vmatpush2.bf16.msra.mxu1 %v5112_v7  ;;  %v6073_v7 = vcombine.low %v1092_v60, %v1096_v61  ;;  %v1044_v60 = vld [vmem:[%s8751_s9 + $0x8] sm:$0xff]  ;;  %v6198_v61 = vcombine.high %v1043_v58, %v1047_v59 }
 0x13a   :  { %1026 = vmatprep.subr.bf16.mxu1 %v5120_v8  ;;  %v6077_v8 = vcombine.high %v1083_v2, %v1087_v3  ;;  %v1048_v2 = vld [vmem:[%s8751_s9 + $0x28] sm:$0xff] }
 0x13b   :  { %9126 = vst [vmem:[#allocation21_spill] sm:$0xff] %v6198_v61  ;;  %v6203_v3 = vcombine.high %v1044_v60, %v1048_v2 }
 0x13d   :  { %1027 = vmatpush2.bf16.msra.mxu1 %v5118_v9  ;;  %v6079_v9 = vcombine.high %v1084_v4, %v1088_v5  ;;  %9127 = vst [vmem:[#allocation22_spill] sm:$0xff] %v6203_v3 }
 0x13e   :  { %1028 = vmatprep.subr.bf16.mxu1 %v5126_v10  ;;  %v1075_v10 = vld [vmem:[%s8751_s9 + $0x100] sm:$0xff] }
 0x141   :  { %1029 = vmatpush2.bf16.msra.mxu1 %v5124_v11  ;;  %v1079_v11 = vld [vmem:[%s8751_s9 + $0x120] sm:$0xff] }
 0x142   :  { %1030 = vmatprep.subr.bf16.mxu1 %v5132_v13  ;;  %v1080_v13 = vld [vmem:[%s8751_s9 + $0x128] sm:$0xff]  ;;  %v6103_v16 = vcombine.high %v1075_v10, %v1079_v11  ;;  %v6121_v24 = vcombine.low %v1075_v10, %v1079_v11  ;;  %v1101_v10 = vld [vmem:[%s8751_s9 + $0x1d0] sm:$0xff] }
 0x143   :  { %v1105_v11 = vld [vmem:[%s8751_s9 + $0x1f0] sm:$0xff] }
 0x144   :  { %9110 = vst [vmem:[#allocation5_spill] sm:$0xff] %v6103_v16  ;;  %9112 = vst [vmem:[#allocation7_spill] sm:$0xff] %v6121_v24 }
 0x145   :  { %1031 = vmatpush2.bf16.msra.mxu1 %v5130_v15  ;;  %v6099_v15 = vcombine.low %v1084_v4, %v1088_v5  ;;  %v6205_v4 = vcombine.low %v1043_v58, %v1047_v59  ;;  %v6207_v5 = vcombine.low %v1044_v60, %v1048_v2  ;;  %v1097_v59 = vld [vmem:[%s8751_s9 + $0x1b0] sm:$0xff]  ;;  %v1094_v60 = vld [vmem:[%s8751_s9 + $0x198] sm:$0xff] }
 0x146   :  { %1032 = vmatprep.subr.bf16.mxu1 %v5138_v17  ;;  %v6105_v17 = vcombine.high %v1076_v12, %v1080_v13  ;;  %v1098_v2 = vld [vmem:[%s8751_s9 + $0x1b8] sm:$0xff] }
 0x147   :  { %9109 = vst [vmem:[#allocation4_spill] sm:$0xff] %v6099_v15  ;;  %9128 = vst [vmem:[#allocation23_spill] sm:$0xff] %v6205_v4 }
 0x148   :  { %9111 = vst [vmem:[#allocation6_spill] sm:$0xff] %v6105_v17  ;;  %9129 = vst [vmem:[#allocation24_spill] sm:$0xff] %v6207_v5 }
 0x149   :  { %1033 = vmatpush2.bf16.msra.mxu1 %v5136_v19  ;;  %v1071_v19 = vld [vmem:[%s8751_s9 + $0xe0] sm:$0xff] }
 0x14a   :  { %4710 = vmatprep.subr.msk.bf16.mxu1 %vm1269_vm0, %v5967_v23  ;;  %v6145_v32 = vcombine.low %v1067_v18, %v1071_v19 }
 0x14c   :  { %9116 = vst [vmem:[#allocation11_spill] sm:$0xff] %v6145_v32 }
 0x1cc   :  { %v546_v27 = vpop.f32.mrf.mxu1 }
 0x1cd   :  { %v547_v28 = vadd.f32 %v546_v27, %v345_v25  ;;  %v6123_v25 = vcombine.low %v1076_v12, %v1080_v13  ;;  %v6129_v27 = vcombine.high %v1068_v20, %v1072_v21  ;;  %v1102_v12 = vld [vmem:[%s8751_s9 + $0x1d8] sm:$0xff]  ;;  %v6222_v13 = vcombine.high %v1101_v10, %v1105_v11 }
 0x1ce   :  { %v548_v29 = vpop.f32.mrf.mxu1 }
 0x1cf   :  { %v549_v31 = vadd.f32 %v548_v29, %v349_v26  ;;  %v617_v40 = vpack.c.bf16 %v547_v28, %v547_v28  ;;  %9113 = vst [vmem:[#allocation8_spill] sm:$0xff] %v6123_v25  ;;  %v6127_v26 = vcombine.high %v1067_v18, %v1071_v19  ;;  %9115 = vst [vmem:[#allocation10_spill] sm:$0xff] %v6129_v27  ;;  %v1059_v28 = vld [vmem:[%s8751_s9 + $0x80] sm:$0xff]  ;;  %v1106_v18 = vld [vmem:[%s8751_s9 + $0x1f8] sm:$0xff] }
 0x1d0   :  { %v550_v35 = vpop.f32.mrf.mxu1  ;;  %v1063_v29 = vld [vmem:[%s8751_s9 + $0xa0] sm:$0xff]  ;;  %9130 = vst [vmem:[#allocation25_spill] sm:$0xff] %v6222_v13  ;;  %v6227_v19 = vcombine.high %v1102_v12, %v1106_v18 }
 0x1d1   :  { %v618_v39 = vpack.c.bf16 %v549_v31, %v549_v31  ;;  %9114 = vst [vmem:[#allocation9_spill] sm:$0xff] %v6127_v26  ;;  %v1064_v31 = vld [vmem:[%s8751_s9 + $0xa8] sm:$0xff]  ;;  %v6147_v35 = vcombine.low %v1068_v20, %v1072_v21  ;;  %v6151_v37 = vcombine.high %v1059_v28, %v1063_v29  ;;  %v6169_v48 = vcombine.low %v1059_v28, %v1063_v29  ;;  %v6239_v29 = vld [vmem:[%s8755_s8] sm:$0xf] }
 0x1d2   :  { %v551_v41 = vpop.f32.mrf.mxu1  ;;  %v6153_v38 = vcombine.high %v1060_v30, %v1064_v31  ;;  %v6171_v49 = vcombine.low %v1060_v30, %v1064_v31  ;;  %9131 = vst [vmem:[#allocation26_spill] sm:$0xff] %v6227_v19  ;;  %v6229_v20 = vcombine.low %v1101_v10, %v1105_v11  ;;  %v6232_v21 = vcombine.low %v1102_v12, %v1106_v18 }
 0x1d3   :  { %993 = vmatprep.mubr.bf16.mxu0 %v618_v39  ;;  %1034 = vmatprep.mubr.bf16.mxu1 %v618_v39  ;;  %9117 = vst [vmem:[#allocation12_spill] sm:$0xff] %v6147_v35  ;;  %9118 = vst [vmem:[#allocation13_spill] sm:$0xff] %v6151_v37  ;;  %v1051_v39 = vld [vmem:[%s8751_s9 + $0x40] sm:$0xff]  ;;  %v1052_v41 = vld [vmem:[%s8751_s9 + $0x48] sm:$0xff]  ;;  %v8761_v28 = vsub.s32 2, %v5841_v33  ;;  %v8760_v30 = vsub.s32 3, %v5841_v33  ;;  %v624_v31 = vrot.slane %v6239_v29, %v5844_v34 }
 0x1d4   :  { %994 = vmatmul.mubr.bf16.vlgmr.msra.gmra.mxu0 %v617_v40  ;;  %1035 = vmatmul.mubr.bf16.vlgmr.msra.gmra.mxu1 %v617_v40  ;;  %9119 = vst [vmem:[#allocation14_spill] sm:$0xff] %v6153_v38  ;;  %v1055_v40 = vld [vmem:[%s8751_s9 + $0x60] sm:$0xff]  ;;  %9120 = vst [vmem:[#allocation15_spill] sm:$0xff] %v6169_v48  ;;  %v6177_v51 = vcombine.high %v1052_v41, %v1056_v47 }
 0x1d5   :  { %1309 = vmatpush1.bf16.msra.mxu0 %v5985_v42  ;;  %1326 = vmatprep.mubr.bf16.mxu0 %v8762_v46  ;;  %9121 = vst [vmem:[#allocation16_spill] sm:$0xff] %v6171_v49  ;;  %v6175_v50 = vcombine.high %v1051_v39, %v1055_v40  ;;  %v6181_v52 = vcombine.low %v1051_v39, %v1055_v40  ;;  %9132 = vst [vmem:[#allocation27_spill] sm:$0xff] %v6229_v20 }
 0x1d6   :  { %1350 = vmatpush1.bf16.msra.mxu1 %v5988_v43  ;;  %1367 = vmatprep.mubr.bf16.mxu1 %v8762_v46  ;;  %9123 = vst [vmem:[#allocation18_spill] sm:$0xff] %v6177_v51  ;;  %9133 = vst [vmem:[#allocation28_spill] sm:$0xff] %v6232_v21  ;;  %v632_v39 = vrot.slane %v6239_v29, %v8761_v28  ;;  %v636_v40 = vrot.slane %v6239_v29, %v8760_v30 }
 0x1d7   :  { %4712 = vmatprep.subr.msk.bf16.mxu0 %vm1269_vm0, %v5990_v44  ;;  %4714 = vmatprep.subr.msk.bf16.mxu1 %vm1269_vm0, %v5992_v45  ;;  %9122 = vst [vmem:[#allocation17_spill] sm:$0xff] %v6175_v50  ;;  %9124 = vst [vmem:[#allocation19_spill] sm:$0xff] %v6181_v52 }
 0x1d8   :  { %9134 = vst [vmem:[#allocation29_spill] sm:$0xff] %v6239_v29 }
 0x1dc   :  { %4709 = vmatmul.mubr.msk.bf16.vlgmr.msra.gmra.mxu0 %vm1265_vm1, %v1244_v53  ;;  %4711 = vmatmul.mubr.msk.bf16.vlgmr.msra.gmra.mxu1 %vm1265_vm1, %v1244_v53 }
 0x1dd   :  { %1391 = vmatpush1.bf16.msra.mxu0 %v6018_v54  ;;  %1408 = vmatprep.mubr.bf16.mxu0 %v8762_v46 }
 0x1de   :  { %1432 = vmatpush1.bf16.msra.mxu1 %v6021_v55  ;;  %1449 = vmatprep.mubr.bf16.mxu1 %v8762_v46 }
 0x1df   :  { %1778 = vmatprep.subr.bf16.mxu0 %v6023_v56  ;;  %1819 = vmatprep.subr.bf16.mxu1 %v6025_v57 }
 0x1e4   :  { %4713 = vmatmul.mubr.msk.bf16.vlgmr.msra.gmra.mxu0 %vm1265_vm1, %v1244_v53  ;;  %4715 = vmatmul.mubr.msk.bf16.vlgmr.msra.gmra.mxu1 %vm1265_vm1, %v1244_v53  ;;  %v6183_v53 = vcombine.low %v1052_v41, %v1056_v47  ;;  %v1093_v41 = vld [vmem:[%s8751_s9 + $0x190] sm:$0xff] }
 0x1e5   :  { %1779 = vmatpush1.bf16.msra.mxu0 %v6047_v62  ;;  %1820 = vmatpush1.bf16.msra.mxu1 %v6049_v63 }
 0x1e6   :  { %1780 = vmatprep.subr.bf16.mxu0 %v6051_v0  ;;  %1821 = vmatprep.subr.bf16.mxu1 %v6053_v1  ;;  %9125 = vst [vmem:[#allocation20_spill] sm:$0xff] %v6183_v53 }
 0x1e7   :  { %1810 = vmatprep.mubr.bf16.mxu0 %v8762_v46  ;;  %1851 = vmatprep.mubr.bf16.mxu1 %v8762_v46  ;;  %v6270_v46 = vcombine.high %v1093_v41, %v1097_v59 }
 0x1e9   :  { %1781 = vmatpush1.bf16.msra.mxu0 %v6071_v6  ;;  %1822 = vmatpush1.bf16.msra.mxu1 %v6073_v7  ;;  %9138 = vst [vmem:[#allocation33_spill] sm:$0xff] %v6270_v46 }
 0x1ea   :  { %1782 = vmatprep.subr.bf16.mxu0 %v6077_v8  ;;  %1823 = vmatprep.subr.bf16.mxu1 %v6079_v9 }
 0x1ed   :  { %1783 = vmatpush1.bf16.msra.mxu0 %v6097_v14  ;;  %1824 = vmatpush1.bf16.msra.mxu1 %v6099_v15 }
 0x1ee   :  { %1784 = vmatprep.subr.bf16.mxu0 %v6103_v16  ;;  %1825 = vmatprep.subr.bf16.mxu1 %v6105_v17 }
 0x1f1   :  { %1785 = vmatpush1.bf16.msra.mxu0 %v6121_v24  ;;  %1826 = vmatpush1.bf16.msra.mxu1 %v6123_v25 }
 0x1f2   :  { %1786 = vmatprep.subr.bf16.mxu0 %v6127_v26  ;;  %1827 = vmatprep.subr.bf16.mxu1 %v6129_v27 }
 0x1f5   :  { %1787 = vmatpush1.bf16.msra.mxu0 %v6145_v32  ;;  %1828 = vmatpush1.bf16.msra.mxu1 %v6147_v35 }
 0x1f6   :  { %1788 = vmatprep.subr.bf16.mxu0 %v6151_v37  ;;  %1829 = vmatprep.subr.bf16.mxu1 %v6153_v38 }
 0x1f9   :  { %1789 = vmatpush1.bf16.msra.mxu0 %v6169_v48  ;;  %1830 = vmatpush1.bf16.msra.mxu1 %v6171_v49 }
 0x1fa   :  { %1790 = vmatprep.subr.bf16.mxu0 %v6175_v50  ;;  %1831 = vmatprep.subr.bf16.mxu1 %v6177_v51 }
 0x1fd   :  { %1791 = vmatpush1.bf16.msra.mxu0 %v6181_v52  ;;  %1832 = vmatpush1.bf16.msra.mxu1 %v6183_v53 }
 0x1fe   :  { %1792 = vmatprep.subr.bf16.mxu0 %v6198_v61  ;;  %1833 = vmatprep.subr.bf16.mxu1 %v6203_v3 }
 0x201   :  { %1793 = vmatpush1.bf16.msra.mxu0 %v6205_v4  ;;  %1834 = vmatpush1.bf16.msra.mxu1 %v6207_v5 }
 0x202   :  { %1860 = vmatprep.subr.bf16.mxu0 %v6222_v13  ;;  %1901 = vmatprep.subr.bf16.mxu1 %v6227_v19  ;;  %v6272_v19 = vcombine.high %v1094_v60, %v1098_v2  ;;  %v1085_v13 = vld [vmem:[%s8751_s9 + $0x150] sm:$0xff] }
 0x204   :  { %9139 = vst [vmem:[#allocation34_spill] sm:$0xff] %v6272_v19 }
 0x294   :  { %v995_v47 = vpop.f32.mrf.mxu0  ;;  %v1036_v58 = vpop.f32.mrf.mxu1 }
 0x295   :  { %v996_v10 = vadd.f32 %v995_v47, %v624_v31  ;;  %v6262_v11 = vadd.f32 %v1036_v58, %v632_v39  ;;  %v1089_v31 = vld [vmem:[%s8751_s9 + $0x170] sm:$0xff]  ;;  %v1086_v39 = vld [vmem:[%s8751_s9 + $0x158] sm:$0xff]  ;;  %v6290_v47 = vcombine.low %v1093_v41, %v1097_v59  ;;  %v6292_v58 = vcombine.low %v1094_v60, %v1098_v2 }
 0x296   :  { %v6264_v12 = vpop.f32.mrf.mxu0  ;;  %v1038_v18 = vpop.f32.mrf.mxu1  ;;  %v1078_v41 = vld [vmem:[%s8751_s9 + $0x118] sm:$0xff]  ;;  %v9144_v60 = vmov 0  }
 0x297   :  { %9135 = vst [vmem:[#allocation30_spill] sm:$0xff] %v6262_v11  ;;  %9136 = vst [vmem:[#allocation31_spill] sm:$0xff] %v6264_v12  ;;  %v6266_v30 = vpack.c.bf16 %v996_v10, %v996_v10  ;;  %v6268_v28 = vadd.f32 %v1038_v18, %v636_v40  ;;  %v1090_v40 = vld [vmem:[%s8751_s9 + $0x178] sm:$0xff]  ;;  %v6296_v10 = vcombine.high %v1085_v13, %v1089_v31 }
 0x298   :  { %v999_v5 = vpop.f32.mrf.mxu0  ;;  %v1040_v4 = vpop.f32.mrf.mxu1  ;;  %9140 = vst [vmem:[#allocation35_spill] sm:$0xff] %v6290_v47  ;;  %9141 = vst [vmem:[#allocation36_spill] sm:$0xff] %v6292_v58  ;;  %v6298_v18 = vcombine.high %v1086_v39, %v1090_v40  ;;  %v1082_v59 = vld [vmem:[%s8751_s9 + $0x138] sm:$0xff]  ;;  %v6320_v11 = vcombine.low %v1085_v13, %v1089_v31  ;;  %v1073_v13 = vld [vmem:[%s8751_s9 + $0xf0] sm:$0xff] }
 0x299   :  { %9137 = vst [vmem:[#allocation32_spill] sm:$0xff] %v6268_v28  ;;  %1811 = vmatmul.mubr.bf16.vlgmr.msra.gmra.mxu0 %v6266_v30  ;;  %1852 = vmatmul.mubr.bf16.vlgmr.msra.gmra.mxu1 %v6266_v30  ;;  %9142 = vst [vmem:[#allocation37_spill] sm:$0xff] %v6296_v10  ;;  %v1077_v28 = vld [vmem:[%s8751_s9 + $0x110] sm:$0xff]  ;;  %v6332_v3 = vcombine.high %v1078_v41, %v1082_v59  ;;  %v1070_v31 = vld [vmem:[%s8751_s9 + $0xd8] sm:$0xff] }
 0x29a   :  { %1861 = vmatpush1.bf16.msra.mxu0 %v6229_v20  ;;  %1902 = vmatpush1.bf16.msra.mxu1 %v6232_v21  ;;  %v1000_v4 = vpop.f32.mrf.mxu0  ;;  %v1041_v5 = vpop.f32.mrf.mxu1  ;;  %9143 = vst [vmem:[#allocation38_spill] sm:$0xff] %v6298_v18  ;;  %9145 = vst [vmem:[#allocation39_spill] sm:$0xff] %v6320_v11 }
 0x29b   :  { %1862 = vmatprep.subr.bf16.mxu0 %v6270_v46  ;;  %1903 = vmatprep.subr.bf16.mxu1 %v6272_v19  ;;  %v1081_v4 = vld [vmem:[%s8751_s9 + $0x130] sm:$0xff]  ;;  %v6322_v19 = vcombine.low %v1086_v39, %v1090_v40  ;;  %9148 = vst [vmem:[#allocation42_spill] sm:$0xff] %v6332_v3  ;;  %v1074_v39 = vld [vmem:[%s8751_s9 + $0xf8] sm:$0xff] }
 0x29c   :  { %1892 = vmatprep.mubr.bf16.mxu0 %v9144_v60  ;;  %1933 = vmatprep.mubr.bf16.mxu1 %v9144_v60  ;;  %v6314_v2 = vpop.f32.mrf.mxu0  ;;  %v6316_v5 = vpop.f32.mrf.mxu1  ;;  %v6330_v20 = vcombine.high %v1077_v28, %v1081_v4  ;;  %v6356_v52 = vcombine.high %v1070_v31, %v1074_v39 }
 0x29d   :  { %9146 = vst [vmem:[#allocation40_spill] sm:$0xff] %v6322_v19 }
 0x29e   :  { %1863 = vmatpush1.bf16.msra.mxu0 %v6290_v47  ;;  %1904 = vmatpush1.bf16.msra.mxu1 %v6292_v58  ;;  %v6324_v46 = vpop.f32.mrf.mxu0  ;;  %v6326_v21 = vpop.f32.mrf.mxu1  ;;  %9147 = vst [vmem:[#allocation41_spill] sm:$0xff] %v6330_v20  ;;  %v1069_v58 = vld [vmem:[%s8751_s9 + $0xd0] sm:$0xff]  ;;  %v6350_v47 = vcombine.low %v1078_v41, %v1082_v59  ;;  %9152 = vst [vmem:[#allocation46_spill] sm:$0xff] %v6356_v52 }
 0x29f   :  { %1864 = vmatprep.subr.bf16.mxu0 %v6296_v10  ;;  %1905 = vmatprep.subr.bf16.mxu1 %v6298_v18  ;;  %v6348_v10 = vcombine.low %v1077_v28, %v1081_v4  ;;  %v6354_v12 = vcombine.high %v1069_v58, %v1073_v13  ;;  %v1065_v28 = vld [vmem:[%s8751_s9 + $0xb0] sm:$0xff]  ;;  %v6376_v59 = vcombine.low %v1069_v58, %v1073_v13  ;;  %v1054_v13 = vld [vmem:[%s8751_s9 + $0x58] sm:$0xff] }
 0x2a0   :  { %v1332_v40 = vpop.f32.mrf.mxu0  ;;  %v1373_v18 = vpop.f32.mrf.mxu1  ;;  %9150 = vst [vmem:[#allocation44_spill] sm:$0xff] %v6350_v47  ;;  %v1057_v58 = vld [vmem:[%s8751_s9 + $0x70] sm:$0xff] }
 0x2a1   :  { %9149 = vst [vmem:[#allocation43_spill] sm:$0xff] %v6348_v10  ;;  %9151 = vst [vmem:[#allocation45_spill] sm:$0xff] %v6354_v12  ;;  %v1061_v18 = vld [vmem:[%s8751_s9 + $0x90] sm:$0xff]  ;;  %v6378_v40 = vcombine.low %v1070_v31, %v1074_v39  ;;  %v1058_v31 = vld [vmem:[%s8751_s9 + $0x78] sm:$0xff] }
 0x2a2   :  { %1865 = vmatpush1.bf16.msra.mxu0 %v6320_v11  ;;  %1906 = vmatpush1.bf16.msra.mxu1 %v6322_v19  ;;  %v1333_v61 = vpop.f32.mrf.mxu0  ;;  %v1374_v53 = vpop.f32.mrf.mxu1  ;;  %9153 = vst [vmem:[#allocation47_spill] sm:$0xff] %v6376_v59  ;;  %v6386_v19 = vcombine.high %v1061_v18, %v1065_v28  ;;  %v6412_v29 = vcombine.high %v1054_v13, %v1058_v31 }
 0x2a3   :  { %1866 = vmatprep.subr.bf16.mxu0 %v6330_v20  ;;  %1907 = vmatprep.subr.bf16.mxu1 %v6332_v3  ;;  %v1062_v53 = vld [vmem:[%s8751_s9 + $0x98] sm:$0xff]  ;;  %9154 = vst [vmem:[#allocation48_spill] sm:$0xff] %v6378_v40 }
 0x2a4   :  { %v1066_v61 = vld [vmem:[%s8751_s9 + $0xb8] sm:$0xff]  ;;  %v6370_v4 = vpop.f32.mrf.mxu0  ;;  %v6372_v41 = vpop.f32.mrf.mxu1  ;;  %9155 = vst [vmem:[#allocation49_spill] sm:$0xff] %v6386_v19  ;;  %9160 = vst [vmem:[#allocation54_spill] sm:$0xff] %v6412_v29 }
 0x2a5   :  { %v6388_v11 = vcombine.high %v1062_v53, %v1066_v61 }
 0x2a6   :  { %1867 = vmatpush1.bf16.msra.mxu0 %v6348_v10  ;;  %1908 = vmatpush1.bf16.msra.mxu1 %v6350_v47  ;;  %v6380_v3 = vpop.f32.mrf.mxu0  ;;  %v6382_v20 = vpop.f32.mrf.mxu1  ;;  %v1053_v47 = vld [vmem:[%s8751_s9 + $0x50] sm:$0xff]  ;;  %v6406_v10 = vcombine.low %v1062_v53, %v1066_v61  ;;  %v6430_v53 = vcombine.low %v1054_v13, %v1058_v31  ;;  %v6461_v13 = vld [vmem:[%s8753_s13] ss:$8 sps:$4 sm:$0xff]  }
 0x2a7   :  { %1868 = vmatprep.subr.bf16.mxu0 %v6354_v12  ;;  %1909 = vmatprep.subr.bf16.mxu1 %v6356_v52  ;;  %9156 = vst [vmem:[#allocation50_spill] sm:$0xff] %v6388_v11  ;;  %v6404_v12 = vcombine.low %v1061_v18, %v1065_v28  ;;  %v6410_v49 = vcombine.high %v1053_v47, %v1057_v58  ;;  %v1049_v18 = vld [vmem:[%s8751_s9 + $0x30] sm:$0xff]  ;;  %9169 = vst [vmem:[#allocation63_spill] sm:$0xff] %v6461_v13 }
 0x2a8   :  { %v1414_v39 = vpop.f32.mrf.mxu0  ;;  %v1455_v52 = vpop.f32.mrf.mxu1  ;;  %9158 = vst [vmem:[#allocation52_spill] sm:$0xff] %v6406_v10  ;;  %v6428_v28 = vcombine.low %v1053_v47, %v1057_v58  ;;  %9162 = vst [vmem:[#allocation56_spill] sm:$0xff] %v6430_v53  ;;  %v6449_v47 = vld [vmem:[%s8753_s13 + $0x4] ss:$8 sps:$4 sm:$0xff]   ;;  %v6454_v58 = vld [vmem:[%s8754_s12 + $0x74] ss:$8 sps:$4 sm:$0xff]  }
 0x2a9   :  { %9157 = vst [vmem:[#allocation51_spill] sm:$0xff] %v6404_v12  ;;  %9159 = vst [vmem:[#allocation53_spill] sm:$0xff] %v6410_v49  ;;  %v1045_v52 = vld [vmem:[%s8751_s9 + $0x10] sm:$0xff] }
 0x2aa   :  { %1869 = vmatpush1.bf16.msra.mxu0 %v6376_v59  ;;  %1910 = vmatpush1.bf16.msra.mxu1 %v6378_v40  ;;  %v1415_v51 = vpop.f32.mrf.mxu0  ;;  %v1456_v50 = vpop.f32.mrf.mxu1  ;;  %9161 = vst [vmem:[#allocation55_spill] sm:$0xff] %v6428_v28  ;;  %v6434_v61 = vcombine.high %v1045_v52, %v1049_v18  ;;  %9167 = vst [vmem:[#allocation61_spill] sm:$0xff] %v6449_v47  ;;  %v6468_v31 = vld [vmem:[%s8754_s12 + $0x174] ss:$8 sps:$4 sm:$0xff]  }
 0x2ab   :  { %1870 = vmatprep.subr.bf16.mxu0 %v6386_v19  ;;  %1911 = vmatprep.subr.bf16.mxu1 %v6388_v11  ;;  %v1046_v50 = vld [vmem:[%s8751_s9 + $0x18] sm:$0xff]  ;;  %v6440_v11 = vcombine.low %v1045_v52, %v1049_v18  ;;  %9168 = vst [vmem:[#allocation62_spill] sm:$0xff] %v6454_v58  ;;  %9170 = vst [vmem:[#allocation64_spill] sm:$0xff] %v6468_v31  ;;  %v6478_v18 = vld [vmem:[%s8754_s12 + $0x64] ss:$8 sps:$4 sm:$0xff]  }
 0x2ac   :  { %v1050_v51 = vld [vmem:[%s8751_s9 + $0x38] sm:$0xff]  ;;  %9163 = vst [vmem:[#allocation57_spill] sm:$0xff] %v6434_v61  ;;  %9172 = vst [vmem:[#allocation66_spill] sm:$0xff] %v6478_v18 }
 0x2ad   :  { %v6436_v39 = vcombine.high %v1046_v50, %v1050_v51  ;;  %9165 = vst [vmem:[#allocation59_spill] sm:$0xff] %v6440_v11  ;;  %v6473_v52 = vld [vmem:[%s8754_s12 + $0x70] ss:$8 sps:$4 sm:$0xff]  }
 0x2ae   :  { %1871 = vmatpush1.bf16.msra.mxu0 %v6404_v12  ;;  %1912 = vmatpush1.bf16.msra.mxu1 %v6406_v10  ;;  %v6442_v12 = vcombine.low %v1046_v50, %v1050_v51  ;;  %9171 = vst [vmem:[#allocation65_spill] sm:$0xff] %v6473_v52  ;;  %v6489_v50 = vld [vmem:[%s8754_s12 + $0x60] ss:$8 sps:$4 sm:$0xff]   ;;  %v6495_v51 = vld [vmem:[%s8754_s12 + $0x54] ss:$8 sps:$4 sm:$0xff]  }
 0x2af   :  { %1872 = vmatprep.subr.bf16.mxu0 %v6410_v49  ;;  %1913 = vmatprep.subr.bf16.mxu1 %v6412_v29  ;;  %9164 = vst [vmem:[#allocation58_spill] sm:$0xff] %v6436_v39  ;;  %9173 = vst [vmem:[#allocation67_spill] sm:$0xff] %v6489_v50 }
 0x2b0   :  { %9166 = vst [vmem:[#allocation60_spill] sm:$0xff] %v6442_v12  ;;  %9174 = vst [vmem:[#allocation68_spill] sm:$0xff] %v6495_v51 }
 0x2b2   :  { %1873 = vmatpush1.bf16.msra.mxu0 %v6428_v28  ;;  %1914 = vmatpush1.bf16.msra.mxu1 %v6430_v53 }
 0x2b3   :  { %1874 = vmatprep.subr.bf16.mxu0 %v6434_v61  ;;  %1915 = vmatprep.subr.bf16.mxu1 %v6436_v39 }
 0x2b6   :  { %1875 = vmatpush1.bf16.msra.mxu0 %v6440_v11  ;;  %1916 = vmatpush1.bf16.msra.mxu1 %v6442_v12 }
 0x2b7   :  { %2028 = vmatprep.subr.bf16.mxu0 %v6449_v47  ;;  %2695 = vmatprep.subr.bf16.mxu1 %v6454_v58 }
 0x2b9   :  { %1893 = vmatmul.mubr.bf16.vlgmr.msra.gmra.mxu0 %v6266_v30  ;;  %1934 = vmatmul.mubr.bf16.vlgmr.msra.gmra.mxu1 %v6266_v30  ;;  %v1999_v30 = vld [vmem:[%s8756_s2] sm:$0xf] }
 0x2ba   :  { %2029 = vmatpush1.bf16.msra.mxu0 %v6461_v13  ;;  %2046 = vmatprep.mubr.bf16.mxu0 %v9144_v60  ;;  %v6520_v13 = vld [vmem:[%s8754_s12 + $0x44] ss:$8 sps:$4 sm:$0xff]  }
 0x2bb   :  { %2736 = vmatprep.subr.bf16.mxu0 %v6468_v31  ;;  %2696 = vmatpush1.bf16.msra.mxu1 %v6473_v52  ;;  %v6503_v52 = vld [vmem:[%s8754_s12 + $0x170] ss:$8 sps:$4 sm:$0xff]   ;;  %v6508_v31 = vld [vmem:[%s8754_s12 + $0x164] ss:$8 sps:$4 sm:$0xff]   ;;  %9178 = vst [vmem:[#allocation72_spill] sm:$0xff] %v6520_v13 }
 0x2bc   :  { %2697 = vmatprep.subr.bf16.mxu1 %v6478_v18  ;;  %9175 = vst [vmem:[#allocation69_spill] sm:$0xff] %v6503_v52  ;;  %9176 = vst [vmem:[#allocation70_spill] sm:$0xff] %v6508_v31  ;;  %v6514_v18 = vld [vmem:[%s8754_s12 + $0x50] ss:$8 sps:$4 sm:$0xff]  }
 0x2bd   :  { %9177 = vst [vmem:[#allocation71_spill] sm:$0xff] %v6514_v18 }
 0x2bf   :  { %2698 = vmatpush1.bf16.msra.mxu1 %v6489_v50  ;;  %v6527_v50 = vld [vmem:[%s8754_s12 + $0x160] ss:$8 sps:$4 sm:$0xff]  }
 0x2c0   :  { %2699 = vmatprep.subr.bf16.mxu1 %v6495_v51  ;;  %9179 = vst [vmem:[#allocation73_spill] sm:$0xff] %v6527_v50  ;;  %v6533_v51 = vld [vmem:[%s8754_s12 + $0x154] ss:$8 sps:$4 sm:$0xff]  }
 0x2c1   :  { %4782 = vmatmul.mubr.msk.bf16.vlgmr.msra.gmra.mxu0 %vm2010_vm2, %v1999_v30  ;;  %9180 = vst [vmem:[#allocation74_spill] sm:$0xff] %v6533_v51  ;;  %v6539_v30 = vld [vmem:[%s8754_s12 + $0x40] ss:$8 sps:$4 sm:$0xff]  }
 0x2c2   :  { %2737 = vmatpush1.bf16.msra.mxu0 %v6503_v52  ;;  %9181 = vst [vmem:[#allocation75_spill] sm:$0xff] %v6539_v30  ;;  %v6545_v52 = vld [vmem:[%s8754_s12 + $0x34] ss:$8 sps:$4 sm:$0xff]  }
 0x2c3   :  { %2738 = vmatprep.subr.bf16.mxu0 %v6508_v31  ;;  %2700 = vmatpush1.bf16.msra.mxu1 %v6514_v18  ;;  %9182 = vst [vmem:[#allocation76_spill] sm:$0xff] %v6545_v52  ;;  %v6551_v31 = vld [vmem:[%s8754_s12 + $0x150] ss:$8 sps:$4 sm:$0xff]   ;;  %v6557_v18 = vld [vmem:[%s8754_s12 + $0x144] ss:$8 sps:$4 sm:$0xff]  }
 0x2c4   :  { %2701 = vmatprep.subr.bf16.mxu1 %v6520_v13  ;;  %9183 = vst [vmem:[#allocation77_spill] sm:$0xff] %v6551_v31  ;;  %9184 = vst [vmem:[#allocation78_spill] sm:$0xff] %v6557_v18  ;;  %v6563_v13 = vld [vmem:[%s8754_s12 + $0x30] ss:$8 sps:$4 sm:$0xff]  }
 0x2c5   :  { %9185 = vst [vmem:[#allocation79_spill] sm:$0xff] %v6563_v13 }
 0x2c6   :  { %2739 = vmatpush1.bf16.msra.mxu0 %v6527_v50  ;;  %v6569_v50 = vld [vmem:[%s8754_s12 + $0x24] ss:$8 sps:$4 sm:$0xff]  }
 0x2c7   :  { %2740 = vmatprep.subr.bf16.mxu0 %v6533_v51  ;;  %2702 = vmatpush1.bf16.msra.mxu1 %v6539_v30  ;;  %9186 = vst [vmem:[#allocation80_spill] sm:$0xff] %v6569_v50  ;;  %v6575_v51 = vld [vmem:[%s8754_s12 + $0x140] ss:$8 sps:$4 sm:$0xff]   ;;  %v6581_v30 = vld [vmem:[%s8754_s12 + $0x134] ss:$8 sps:$4 sm:$0xff]  }
 0x2c8   :  { %2703 = vmatprep.subr.bf16.mxu1 %v6545_v52  ;;  %9187 = vst [vmem:[#allocation81_spill] sm:$0xff] %v6575_v51  ;;  %9188 = vst [vmem:[#allocation82_spill] sm:$0xff] %v6581_v30  ;;  %v6587_v52 = vld [vmem:[%s8754_s12 + $0x20] ss:$8 sps:$4 sm:$0xff]  }
 0x2c9   :  { %9189 = vst [vmem:[#allocation83_spill] sm:$0xff] %v6587_v52 }
 0x2ca   :  { %2741 = vmatpush1.bf16.msra.mxu0 %v6551_v31  ;;  %v6593_v31 = vld [vmem:[%s8754_s12 + $0x14] ss:$8 sps:$4 sm:$0xff]  }
 0x2cb   :  { %2742 = vmatprep.subr.bf16.mxu0 %v6557_v18  ;;  %2704 = vmatpush1.bf16.msra.mxu1 %v6563_v13  ;;  %9190 = vst [vmem:[#allocation84_spill] sm:$0xff] %v6593_v31  ;;  %v6599_v18 = vld [vmem:[%s8754_s12 + $0x130] ss:$8 sps:$4 sm:$0xff]   ;;  %v6605_v13 = vld [vmem:[%s8754_s12 + $0x124] ss:$8 sps:$4 sm:$0xff]  }
 0x2cc   :  { %2705 = vmatprep.subr.bf16.mxu1 %v6569_v50  ;;  %9191 = vst [vmem:[#allocation85_spill] sm:$0xff] %v6599_v18  ;;  %9192 = vst [vmem:[#allocation86_spill] sm:$0xff] %v6605_v13  ;;  %v6611_v50 = vld [vmem:[%s8754_s12 + $0x10] ss:$8 sps:$4 sm:$0xff]  }
 0x2cd   :  { %9193 = vst [vmem:[#allocation87_spill] sm:$0xff] %v6611_v50 }
 0x2ce   :  { %2743 = vmatpush1.bf16.msra.mxu0 %v6575_v51  ;;  %v6617_v51 = vld [vmem:[%s8754_s12 + $0x4] ss:$8 sps:$4 sm:$0xff]  }
 0x2cf   :  { %2744 = vmatprep.subr.bf16.mxu0 %v6581_v30  ;;  %2706 = vmatpush1.bf16.msra.mxu1 %v6587_v52  ;;  %9194 = vst [vmem:[#allocation88_spill] sm:$0xff] %v6617_v51  ;;  %v6623_v30 = vld [vmem:[%s8754_s12 + $0x120] ss:$8 sps:$4 sm:$0xff]   ;;  %v6629_v52 = vld [vmem:[%s8754_s12 + $0x114] ss:$8 sps:$4 sm:$0xff]  }
 0x2d0   :  { %2707 = vmatprep.subr.bf16.mxu1 %v6593_v31  ;;  %9195 = vst [vmem:[#allocation89_spill] sm:$0xff] %v6623_v30  ;;  %9196 = vst [vmem:[#allocation90_spill] sm:$0xff] %v6629_v52  ;;  %v6635_v31 = vld [vmem:[%s8754_s12] ss:$8 sps:$4 sm:$0xff]  }
 0x2d1   :  { %9197 = vst [vmem:[#allocation91_spill] sm:$0xff] %v6635_v31 }
 0x2d2   :  { %2745 = vmatpush1.bf16.msra.mxu0 %v6599_v18  ;;  %v6641_v18 = vld [vmem:[%s8754_s12 + $0xf4] ss:$8 sps:$4 sm:$0xff]  }
 0x2d3   :  { %2746 = vmatprep.subr.bf16.mxu0 %v6605_v13  ;;  %2708 = vmatpush1.bf16.msra.mxu1 %v6611_v50  ;;  %9198 = vst [vmem:[#allocation92_spill] sm:$0xff] %v6641_v18  ;;  %v6647_v13 = vld [vmem:[%s8754_s12 + $0x110] ss:$8 sps:$4 sm:$0xff]   ;;  %v6653_v50 = vld [vmem:[%s8754_s12 + $0x104] ss:$8 sps:$4 sm:$0xff]  }
 0x2d4   :  { %2709 = vmatprep.subr.bf16.mxu1 %v6617_v51  ;;  %9199 = vst [vmem:[#allocation93_spill] sm:$0xff] %v6647_v13  ;;  %9200 = vst [vmem:[#allocation94_spill] sm:$0xff] %v6653_v50  ;;  %v6659_v51 = vld [vmem:[%s8754_s12 + $0xf0] ss:$8 sps:$4 sm:$0xff]  }
 0x2d5   :  { %9201 = vst [vmem:[#allocation95_spill] sm:$0xff] %v6659_v51 }
 0x2d6   :  { %2747 = vmatpush1.bf16.msra.mxu0 %v6623_v30  ;;  %v6665_v30 = vld [vmem:[%s8754_s12 + $0xe4] ss:$8 sps:$4 sm:$0xff]  }
 0x2d7   :  { %2748 = vmatprep.subr.bf16.mxu0 %v6629_v52  ;;  %2710 = vmatpush1.bf16.msra.mxu1 %v6635_v31  ;;  %9202 = vst [vmem:[#allocation96_spill] sm:$0xff] %v6665_v30  ;;  %v6671_v52 = vld [vmem:[%s8754_s12 + $0x100] ss:$8 sps:$4 sm:$0xff]   ;;  %v6677_v31 = vld [vmem:[%s8754_s12 + $0x1f4] ss:$8 sps:$4 sm:$0xff]  }
 0x2d8   :  { %2711 = vmatprep.subr.bf16.mxu1 %v6641_v18  ;;  %9203 = vst [vmem:[#allocation97_spill] sm:$0xff] %v6671_v52  ;;  %9204 = vst [vmem:[#allocation98_spill] sm:$0xff] %v6677_v31  ;;  %v6683_v18 = vld [vmem:[%s8754_s12 + $0xe0] ss:$8 sps:$4 sm:$0xff]  }
 0x2d9   :  { %9205 = vst [vmem:[#allocation99_spill] sm:$0xff] %v6683_v18 }
 0x2da   :  { %2749 = vmatpush1.bf16.msra.mxu0 %v6647_v13  ;;  %v6689_v13 = vld [vmem:[%s8754_s12 + $0xd4] ss:$8 sps:$4 sm:$0xff]  }
 0x2db   :  { %2750 = vmatprep.subr.bf16.mxu0 %v6653_v50  ;;  %2712 = vmatpush2.bf16.msra.mxu1 %v6659_v51  ;;  %9206 = vst [vmem:[#allocation100_spill] sm:$0xff] %v6689_v13  ;;  %v6695_v50 = vld [vmem:[%s8754_s12 + $0x1f0] ss:$8 sps:$4 sm:$0xff]   ;;  %v6701_v51 = vld [vmem:[%s8754_s12 + $0x1e4] ss:$8 sps:$4 sm:$0xff]  }
 0x2dc   :  { %2713 = vmatprep.subr.bf16.mxu1 %v6665_v30  ;;  %9207 = vst [vmem:[#allocation101_spill] sm:$0xff] %v6695_v50  ;;  %9208 = vst [vmem:[#allocation102_spill] sm:$0xff] %v6701_v51  ;;  %v6707_v30 = vld [vmem:[%s8754_s12 + $0xd0] ss:$8 sps:$4 sm:$0xff]  }
 0x2dd   :  { %9209 = vst [vmem:[#allocation103_spill] sm:$0xff] %v6707_v30 }
 0x2de   :  { %2751 = vmatpush1.bf16.msra.mxu0 %v6671_v52  ;;  %v6713_v52 = vld [vmem:[%s8754_s12 + $0xc4] ss:$8 sps:$4 sm:$0xff]  }
 0x2df   :  { %2752 = vmatprep.subr.bf16.mxu0 %v6677_v31  ;;  %2714 = vmatpush2.bf16.msra.mxu1 %v6683_v18  ;;  %9210 = vst [vmem:[#allocation104_spill] sm:$0xff] %v6713_v52  ;;  %v6719_v31 = vld [vmem:[%s8754_s12 + $0x1e0] ss:$8 sps:$4 sm:$0xff]   ;;  %v6725_v18 = vld [vmem:[%s8754_s12 + $0x1d4] ss:$8 sps:$4 sm:$0xff]  }
 0x2e0   :  { %2715 = vmatprep.subr.bf16.mxu1 %v6689_v13  ;;  %9211 = vst [vmem:[#allocation105_spill] sm:$0xff] %v6719_v31  ;;  %9212 = vst [vmem:[#allocation106_spill] sm:$0xff] %v6725_v18  ;;  %v6731_v13 = vld [vmem:[%s8754_s12 + $0xc0] ss:$8 sps:$4 sm:$0xff]  }
 0x2e1   :  { %9213 = vst [vmem:[#allocation107_spill] sm:$0xff] %v6731_v13 }
 0x2e2   :  { %2753 = vmatpush2.bf16.msra.mxu0 %v6695_v50  ;;  %v6737_v50 = vld [vmem:[%s8754_s12 + $0xb4] ss:$8 sps:$4 sm:$0xff]  }
 0x2e3   :  { %2754 = vmatprep.subr.bf16.mxu0 %v6701_v51  ;;  %2716 = vmatpush2.bf16.msra.mxu1 %v6707_v30  ;;  %9214 = vst [vmem:[#allocation108_spill] sm:$0xff] %v6737_v50  ;;  %v6743_v51 = vld [vmem:[%s8754_s12 + $0x1d0] ss:$8 sps:$4 sm:$0xff]   ;;  %v6749_v30 = vld [vmem:[%s8754_s12 + $0x1c4] ss:$8 sps:$4 sm:$0xff]  }
 0x2e4   :  { %2717 = vmatprep.subr.bf16.mxu1 %v6713_v52  ;;  %9215 = vst [vmem:[#allocation109_spill] sm:$0xff] %v6743_v51  ;;  %9216 = vst [vmem:[#allocation110_spill] sm:$0xff] %v6749_v30  ;;  %v6755_v52 = vld [vmem:[%s8754_s12 + $0xb0] ss:$8 sps:$4 sm:$0xff]  }
 0x2e5   :  { %9217 = vst [vmem:[#allocation111_spill] sm:$0xff] %v6755_v52 }
 0x2e6   :  { %2755 = vmatpush2.bf16.msra.mxu0 %v6719_v31  ;;  %v6761_v31 = vld [vmem:[%s8754_s12 + $0xa4] ss:$8 sps:$4 sm:$0xff]  }
 0x2e7   :  { %2756 = vmatprep.subr.bf16.mxu0 %v6725_v18  ;;  %2718 = vmatpush2.bf16.msra.mxu1 %v6731_v13  ;;  %9218 = vst [vmem:[#allocation112_spill] sm:$0xff] %v6761_v31  ;;  %v6767_v18 = vld [vmem:[%s8754_s12 + $0x1c0] ss:$8 sps:$4 sm:$0xff]   ;;  %v6773_v13 = vld [vmem:[%s8754_s12 + $0x1b4] ss:$8 sps:$4 sm:$0xff]  }
 0x2e8   :  { %2719 = vmatprep.subr.bf16.mxu1 %v6737_v50  ;;  %9219 = vst [vmem:[#allocation113_spill] sm:$0xff] %v6767_v18  ;;  %9220 = vst [vmem:[#allocation114_spill] sm:$0xff] %v6773_v13  ;;  %v6779_v50 = vld [vmem:[%s8754_s12 + $0xa0] ss:$8 sps:$4 sm:$0xff]  }
 0x2e9   :  { %9221 = vst [vmem:[#allocation115_spill] sm:$0xff] %v6779_v50 }
 0x2ea   :  { %2757 = vmatpush2.bf16.msra.mxu0 %v6743_v51  ;;  %v6785_v51 = vld [vmem:[%s8754_s12 + $0x94] ss:$8 sps:$4 sm:$0xff]  }
 0x2eb   :  { %2758 = vmatprep.subr.bf16.mxu0 %v6749_v30  ;;  %2720 = vmatpush2.bf16.msra.mxu1 %v6755_v52  ;;  %9222 = vst [vmem:[#allocation116_spill] sm:$0xff] %v6785_v51  ;;  %v6791_v30 = vld [vmem:[%s8754_s12 + $0x1b0] ss:$8 sps:$4 sm:$0xff]   ;;  %v6797_v52 = vld [vmem:[%s8754_s12 + $0x1a4] ss:$8 sps:$4 sm:$0xff]  }
 0x2ec   :  { %2721 = vmatprep.subr.bf16.mxu1 %v6761_v31  ;;  %9223 = vst [vmem:[#allocation117_spill] sm:$0xff] %v6791_v30  ;;  %9224 = vst [vmem:[#allocation118_spill] sm:$0xff] %v6797_v52  ;;  %v6803_v31 = vld [vmem:[%s8754_s12 + $0x90] ss:$8 sps:$4 sm:$0xff]  }
 0x2ed   :  { %9225 = vst [vmem:[#allocation119_spill] sm:$0xff] %v6803_v31 }
 0x2ee   :  { %2759 = vmatpush2.bf16.msra.mxu0 %v6767_v18  ;;  %v6809_v18 = vld [vmem:[%s8754_s12 + $0x84] ss:$8 sps:$4 sm:$0xff]  }
 0x2ef   :  { %2760 = vmatprep.subr.bf16.mxu0 %v6773_v13  ;;  %2722 = vmatpush2.bf16.msra.mxu1 %v6779_v50  ;;  %9226 = vst [vmem:[#allocation120_spill] sm:$0xff] %v6809_v18  ;;  %v6815_v13 = vld [vmem:[%s8754_s12 + $0x1a0] ss:$8 sps:$4 sm:$0xff]   ;;  %v6821_v50 = vld [vmem:[%s8754_s12 + $0x194] ss:$8 sps:$4 sm:$0xff]  }
 0x2f0   :  { %2723 = vmatprep.subr.bf16.mxu1 %v6785_v51  ;;  %9227 = vst [vmem:[#allocation121_spill] sm:$0xff] %v6815_v13  ;;  %9228 = vst [vmem:[#allocation122_spill] sm:$0xff] %v6821_v50  ;;  %v6827_v51 = vld [vmem:[%s8754_s12 + $0x80] ss:$8 sps:$4 sm:$0xff]  }
 0x2f1   :  { %9229 = vst [vmem:[#allocation123_spill] sm:$0xff] %v6827_v51 }
 0x2f2   :  { %2761 = vmatpush2.bf16.msra.mxu0 %v6791_v30  ;;  %v6833_v30 = vld [vmem:[%s8754_s12 + $0x274] ss:$8 sps:$4 sm:$0xff]  }
 0x2f3   :  { %2762 = vmatprep.subr.bf16.mxu0 %v6797_v52  ;;  %2724 = vmatpush2.bf16.msra.mxu1 %v6803_v31  ;;  %9230 = vst [vmem:[#allocation124_spill] sm:$0xff] %v6833_v30  ;;  %v6839_v52 = vld [vmem:[%s8754_s12 + $0x190] ss:$8 sps:$4 sm:$0xff]   ;;  %v6845_v31 = vld [vmem:[%s8754_s12 + $0x184] ss:$8 sps:$4 sm:$0xff]  }
 0x2f4   :  { %2725 = vmatprep.subr.bf16.mxu1 %v6809_v18  ;;  %9231 = vst [vmem:[#allocation125_spill] sm:$0xff] %v6839_v52  ;;  %9232 = vst [vmem:[#allocation126_spill] sm:$0xff] %v6845_v31 }
 0x2f6   :  { %2763 = vmatpush2.bf16.msra.mxu0 %v6815_v13  ;;  %v6853_v13 = vld [vmem:[%s8754_s12 + $0x180] ss:$8 sps:$4 sm:$0xff]  }
 0x2f7   :  { %2764 = vmatprep.subr.bf16.mxu0 %v6821_v50  ;;  %2726 = vmatpush2.bf16.msra.mxu1 %v6827_v51  ;;  %9233 = vst [vmem:[#allocation127_spill] sm:$0xff] %v6853_v13  ;;  %v6859_v50 = vld [vmem:[%s8754_s12 + $0x374] ss:$8 sps:$4 sm:$0xff]  }
 0x2f8   :  { %2777 = vmatprep.subr.bf16.mxu1 %v6833_v30  ;;  %9234 = vst [vmem:[#allocation128_spill] sm:$0xff] %v6859_v50  ;;  %v9235_v30 = vsub.s32 2, %v5841_v33 }
 0x2fa   :  { %2765 = vmatpush2.bf16.msra.mxu0 %v6839_v52  ;;  %v6866_v52 = vld [vmem:[%s8757_s11] sm:$0xff] }
 0x2fb   :  { %2766 = vmatprep.subr.bf16.mxu0 %v6845_v31  ;;  %v6871_v51 = vrot.slane %v6866_v52, %v9235_v30  ;;  %v6875_v18 = vrot.slane %v6866_v52, %v5844_v34  ;;  %v6886_v11 = vrot.slane %v6866_v52, %v5850_v36 }
 0x2fe   :  { %2767 = vmatpush2.bf16.msra.mxu0 %v6853_v13  ;;  %v9236_v13 = vsub.s32 3, %v5841_v33 }
 0x2ff   :  { %2818 = vmatprep.subr.bf16.mxu0 %v6859_v50 }
 0x300   :  { %v6880_v50 = vrot.slane %v6866_v52, %v9236_v13 }
 0x359   :  { %v1812_v31 = vpop.f32.mrf.mxu0  ;;  %v1853_v58 = vpop.f32.mrf.mxu1 }
 0x35a   :  { %v1813_v47 = vadd.f32 %v1812_v31, %v6314_v2  ;;  %v1854_v12 = vadd.f32 %v1853_v58, %v6316_v5 }
 0x35b   :  { %v1814_v30 = vpop.f32.mrf.mxu0  ;;  %v1855_v39 = vpop.f32.mrf.mxu1 }
 0x35c   :  { %v1815_v61 = vadd.f32 %v1814_v30, %v6324_v46  ;;  %v1856_v34 = vadd.f32 %v1855_v39, %v6326_v21  ;;  %v1983_v53 = vadd.f32 %v6875_v18, %v1813_v47  ;;  %v1985_v28 = vadd.f32 %v6871_v51, %v1854_v12  ;;  %v6897_v46 = vld [vmem:[%s8754_s12 + $0x270] ss:$8 sps:$4 sm:$0xff]   ;;  %v6955_v30 = vld [vmem:[%s8754_s12 + $0x244] ss:$8 sps:$4 sm:$0xff]  }
 0x35d   :  { %v1816_v13 = vpop.f32.mrf.mxu0  ;;  %v1857_v29 = vpop.f32.mrf.mxu1  ;;  %v6902_v21 = vld [vmem:[%s8754_s12 + $0x370] ss:$8 sps:$4 sm:$0xff]   ;;  %9245 = vst [vmem:[#allocation137_spill] sm:$0xff] %v6955_v30 }
 0x35e   :  { %v1984_v2 = vadd.f32 %v6886_v11, %v1815_v61  ;;  %v1986_v5 = vadd.f32 %v6880_v50, %v1856_v34  ;;  %v1991_v12 = vpack.c.bf16 %v1983_v53, %v1983_v53  ;;  %v1993_v29 = vpack.c.bf16 %v1985_v28, %v1985_v28  ;;  %v6907_v34 = vld [vmem:[%s8754_s12 + $0x264] ss:$8 sps:$4 sm:$0xff]   ;;  %v6919_v28 = vld [vmem:[%s8754_s12 + $0x260] ss:$8 sps:$4 sm:$0xff]   ;;  %v6943_v39 = vld [vmem:[%s8754_s12 + $0x250] ss:$8 sps:$4 sm:$0xff]  }
 0x35f   :  { %v1817_v58 = vpop.f32.mrf.mxu0  ;;  %v1858_v31 = vpop.f32.mrf.mxu1  ;;  %9237 = vst [vmem:[#allocation129_spill] sm:$0xff] %v6907_v34  ;;  %v6912_v61 = vld [vmem:[%s8754_s12 + $0x364] ss:$8 sps:$4 sm:$0xff]   ;;  %9239 = vst [vmem:[#allocation131_spill] sm:$0xff] %v6919_v28  ;;  %v6924_v53 = vld [vmem:[%s8754_s12 + $0x360] ss:$8 sps:$4 sm:$0xff]  }
 0x360   :  { %v1992_v49 = vpack.c.bf16 %v1984_v2, %v1984_v2  ;;  %v1994_v10 = vpack.c.bf16 %v1986_v5, %v1986_v5  ;;  %9238 = vst [vmem:[#allocation130_spill] sm:$0xff] %v6912_v61  ;;  %9240 = vst [vmem:[#allocation132_spill] sm:$0xff] %v6924_v53  ;;  %v6948_v47 = vld [vmem:[%s8754_s12 + $0x350] ss:$8 sps:$4 sm:$0xff]   ;;  %v6960_v13 = vld [vmem:[%s8754_s12 + $0x344] ss:$8 sps:$4 sm:$0xff]  }
 0x361   :  { %9243 = vst [vmem:[#allocation135_spill] sm:$0xff] %v6943_v39  ;;  %9244 = vst [vmem:[#allocation136_spill] sm:$0xff] %v6948_v47  ;;  %v6967_v2 = vld [vmem:[%s8754_s12 + $0x240] ss:$8 sps:$4 sm:$0xff]   ;;  %v6979_v58 = vld [vmem:[%s8754_s12 + $0x234] ss:$8 sps:$4 sm:$0xff]  }
 0x362   :  { %2727 = vmatprep.mubr.bf16.mxu1 %v1992_v49  ;;  %2768 = vmatprep.mubr.bf16.mxu0 %v1994_v10  ;;  %v6931_v49 = vld [vmem:[%s8754_s12 + $0x254] ss:$8 sps:$4 sm:$0xff]   ;;  %9246 = vst [vmem:[#allocation138_spill] sm:$0xff] %v6960_v13  ;;  %9247 = vst [vmem:[#allocation139_spill] sm:$0xff] %v6967_v2  ;;  %v6972_v5 = vld [vmem:[%s8754_s12 + $0x340] ss:$8 sps:$4 sm:$0xff]  }
 0x363   :  { %2728 = vmatmul.mubr.bf16.vlgmr.msra.gmra.mxu1 %v1991_v12  ;;  %2769 = vmatmul.mubr.bf16.vlgmr.msra.gmra.mxu0 %v1993_v29  ;;  %9241 = vst [vmem:[#allocation133_spill] sm:$0xff] %v6931_v49  ;;  %v6936_v10 = vld [vmem:[%s8754_s12 + $0x354] ss:$8 sps:$4 sm:$0xff]   ;;  %9248 = vst [vmem:[#allocation140_spill] sm:$0xff] %v6972_v5  ;;  %v6991_v12 = vld [vmem:[%s8754_s12 + $0x230] ss:$8 sps:$4 sm:$0xff]  }
 0x364   :  { %2778 = vmatpush1.bf16.msra.mxu1 %v6897_v46  ;;  %2819 = vmatpush1.bf16.msra.mxu0 %v6902_v21  ;;  %9242 = vst [vmem:[#allocation134_spill] sm:$0xff] %v6936_v10  ;;  %9249 = vst [vmem:[#allocation141_spill] sm:$0xff] %v6979_v58  ;;  %v6984_v31 = vld [vmem:[%s8754_s12 + $0x334] ss:$8 sps:$4 sm:$0xff]   ;;  %v6996_v29 = vld [vmem:[%s8754_s12 + $0x330] ss:$8 sps:$4 sm:$0xff]  }
 0x365   :  { %2779 = vmatprep.subr.bf16.mxu1 %v6907_v34  ;;  %2820 = vmatprep.subr.bf16.mxu0 %v6912_v61  ;;  %9250 = vst [vmem:[#allocation142_spill] sm:$0xff] %v6984_v31  ;;  %9251 = vst [vmem:[#allocation143_spill] sm:$0xff] %v6991_v12  ;;  %v7083_v34 = vld [vmem:[%s8754_s12 + $0x300] ss:$8 sps:$4 sm:$0xff]  }
 0x366   :  { %9252 = vst [vmem:[#allocation144_spill] sm:$0xff] %v6996_v29  ;;  %9262 = vst [vmem:[#allocation154_spill] sm:$0xff] %v7083_v34 }
 0x368   :  { %2780 = vmatpush1.bf16.msra.mxu1 %v6919_v28  ;;  %2821 = vmatpush1.bf16.msra.mxu0 %v6924_v53 }
 0x369   :  { %2781 = vmatprep.subr.bf16.mxu1 %v6931_v49  ;;  %2822 = vmatprep.subr.bf16.mxu0 %v6936_v10 }
 0x36c   :  { %2782 = vmatpush1.bf16.msra.mxu1 %v6943_v39  ;;  %2823 = vmatpush1.bf16.msra.mxu0 %v6948_v47  ;;  %v7052_v39 = vld [vmem:[%s8754_s12 + $0x310] ss:$8 sps:$4 sm:$0xff]  }
 0x36d   :  { %2783 = vmatprep.subr.bf16.mxu1 %v6955_v30  ;;  %2824 = vmatprep.subr.bf16.mxu0 %v6960_v13  ;;  %v1965_v13 = vsub.s32 5, %v5841_v33  ;;  %v1973_v30 = vsub.s32 7, %v5841_v33  ;;  %9260 = vst [vmem:[#allocation152_spill] sm:$0xff] %v7052_v39 }
 0x36f   :  { %v7063_v10 = vrot.slane %v6866_v52, %v1973_v30 }
 0x370   :  { %2784 = vmatpush1.bf16.msra.mxu1 %v6967_v2  ;;  %2825 = vmatpush1.bf16.msra.mxu0 %v6972_v5  ;;  %v7003_v2 = vld [vmem:[%s8754_s12 + $0x224] ss:$8 sps:$4 sm:$0xff]  }
 0x371   :  { %2785 = vmatprep.subr.bf16.mxu1 %v6979_v58  ;;  %2826 = vmatprep.subr.bf16.mxu0 %v6984_v31  ;;  %9253 = vst [vmem:[#allocation145_spill] sm:$0xff] %v7003_v2  ;;  %v7008_v5 = vld [vmem:[%s8754_s12 + $0x324] ss:$8 sps:$4 sm:$0xff]   ;;  %v7015_v58 = vld [vmem:[%s8754_s12 + $0x220] ss:$8 sps:$4 sm:$0xff]  }
 0x372   :  { %9254 = vst [vmem:[#allocation146_spill] sm:$0xff] %v7008_v5  ;;  %9255 = vst [vmem:[#allocation147_spill] sm:$0xff] %v7015_v58  ;;  %v7020_v31 = vld [vmem:[%s8754_s12 + $0x320] ss:$8 sps:$4 sm:$0xff]  }
 0x373   :  { %9256 = vst [vmem:[#allocation148_spill] sm:$0xff] %v7020_v31 }
 0x374   :  { %2786 = vmatpush1.bf16.msra.mxu1 %v6991_v12  ;;  %2827 = vmatpush1.bf16.msra.mxu0 %v6996_v29  ;;  %v7027_v12 = vld [vmem:[%s8754_s12 + $0x214] ss:$8 sps:$4 sm:$0xff]  }
 0x375   :  { %2787 = vmatprep.subr.bf16.mxu1 %v7003_v2  ;;  %2828 = vmatprep.subr.bf16.mxu0 %v7008_v5  ;;  %9257 = vst [vmem:[#allocation149_spill] sm:$0xff] %v7027_v12  ;;  %v7032_v29 = vld [vmem:[%s8754_s12 + $0x314] ss:$8 sps:$4 sm:$0xff]   ;;  %v7041_v5 = vld [vmem:[%s8754_s12 + $0x210] ss:$8 sps:$4 sm:$0xff]  }
 0x376   :  { %9258 = vst [vmem:[#allocation150_spill] sm:$0xff] %v7032_v29  ;;  %9259 = vst [vmem:[#allocation151_spill] sm:$0xff] %v7041_v5 }
 0x378   :  { %2788 = vmatpush1.bf16.msra.mxu1 %v7015_v58  ;;  %2829 = vmatpush1.bf16.msra.mxu0 %v7020_v31  ;;  %v7057_v31 = vld [vmem:[%s8754_s12 + $0x204] ss:$8 sps:$4 sm:$0xff]   ;;  %v7060_v58 = vrot.slane %v6866_v52, %v1965_v13  ;;  %v7076_v13 = vld [vmem:[%s8754_s12 + $0x200] ss:$8 sps:$4 sm:$0xff]  }
 0x379   :  { %v7043_v2 = vpop.f32.mrf.mxu0  ;;  %v7045_v47 = vpop.f32.mrf.mxu1  ;;  %2789 = vmatprep.subr.bf16.mxu1 %v7027_v12  ;;  %2830 = vmatprep.subr.bf16.mxu0 %v7032_v29  ;;  %9261 = vst [vmem:[#allocation153_spill] sm:$0xff] %v7057_v31  ;;  %v7068_v29 = vld [vmem:[%s8754_s12 + $0x304] ss:$8 sps:$4 sm:$0xff]  }
 0x37b   :  { %v1896_v12 = vpop.f32.mrf.mxu0  ;;  %v1937_v49 = vpop.f32.mrf.mxu1 }
 0x37c   :  { %v1897_v53 = vadd.f32 %v1896_v12, %v6380_v3  ;;  %v1938_v28 = vadd.f32 %v1937_v49, %v6382_v20  ;;  %2790 = vmatpush1.bf16.msra.mxu1 %v7041_v5  ;;  %2831 = vmatpush1.bf16.msra.mxu0 %v7052_v39  ;;  %v7088_v3 = vld [vmem:[%s8754_s12 + $0x2f4] ss:$8 sps:$4 sm:$0xff]   ;;  %v7102_v5 = vld [vmem:[%s8754_s12 + $0x2f0] ss:$8 sps:$4 sm:$0xff]  }
 0x37d   :  { %v1898_v30 = vpop.f32.mrf.mxu0  ;;  %v1939_v61 = vpop.f32.mrf.mxu1  ;;  %2791 = vmatprep.subr.bf16.mxu1 %v7057_v31  ;;  %9263 = vst [vmem:[#allocation155_spill] sm:$0xff] %v7088_v3  ;;  %2832 = vmatprep.subr.bf16.mxu0 %v7068_v29  ;;  %9265 = vst [vmem:[#allocation157_spill] sm:$0xff] %v7102_v5 }
 0x37e   :  { %v1988_v20 = vadd.f32 %v7060_v58, %v1897_v53  ;;  %v1990_v49 = vadd.f32 %v7063_v10, %v1938_v28  ;;  %v7096_v30 = vld [vmem:[%s8754_s12 + $0x3f4] ss:$8 sps:$4 sm:$0xff]   ;;  %v7109_v28 = vld [vmem:[%s8754_s12 + $0x3f0] ss:$8 sps:$4 sm:$0xff]   ;;  %v7114_v53 = vld [vmem:[%s8754_s12 + $0x2e4] ss:$8 sps:$4 sm:$0xff]  }
 0x37f   :  { %v1899_v12 = vpop.f32.mrf.mxu0  ;;  %v1940_v61 = vpop.f32.mrf.mxu1  ;;  %9264 = vst [vmem:[#allocation156_spill] sm:$0xff] %v7096_v30  ;;  %9266 = vst [vmem:[#allocation158_spill] sm:$0xff] %v7109_v28 }
 0x380   :  { %v1996_v31 = vpack.c.bf16 %v1988_v20, %v1988_v20  ;;  %v1998_v39 = vpack.c.bf16 %v1990_v49, %v1990_v49  ;;  %2792 = vmatpush1.bf16.msra.mxu1 %v7076_v13  ;;  %2833 = vmatpush1.bf16.msra.mxu0 %v7083_v34  ;;  %9267 = vst [vmem:[#allocation159_spill] sm:$0xff] %v7114_v53  ;;  %v7121_v49 = vld [vmem:[%s8754_s12 + $0x3e4] ss:$8 sps:$4 sm:$0xff]   ;;  %v7130_v61 = vld [vmem:[%s8754_s12 + $0x2e0] ss:$8 sps:$4 sm:$0xff]  }
 0x381   :  { %2793 = vmatprep.subr.bf16.mxu1 %v7088_v3  ;;  %v7116_v20 = vpop.f32.mrf.mxu0  ;;  %9268 = vst [vmem:[#allocation160_spill] sm:$0xff] %v7121_v49  ;;  %2834 = vmatprep.subr.bf16.mxu0 %v7096_v30  ;;  %9269 = vst [vmem:[#allocation161_spill] sm:$0xff] %v7130_v61  ;;  %v7148_v30 = vld [vmem:[%s8754_s12 + $0x3d4] ss:$8 sps:$4 sm:$0xff]   ;;  %v1895_v3 = vadd.f32 %v7043_v2, %v6370_v4  ;;  %v1936_v4 = vadd.f32 %v7045_v47, %v6372_v41  ;;  %v7294_v41 = vld [vmem:[%s8754_s12 + $0x380] ss:$8 sps:$4 sm:$0xff]  }
 0x382   :  { %2809 = vmatprep.mubr.bf16.mxu1 %v1996_v31  ;;  %2850 = vmatprep.mubr.bf16.mxu0 %v1998_v39  ;;  %v7137_v39 = vld [vmem:[%s8754_s12 + $0x3e0] ss:$8 sps:$4 sm:$0xff]   ;;  %v7142_v31 = vld [vmem:[%s8754_s12 + $0x2d4] ss:$8 sps:$4 sm:$0xff]   ;;  %9272 = vst [vmem:[#allocation164_spill] sm:$0xff] %v7148_v30 }
 0x383   :  { %v7124_v12 = vpop.f32.mrf.mxu0  ;;  %9270 = vst [vmem:[#allocation162_spill] sm:$0xff] %v7137_v39  ;;  %9271 = vst [vmem:[#allocation163_spill] sm:$0xff] %v7142_v31 }
 0x384   :  { %2794 = vmatpush2.bf16.msra.mxu1 %v7102_v5  ;;  %2835 = vmatpush2.bf16.msra.mxu0 %v7109_v28 }
 0x385   :  { %2795 = vmatprep.subr.bf16.mxu1 %v7114_v53  ;;  %v2052_v5 = vpop.f32.mrf.mxu0  ;;  %2836 = vmatprep.subr.bf16.mxu0 %v7121_v49  ;;  %v7154_v53 = vld [vmem:[%s8754_s12 + $0x2d0] ss:$8 sps:$4 sm:$0xff]   ;;  %v1969_v49 = vsub.s32 6, %v5841_v33 }
 0x386   :  { %9273 = vst [vmem:[#allocation165_spill] sm:$0xff] %v7154_v53  ;;  %v7161_v5 = vld [vmem:[%s8754_s12 + $0x3d0] ss:$8 sps:$4 sm:$0xff]  }
 0x387   :  { %v2053_v28 = vpop.f32.mrf.mxu0  ;;  %9274 = vst [vmem:[#allocation166_spill] sm:$0xff] %v7161_v5  ;;  %v7274_v2 = vrot.slane %v6866_v52, %v1969_v49  ;;  %v9288_v49 = vld [vmem:[#allocation29_spill] sm:$0xff] }
 0x388   :  { %2796 = vmatpush2.bf16.msra.mxu1 %v7130_v61  ;;  %2837 = vmatpush2.bf16.msra.mxu0 %v7137_v39  ;;  %v7166_v28 = vld [vmem:[%s8754_s12 + $0x2c4] ss:$8 sps:$4 sm:$0xff]   ;;  %v7190_v39 = vld [vmem:[%s8754_s12 + $0x2b4] ss:$8 sps:$4 sm:$0xff]  }
 0x389   :  { %2797 = vmatprep.subr.bf16.mxu1 %v7142_v31  ;;  %9275 = vst [vmem:[#allocation167_spill] sm:$0xff] %v7166_v28  ;;  %2838 = vmatprep.subr.bf16.mxu0 %v7148_v30  ;;  %v7172_v61 = vld [vmem:[%s8754_s12 + $0x3c4] ss:$8 sps:$4 sm:$0xff]   ;;  %v7178_v31 = vld [vmem:[%s8754_s12 + $0x2c0] ss:$8 sps:$4 sm:$0xff]   ;;  %9279 = vst [vmem:[#allocation171_spill] sm:$0xff] %v7190_v39 }
 0x38a   :  { %9276 = vst [vmem:[#allocation168_spill] sm:$0xff] %v7172_v61  ;;  %9277 = vst [vmem:[#allocation169_spill] sm:$0xff] %v7178_v31  ;;  %v7185_v30 = vld [vmem:[%s8754_s12 + $0x3c0] ss:$8 sps:$4 sm:$0xff]  }
 0x38b   :  { %9278 = vst [vmem:[#allocation170_spill] sm:$0xff] %v7185_v30 }
 0x38c   :  { %2798 = vmatpush2.bf16.msra.mxu1 %v7154_v53  ;;  %2839 = vmatpush2.bf16.msra.mxu0 %v7161_v5  ;;  %v7196_v53 = vld [vmem:[%s8754_s12 + $0x3b4] ss:$8 sps:$4 sm:$0xff]   ;;  %v7214_v5 = vld [vmem:[%s8754_s12 + $0x2a4] ss:$8 sps:$4 sm:$0xff]  }
 0x38d   :  { %2799 = vmatprep.subr.bf16.mxu1 %v7166_v28  ;;  %2840 = vmatprep.subr.bf16.mxu0 %v7172_v61  ;;  %9280 = vst [vmem:[#allocation172_spill] sm:$0xff] %v7196_v53  ;;  %v7202_v28 = vld [vmem:[%s8754_s12 + $0x2b0] ss:$8 sps:$4 sm:$0xff]   ;;  %9283 = vst [vmem:[#allocation175_spill] sm:$0xff] %v7214_v5 }
 0x38e   :  { %9281 = vst [vmem:[#allocation173_spill] sm:$0xff] %v7202_v28  ;;  %v7209_v61 = vld [vmem:[%s8754_s12 + $0x3b0] ss:$8 sps:$4 sm:$0xff]  }
 0x38f   :  { %9282 = vst [vmem:[#allocation174_spill] sm:$0xff] %v7209_v61 }
 0x390   :  { %2800 = vmatpush2.bf16.msra.mxu1 %v7178_v31  ;;  %2841 = vmatpush2.bf16.msra.mxu0 %v7185_v30  ;;  %v7220_v31 = vld [vmem:[%s8754_s12 + $0x3a4] ss:$8 sps:$4 sm:$0xff]   ;;  %v1961_v30 = vsub.s32 4, %v5841_v33  ;;  %v7264_v33 = vld [vmem:[%s8754_s12 + $0x390] ss:$8 sps:$4 sm:$0xff]  }
 0x391   :  { %2801 = vmatprep.subr.bf16.mxu1 %v7190_v39  ;;  %2842 = vmatprep.subr.bf16.mxu0 %v7196_v53  ;;  %v7226_v39 = vld [vmem:[%s8754_s12 + $0x2a0] ss:$8 sps:$4 sm:$0xff]  }
 0x392   :  { %9284 = vst [vmem:[#allocation176_spill] sm:$0xff] %v7226_v39  ;;  %v7234_v53 = vld [vmem:[%s8754_s12 + $0x3a0] ss:$8 sps:$4 sm:$0xff]   ;;  %v7257_v34 = vrot.slane %v6866_v52, %v1961_v30  ;;  %v7280_v30 = vld [vmem:[%s8754_s12 + $0x384] ss:$8 sps:$4 sm:$0xff]   ;;  %v1989_v52 = vadd.f32 %v7274_v2, %v1936_v4  ;;  %v628_v4 = vrot.slane %v9288_v49, %v5850_v36  ;;  %v9298_v49 = vld [vmem:[#allocation24_spill] sm:$0xff] }
 0x393   :  { %9285 = vst [vmem:[#allocation177_spill] sm:$0xff] %v7234_v53 }
 0x394   :  { %2802 = vmatpush2.bf16.msra.mxu1 %v7202_v28  ;;  %2843 = vmatpush2.bf16.msra.mxu0 %v7209_v61  ;;  %v7239_v28 = vld [vmem:[%s8754_s12 + $0x294] ss:$8 sps:$4 sm:$0xff]   ;;  %9287 = vst [vmem:[#allocation179_spill] sm:$0xff] %v7257_v34 }
 0x395   :  { %2803 = vmatprep.subr.bf16.mxu1 %v7214_v5  ;;  %9286 = vst [vmem:[#allocation178_spill] sm:$0xff] %v7239_v28  ;;  %2844 = vmatprep.subr.bf16.mxu0 %v7220_v31  ;;  %v7246_v61 = vld [vmem:[%s8754_s12 + $0x394] ss:$8 sps:$4 sm:$0xff]   ;;  %v7252_v5 = vld [vmem:[%s8754_s12 + $0x290] ss:$8 sps:$4 sm:$0xff]  }
 0x398   :  { %2804 = vmatpush2.bf16.msra.mxu1 %v7226_v39  ;;  %2845 = vmatpush2.bf16.msra.mxu0 %v7234_v53  ;;  %v7269_v39 = vld [vmem:[%s8754_s12 + $0x284] ss:$8 sps:$4 sm:$0xff]   ;;  %v1987_v53 = vadd.f32 %v7257_v34, %v1895_v3  ;;  %v1997_v3 = vpack.c.bf16 %v1989_v52, %v1989_v52  ;;  %v9289_v52 = vld [vmem:[#allocation16_spill] sm:$0xff] }
 0x399   :  { %2805 = vmatprep.subr.bf16.mxu1 %v7239_v28  ;;  %2846 = vmatprep.subr.bf16.mxu0 %v7246_v61  ;;  %v7286_v28 = vld [vmem:[%s8754_s12 + $0x280] ss:$8 sps:$4 sm:$0xff]  }
 0x39a   :  { %v1995_v47 = vpack.c.bf16 %v1987_v53, %v1987_v53  ;;  %v4911_v53 = vld [vmem:[%s8752_s1 + $0x4] sm:$0xf] }
 0x39c   :  { %2806 = vmatpush2.bf16.msra.mxu1 %v7252_v5  ;;  %2847 = vmatpush2.bf16.msra.mxu0 %v7264_v33 }
 0x39d   :  { %2807 = vmatprep.subr.bf16.mxu1 %v7269_v39  ;;  %2848 = vmatprep.subr.bf16.mxu0 %v7280_v30 }
 0x3a0   :  { %2808 = vmatpush2.bf16.msra.mxu1 %v7286_v28  ;;  %2849 = vmatpush2.bf16.msra.mxu0 %v7294_v41 }
 0x3a1   :  { %4912 = vmatprep.subr.msk.bf16.mxu1 %vm1269_vm0, %v5965_v22  ;;  %4914 = vmatprep.subr.msk.bf16.mxu0 %vm1269_vm0, %v5967_v23 }
 0x3a3   :  { %2810 = vmatmul.mubr.bf16.vlgmr.msra.gmra.mxu1 %v1995_v47  ;;  %2851 = vmatmul.mubr.bf16.vlgmr.msra.gmra.mxu0 %v1997_v3  ;;  %v9290_v47 = vld [vmem:[#allocation17_spill] sm:$0xff]  ;;  %v9291_v3 = vld [vmem:[#allocation18_spill] sm:$0xff] }
 0x3a4   :  { %2895 = vmatpush1.bf16.msra.mxu1 %v5985_v42  ;;  %2936 = vmatpush1.bf16.msra.mxu0 %v5988_v43 }
 0x3a5   :  { %2912 = vmatprep.mubr.bf16.mxu1 %v9144_v60  ;;  %2953 = vmatprep.mubr.bf16.mxu0 %v9144_v60 }
 0x3a6   :  { %4916 = vmatprep.subr.msk.bf16.mxu1 %vm1269_vm0, %v5990_v44  ;;  %4918 = vmatprep.subr.msk.bf16.mxu0 %vm1269_vm0, %v5992_v45 }
 0x3ab   :  { %4913 = vmatmul.mubr.msk.bf16.vlgmr.msra.gmra.mxu1 %vm1265_vm1, %v4911_v53  ;;  %4915 = vmatmul.mubr.msk.bf16.vlgmr.msra.gmra.mxu0 %vm1265_vm1, %v4911_v53 }
 0x3ac   :  { %2977 = vmatpush1.bf16.msra.mxu1 %v6018_v54  ;;  %3018 = vmatpush1.bf16.msra.mxu0 %v6021_v55 }
 0x3ad   :  { %2994 = vmatprep.mubr.bf16.mxu1 %v9144_v60  ;;  %3035 = vmatprep.mubr.bf16.mxu0 %v9144_v60 }
 0x3ae   :  { %3044 = vmatprep.subr.bf16.mxu1 %v6023_v56  ;;  %3085 = vmatprep.subr.bf16.mxu0 %v6025_v57 }
 0x3b3   :  { %4917 = vmatmul.mubr.msk.bf16.vlgmr.msra.gmra.mxu1 %vm1265_vm1, %v4911_v53  ;;  %4919 = vmatmul.mubr.msk.bf16.vlgmr.msra.gmra.mxu0 %vm1265_vm1, %v4911_v53  ;;  %v9292_v53 = vld [vmem:[#allocation19_spill] sm:$0xff] }
 0x3b4   :  { %3045 = vmatpush1.bf16.msra.mxu1 %v6047_v62  ;;  %3086 = vmatpush1.bf16.msra.mxu0 %v6049_v63 }
 0x3b5   :  { %3046 = vmatprep.subr.bf16.mxu1 %v6051_v0  ;;  %3087 = vmatprep.subr.bf16.mxu0 %v6053_v1 }
 0x3b6   :  { %3076 = vmatprep.mubr.bf16.mxu1 %v9144_v60  ;;  %3117 = vmatprep.mubr.bf16.mxu0 %v9144_v60 }
 0x3b8   :  { %3047 = vmatpush1.bf16.msra.mxu1 %v6071_v6  ;;  %3088 = vmatpush1.bf16.msra.mxu0 %v6073_v7 }
 0x3b9   :  { %3048 = vmatprep.subr.bf16.mxu1 %v6077_v8  ;;  %3089 = vmatprep.subr.bf16.mxu0 %v6079_v9 }
 0x3bc   :  { %3049 = vmatpush1.bf16.msra.mxu1 %v6097_v14  ;;  %3090 = vmatpush1.bf16.msra.mxu0 %v6099_v15 }
 0x3bd   :  { %3050 = vmatprep.subr.bf16.mxu1 %v6103_v16  ;;  %3091 = vmatprep.subr.bf16.mxu0 %v6105_v17 }
 0x3c0   :  { %3051 = vmatpush1.bf16.msra.mxu1 %v6121_v24  ;;  %3092 = vmatpush1.bf16.msra.mxu0 %v6123_v25  ;;  %v9385_v25 = vld [vmem:[#allocation118_spill] sm:$0xff] }
 0x3c1   :  { %3052 = vmatprep.subr.bf16.mxu1 %v6127_v26  ;;  %3093 = vmatprep.subr.bf16.mxu0 %v6129_v27 }
 0x3c4   :  { %3053 = vmatpush1.bf16.msra.mxu1 %v6145_v32  ;;  %3094 = vmatpush1.bf16.msra.mxu0 %v6147_v35  ;;  %v9293_v32 = vld [vmem:[#allocation31_spill] sm:$0xff]  ;;  %v9294_v35 = vld [vmem:[#allocation20_spill] sm:$0xff] }
 0x3c5   :  { %3054 = vmatprep.subr.bf16.mxu1 %v6151_v37  ;;  %3095 = vmatprep.subr.bf16.mxu0 %v6153_v38  ;;  %v998_v27 = vadd.f32 %v9293_v32, %v628_v4  ;;  %v9295_v37 = vld [vmem:[#allocation21_spill] sm:$0xff]  ;;  %v9296_v38 = vld [vmem:[#allocation22_spill] sm:$0xff]  ;;  %v9302_v32 = vld [vmem:[#allocation28_spill] sm:$0xff] }
 0x3c6   :  { %v9303_v4 = vld [vmem:[#allocation33_spill] sm:$0xff] }
 0x3c7   :  { %v2874_v26 = vpack.c.bf16 %v998_v27, %v998_v27  ;;  %v9305_v27 = vld [vmem:[#allocation35_spill] sm:$0xff] }
 0x3c8   :  { %3055 = vmatpush1.bf16.msra.mxu1 %v6169_v48  ;;  %3096 = vmatpush1.bf16.msra.mxu0 %v9289_v52  ;;  %v9297_v48 = vld [vmem:[#allocation23_spill] sm:$0xff]  ;;  %v9299_v52 = vld [vmem:[#allocation25_spill] sm:$0xff] }
 0x3c9   :  { %3056 = vmatprep.subr.bf16.mxu1 %v9290_v47  ;;  %3097 = vmatprep.subr.bf16.mxu0 %v9291_v3  ;;  %v9300_v47 = vld [vmem:[#allocation26_spill] sm:$0xff]  ;;  %v9382_v3 = vld [vmem:[#allocation115_spill] sm:$0xff] }
 0x3cc   :  { %3057 = vmatpush1.bf16.msra.mxu1 %v9292_v53  ;;  %3098 = vmatpush1.bf16.msra.mxu0 %v9294_v35  ;;  %v9301_v53 = vld [vmem:[#allocation27_spill] sm:$0xff]  ;;  %v9315_v35 = vld [vmem:[#allocation45_spill] sm:$0xff] }
 0x3cd   :  { %3058 = vmatprep.subr.bf16.mxu1 %v9295_v37  ;;  %3099 = vmatprep.subr.bf16.mxu0 %v9296_v38  ;;  %v9304_v37 = vld [vmem:[#allocation34_spill] sm:$0xff]  ;;  %v9314_v38 = vld [vmem:[#allocation44_spill] sm:$0xff] }
 0x3d0   :  { %3059 = vmatpush1.bf16.msra.mxu1 %v9297_v48  ;;  %3100 = vmatpush1.bf16.msra.mxu0 %v9298_v49  ;;  %v9306_v49 = vld [vmem:[#allocation36_spill] sm:$0xff]  ;;  %v9309_v48 = vld [vmem:[#allocation39_spill] sm:$0xff] }
 0x3d1   :  { %3126 = vmatprep.subr.bf16.mxu1 %v9299_v52  ;;  %3167 = vmatprep.subr.bf16.mxu0 %v9300_v47  ;;  %v9307_v52 = vld [vmem:[#allocation37_spill] sm:$0xff]  ;;  %v9308_v47 = vld [vmem:[#allocation38_spill] sm:$0xff] }
 0x3d3   :  { %3077 = vmatmul.mubr.bf16.vlgmr.msra.gmra.mxu1 %v2874_v26  ;;  %3118 = vmatmul.mubr.bf16.vlgmr.msra.gmra.mxu0 %v2874_v26 }
 0x3d4   :  { %3127 = vmatpush1.bf16.msra.mxu1 %v9301_v53  ;;  %3168 = vmatpush1.bf16.msra.mxu0 %v9302_v32  ;;  %v9310_v53 = vld [vmem:[#allocation40_spill] sm:$0xff]  ;;  %v9311_v32 = vld [vmem:[#allocation41_spill] sm:$0xff] }
 0x3d5   :  { %3128 = vmatprep.subr.bf16.mxu1 %v9303_v4  ;;  %3169 = vmatprep.subr.bf16.mxu0 %v9304_v37  ;;  %v9312_v4 = vld [vmem:[#allocation42_spill] sm:$0xff]  ;;  %v9313_v37 = vld [vmem:[#allocation43_spill] sm:$0xff] }
 0x3d6   :  { %3158 = vmatprep.mubr.bf16.mxu1 %v9144_v60  ;;  %3199 = vmatprep.mubr.bf16.mxu0 %v9144_v60 }
 0x3d8   :  { %3129 = vmatpush1.bf16.msra.mxu1 %v9305_v27  ;;  %3170 = vmatpush1.bf16.msra.mxu0 %v9306_v49  ;;  %v9316_v27 = vld [vmem:[#allocation46_spill] sm:$0xff] }
 0x3d9   :  { %3130 = vmatprep.subr.bf16.mxu1 %v9307_v52  ;;  %3171 = vmatprep.subr.bf16.mxu0 %v9308_v47  ;;  %v9377_v47 = vld [vmem:[#allocation110_spill] sm:$0xff]  ;;  %v9379_v52 = vld [vmem:[#allocation112_spill] sm:$0xff] }
 0x3da   :  { %v9381_v49 = vld [vmem:[#allocation114_spill] sm:$0xff] }
 0x3dc   :  { %3131 = vmatpush1.bf16.msra.mxu1 %v9309_v48  ;;  %3172 = vmatpush1.bf16.msra.mxu0 %v9310_v53  ;;  %v9317_v48 = vld [vmem:[#allocation50_spill] sm:$0xff]  ;;  %v9318_v53 = vld [vmem:[#allocation51_spill] sm:$0xff] }
 0x3dd   :  { %3132 = vmatprep.subr.bf16.mxu1 %v9311_v32  ;;  %3173 = vmatprep.subr.bf16.mxu0 %v9312_v4  ;;  %v9319_v32 = vld [vmem:[#allocation52_spill] sm:$0xff]  ;;  %v9320_v4 = vld [vmem:[#allocation53_spill] sm:$0xff] }
 0x3e0   :  { %3133 = vmatpush1.bf16.msra.mxu1 %v9313_v37  ;;  %3174 = vmatpush1.bf16.msra.mxu0 %v9314_v38  ;;  %v9321_v37 = vld [vmem:[#allocation54_spill] sm:$0xff]  ;;  %v9322_v38 = vld [vmem:[#allocation55_spill] sm:$0xff] }
 0x3e1   :  { %3134 = vmatprep.subr.bf16.mxu1 %v9315_v35  ;;  %3175 = vmatprep.subr.bf16.mxu0 %v9316_v27  ;;  %v9323_v35 = vld [vmem:[#allocation56_spill] sm:$0xff]  ;;  %v9324_v27 = vld [vmem:[#allocation57_spill] sm:$0xff] }
 0x3e4   :  { %3135 = vmatpush1.bf16.msra.mxu1 %v6376_v59  ;;  %3176 = vmatpush1.bf16.msra.mxu0 %v6378_v40  ;;  %v9325_v59 = vld [vmem:[#allocation58_spill] sm:$0xff]  ;;  %v9326_v40 = vld [vmem:[#allocation59_spill] sm:$0xff] }
 0x3e5   :  { %3136 = vmatprep.subr.bf16.mxu1 %v6386_v19  ;;  %3177 = vmatprep.subr.bf16.mxu0 %v9317_v48  ;;  %v9327_v19 = vld [vmem:[#allocation60_spill] sm:$0xff]  ;;  %v9328_v48 = vld [vmem:[#allocation61_spill] sm:$0xff] }
 0x3e8   :  { %3137 = vmatpush1.bf16.msra.mxu1 %v9318_v53  ;;  %3178 = vmatpush1.bf16.msra.mxu0 %v9319_v32  ;;  %v9329_v53 = vld [vmem:[#allocation62_spill] sm:$0xff]  ;;  %v9375_v32 = vld [vmem:[#allocation108_spill] sm:$0xff] }
 0x3e9   :  { %3138 = vmatprep.subr.bf16.mxu1 %v9320_v4  ;;  %3179 = vmatprep.subr.bf16.mxu0 %v9321_v37  ;;  %v9330_v4 = vld [vmem:[#allocation63_spill] sm:$0xff]  ;;  %v9343_v37 = vld [vmem:[#allocation76_spill] sm:$0xff] }
 0x3ec   :  { %3139 = vmatpush1.bf16.msra.mxu1 %v9322_v38  ;;  %3180 = vmatpush1.bf16.msra.mxu0 %v9323_v35  ;;  %v9331_v38 = vld [vmem:[#allocation64_spill] sm:$0xff]  ;;  %v9332_v35 = vld [vmem:[#allocation65_spill] sm:$0xff] }
 0x3ed   :  { %3140 = vmatprep.subr.bf16.mxu1 %v9324_v27  ;;  %3181 = vmatprep.subr.bf16.mxu0 %v9325_v59  ;;  %v9333_v27 = vld [vmem:[#allocation66_spill] sm:$0xff]  ;;  %v9342_v59 = vld [vmem:[#allocation75_spill] sm:$0xff] }
 0x3f0   :  { %3141 = vmatpush1.bf16.msra.mxu1 %v9326_v40  ;;  %3182 = vmatpush1.bf16.msra.mxu0 %v9327_v19  ;;  %v4920_v19 = vld [vmem:[%s8756_s2 + $0x4] sm:$0xf]  ;;  %v9334_v40 = vld [vmem:[#allocation67_spill] sm:$0xff] }
 0x3f1   :  { %3243 = vmatprep.subr.bf16.mxu1 %v9328_v48  ;;  %3270 = vmatprep.subr.bf16.mxu0 %v9329_v53  ;;  %v9335_v48 = vld [vmem:[#allocation68_spill] sm:$0xff]  ;;  %v9337_v53 = vld [vmem:[#allocation70_spill] sm:$0xff] }
 0x3f3   :  { %3159 = vmatmul.mubr.bf16.vlgmr.msra.gmra.mxu1 %v2874_v26  ;;  %3200 = vmatmul.mubr.bf16.vlgmr.msra.gmra.mxu0 %v2874_v26  ;;  %v9336_v26 = vld [vmem:[#allocation69_spill] sm:$0xff] }
 0x3f4   :  { %3244 = vmatpush1.bf16.msra.mxu1 %v9330_v4  ;;  %3261 = vmatprep.mubr.bf16.mxu1 %v9144_v60  ;;  %v9338_v4 = vld [vmem:[#allocation71_spill] sm:$0xff] }
 0x3f5   :  { %3311 = vmatprep.subr.bf16.mxu1 %v9331_v38  ;;  %3271 = vmatpush1.bf16.msra.mxu0 %v9332_v35  ;;  %v9339_v38 = vld [vmem:[#allocation72_spill] sm:$0xff]  ;;  %v9340_v35 = vld [vmem:[#allocation73_spill] sm:$0xff] }
 0x3f6   :  { %3272 = vmatprep.subr.bf16.mxu0 %v9333_v27  ;;  %v9341_v27 = vld [vmem:[#allocation74_spill] sm:$0xff] }
 0x3f9   :  { %3273 = vmatpush1.bf16.msra.mxu0 %v9334_v40  ;;  %v9344_v40 = vld [vmem:[#allocation77_spill] sm:$0xff] }
 0x3fa   :  { %3274 = vmatprep.subr.bf16.mxu0 %v9335_v48  ;;  %v9346_v48 = vld [vmem:[#allocation79_spill] sm:$0xff] }
 0x3fb   :  { %4921 = vmatmul.mubr.msk.bf16.vlgmr.msra.gmra.mxu1 %vm2010_vm2, %v4920_v19  ;;  %v9345_v19 = vld [vmem:[#allocation78_spill] sm:$0xff] }
 0x3fc   :  { %3312 = vmatpush1.bf16.msra.mxu1 %v9336_v26  ;;  %v9347_v26 = vld [vmem:[#allocation80_spill] sm:$0xff] }
 0x3fd   :  { %3313 = vmatprep.subr.bf16.mxu1 %v9337_v53  ;;  %3275 = vmatpush1.bf16.msra.mxu0 %v9338_v4  ;;  %v9348_v53 = vld [vmem:[#allocation81_spill] sm:$0xff]  ;;  %v9349_v4 = vld [vmem:[#allocation82_spill] sm:$0xff] }
 0x3fe   :  { %3276 = vmatprep.subr.bf16.mxu0 %v9339_v38  ;;  %v9350_v38 = vld [vmem:[#allocation83_spill] sm:$0xff] }
 0x400   :  { %3314 = vmatpush1.bf16.msra.mxu1 %v9340_v35  ;;  %v9351_v35 = vld [vmem:[#allocation84_spill] sm:$0xff] }
 0x401   :  { %3315 = vmatprep.subr.bf16.mxu1 %v9341_v27  ;;  %3277 = vmatpush1.bf16.msra.mxu0 %v9342_v59  ;;  %v9352_v27 = vld [vmem:[#allocation85_spill] sm:$0xff]  ;;  %v9353_v59 = vld [vmem:[#allocation86_spill] sm:$0xff] }
 0x402   :  { %3278 = vmatprep.subr.bf16.mxu0 %v9343_v37  ;;  %v9354_v37 = vld [vmem:[#allocation87_spill] sm:$0xff] }
 0x404   :  { %3316 = vmatpush1.bf16.msra.mxu1 %v9344_v40  ;;  %v9355_v40 = vld [vmem:[#allocation88_spill] sm:$0xff] }
 0x405   :  { %3317 = vmatprep.subr.bf16.mxu1 %v9345_v19  ;;  %3279 = vmatpush1.bf16.msra.mxu0 %v9346_v48  ;;  %v9356_v19 = vld [vmem:[#allocation89_spill] sm:$0xff]  ;;  %v9357_v48 = vld [vmem:[#allocation90_spill] sm:$0xff] }
 0x406   :  { %3280 = vmatprep.subr.bf16.mxu0 %v9347_v26  ;;  %v9358_v26 = vld [vmem:[#allocation91_spill] sm:$0xff] }
 0x408   :  { %3318 = vmatpush1.bf16.msra.mxu1 %v9348_v53  ;;  %v9359_v53 = vld [vmem:[#allocation92_spill] sm:$0xff] }
 0x409   :  { %3319 = vmatprep.subr.bf16.mxu1 %v9349_v4  ;;  %3281 = vmatpush1.bf16.msra.mxu0 %v9350_v38  ;;  %v9360_v4 = vld [vmem:[#allocation93_spill] sm:$0xff]  ;;  %v9361_v38 = vld [vmem:[#allocation94_spill] sm:$0xff] }
 0x40a   :  { %3282 = vmatprep.subr.bf16.mxu0 %v9351_v35  ;;  %v9362_v35 = vld [vmem:[#allocation95_spill] sm:$0xff] }
 0x40c   :  { %3320 = vmatpush1.bf16.msra.mxu1 %v9352_v27  ;;  %v9363_v27 = vld [vmem:[#allocation96_spill] sm:$0xff] }
 0x40d   :  { %3321 = vmatprep.subr.bf16.mxu1 %v9353_v59  ;;  %3283 = vmatpush1.bf16.msra.mxu0 %v9354_v37  ;;  %v9364_v59 = vld [vmem:[#allocation97_spill] sm:$0xff]  ;;  %v9365_v37 = vld [vmem:[#allocation98_spill] sm:$0xff] }
 0x40e   :  { %3284 = vmatprep.subr.bf16.mxu0 %v9355_v40  ;;  %v9366_v40 = vld [vmem:[#allocation99_spill] sm:$0xff] }
 0x410   :  { %3322 = vmatpush1.bf16.msra.mxu1 %v9356_v19  ;;  %v9367_v19 = vld [vmem:[#allocation100_spill] sm:$0xff] }
 0x411   :  { %3323 = vmatprep.subr.bf16.mxu1 %v9357_v48  ;;  %3285 = vmatpush1.bf16.msra.mxu0 %v9358_v26  ;;  %v9368_v48 = vld [vmem:[#allocation101_spill] sm:$0xff]  ;;  %v9369_v26 = vld [vmem:[#allocation102_spill] sm:$0xff] }
 0x412   :  { %3286 = vmatprep.subr.bf16.mxu0 %v9359_v53  ;;  %v9370_v53 = vld [vmem:[#allocation103_spill] sm:$0xff] }
 0x414   :  { %3324 = vmatpush1.bf16.msra.mxu1 %v9360_v4  ;;  %v9371_v4 = vld [vmem:[#allocation104_spill] sm:$0xff] }
 0x415   :  { %3325 = vmatprep.subr.bf16.mxu1 %v9361_v38  ;;  %3287 = vmatpush2.bf16.msra.mxu0 %v9362_v35  ;;  %v9372_v38 = vld [vmem:[#allocation105_spill] sm:$0xff]  ;;  %v9373_v35 = vld [vmem:[#allocation106_spill] sm:$0xff] }
 0x416   :  { %3288 = vmatprep.subr.bf16.mxu0 %v9363_v27  ;;  %v9374_v27 = vld [vmem:[#allocation107_spill] sm:$0xff] }
 0x418   :  { %3326 = vmatpush1.bf16.msra.mxu1 %v9364_v59 }
 0x419   :  { %3327 = vmatprep.subr.bf16.mxu1 %v9365_v37  ;;  %3289 = vmatpush2.bf16.msra.mxu0 %v9366_v40  ;;  %v9376_v40 = vld [vmem:[#allocation109_spill] sm:$0xff] }
 0x41a   :  { %3290 = vmatprep.subr.bf16.mxu0 %v9367_v19 }
 0x41c   :  { %3328 = vmatpush2.bf16.msra.mxu1 %v9368_v48 }
 0x41d   :  { %3329 = vmatprep.subr.bf16.mxu1 %v9369_v26  ;;  %3291 = vmatpush2.bf16.msra.mxu0 %v9370_v53  ;;  %v9378_v26 = vld [vmem:[#allocation111_spill] sm:$0xff] }
 0x41e   :  { %3292 = vmatprep.subr.bf16.mxu0 %v9371_v4 }
 0x420   :  { %3330 = vmatpush2.bf16.msra.mxu1 %v9372_v38  ;;  %v9380_v38 = vld [vmem:[#allocation113_spill] sm:$0xff] }
 0x421   :  { %3331 = vmatprep.subr.bf16.mxu1 %v9373_v35  ;;  %3293 = vmatpush2.bf16.msra.mxu0 %v9374_v27 }
 0x422   :  { %3294 = vmatprep.subr.bf16.mxu0 %v9375_v32  ;;  %v9383_v32 = vld [vmem:[#allocation116_spill] sm:$0xff] }
 0x423   :  { %v2729_v59 = vpop.f32.mrf.mxu1  ;;  %v2770_v37 = vpop.f32.mrf.mxu0 }
 0x424   :  { %3332 = vmatpush2.bf16.msra.mxu1 %v9376_v40  ;;  %v9384_v40 = vld [vmem:[#allocation117_spill] sm:$0xff] }
 0x425   :  { %v2731_v19 = vpop.f32.mrf.mxu1  ;;  %v2772_v48 = vpop.f32.mrf.mxu0  ;;  %3333 = vmatprep.subr.bf16.mxu1 %v9377_v47  ;;  %3295 = vmatpush2.bf16.msra.mxu0 %v9378_v26  ;;  %v9386_v47 = vld [vmem:[#allocation119_spill] sm:$0xff]  ;;  %v9387_v26 = vld [vmem:[#allocation120_spill] sm:$0xff] }
 0x426   :  { %3296 = vmatprep.subr.bf16.mxu0 %v9379_v52  ;;  %v9389_v52 = vld [vmem:[#allocation122_spill] sm:$0xff] }
 0x427   :  { %v2733_v53 = vpop.f32.mrf.mxu1  ;;  %v2774_v4 = vpop.f32.mrf.mxu0 }
 0x428   :  { %3334 = vmatpush2.bf16.msra.mxu1 %v9380_v38  ;;  %v9388_v53 = vld [vmem:[#allocation121_spill] sm:$0xff]  ;;  %v9390_v4 = vld [vmem:[#allocation123_spill] sm:$0xff]  ;;  %v9391_v38 = vld [vmem:[#allocation124_spill] sm:$0xff] }
 0x429   :  { %v2734_v35 = vpop.f32.mrf.mxu1  ;;  %v2775_v27 = vpop.f32.mrf.mxu0  ;;  %3335 = vmatprep.subr.bf16.mxu1 %v9381_v49  ;;  %3297 = vmatpush2.bf16.msra.mxu0 %v9382_v3  ;;  %v9392_v49 = vld [vmem:[#allocation125_spill] sm:$0xff]  ;;  %v9393_v3 = vld [vmem:[#allocation126_spill] sm:$0xff] }
 0x42a   :  { %3298 = vmatprep.subr.bf16.mxu0 %v9383_v32  ;;  %v9394_v35 = vld [vmem:[#allocation127_spill] sm:$0xff]  ;;  %v9395_v27 = vld [vmem:[#allocation128_spill] sm:$0xff]  ;;  %v2732_v32 = vadd.f32 %v2731_v19, %v7124_v12 }
 0x42c   :  { %3336 = vmatpush2.bf16.msra.mxu1 %v9384_v40  ;;  %v1242_v40 = vld [vmem:[%s8758_s14] sm:$0x3] }
 0x42d   :  { %3337 = vmatprep.subr.bf16.mxu1 %v9385_v25  ;;  %3299 = vmatpush2.bf16.msra.mxu0 %v9386_v47  ;;  %v2730_v25 = vadd.f32 %v2729_v59, %v7116_v20  ;;  %v7476_v20 = vrot.slane %v1242_v40, %v5850_v36 }
 0x42e   :  { %3300 = vmatprep.subr.bf16.mxu0 %v9387_v26 }
 0x42f   :  { %v2771_v47 = vadd.f32 %v2770_v37, %v2730_v25  ;;  %9398 = vst [vmem:[#allocation31_spill] sm:$0xff] %v7476_v20 }
 0x430   :  { %3338 = vmatpush2.bf16.msra.mxu1 %v9388_v53  ;;  %v2773_v53 = vadd.f32 %v2772_v48, %v2732_v32 }
 0x431   :  { %3339 = vmatprep.subr.bf16.mxu1 %v9389_v52  ;;  %3301 = vmatpush2.bf16.msra.mxu0 %v9390_v4 }
 0x432   :  { %3352 = vmatprep.subr.bf16.mxu0 %v9391_v38  ;;  %v9396_v38 = vld [vmem:[#allocation2_spill] sm:$0xff] }
 0x434   :  { %3340 = vmatpush2.bf16.msra.mxu1 %v9392_v49  ;;  %v7473_v49 = vrot.slane %v1242_v40, %v9396_v38 }
 0x435   :  { %3341 = vmatprep.subr.bf16.mxu1 %v9393_v3 }
 0x436   :  { %9397 = vst [vmem:[#allocation29_spill] sm:$0xff] %v7473_v49 }
 0x438   :  { %3342 = vmatpush2.bf16.msra.mxu1 %v9394_v35 }
 0x439   :  { %3393 = vmatprep.subr.bf16.mxu1 %v9395_v27 }
 0x463   :  { %v2811_v26 = vpop.f32.mrf.mxu1  ;;  %v2852_v4 = vpop.f32.mrf.mxu0 }
 0x464   :  { %v2812_v52 = vadd.f32 %v2811_v26, %v2771_v47 }
 0x465   :  { %v2813_v3 = vpop.f32.mrf.mxu1  ;;  %v2854_v27 = vpop.f32.mrf.mxu0 }
 0x466   :  { %v2853_v35 = vadd.f32 %v2852_v4, %v2812_v52  ;;  %v2814_v24 = vadd.f32 %v2813_v3, %v2773_v53 }
 0x467   :  { %v2815_v12 = vpop.f32.mrf.mxu1  ;;  %v2856_v17 = vpop.f32.mrf.mxu0 }
 0x468   :  { %v2870_v59 = vadd.f32 %v7473_v49, %v2853_v35  ;;  %v2855_v19 = vadd.f32 %v2854_v27, %v2814_v24 }
 0x469   :  { %v2816_v37 = vpop.f32.mrf.mxu1  ;;  %v2857_v25 = vpop.f32.mrf.mxu0 }
 0x46a   :  { %2872 = vst [vmem:[%s8759_s15] sm:$0xff] %v2870_v59  ;;  %v2871_v48 = vadd.f32 %v7476_v20, %v2855_v19 }
 0x46b   :  { %v2914_v32 = vpop.f32.mrf.mxu1  ;;  %v2955_v36 = vpop.f32.mrf.mxu0 }
 0x46c   :  { %2873 = vst [vmem:[%s8759_s15 + $0x8] sm:$0xff] %v2871_v48 }
 0x46d   :  { %v2916_v40 = vpop.f32.mrf.mxu1  ;;  %v2957_v47 = vpop.f32.mrf.mxu0 }
 0x46f   :  { %v2918_v26 = vpop.f32.mrf.mxu1  ;;  %v2959_v53 = vpop.f32.mrf.mxu0 }
 0x471   :  { %v2919_v24 = vpop.f32.mrf.mxu1  ;;  %v2960_v17 = vpop.f32.mrf.mxu0 }
 0x473   :  { %v7486_v52 = vpop.f32.mrf.mxu1  ;;  %v7488_v4 = vpop.f32.mrf.mxu0 }
 0x475   :  { %v2998_v38 = vpop.f32.mrf.mxu1  ;;  %v3039_v3 = vpop.f32.mrf.mxu0 }
 0x477   :  { %v3000_v35 = vpop.f32.mrf.mxu1  ;;  %v3041_v27 = vpop.f32.mrf.mxu0 }
 0x479   :  { %v3001_v12 = vpop.f32.mrf.mxu1  ;;  %v3042_v59 = vpop.f32.mrf.mxu0 }
 0x493   :  { %v3078_v19 = vpop.f32.mrf.mxu1  ;;  %v3119_v48 = vpop.f32.mrf.mxu0 }
 0x494   :  { %v3079_v37 = vadd.f32 %v3078_v19, %v2914_v32  ;;  %v3120_v25 = vadd.f32 %v3119_v48, %v2955_v36  ;;  %v9407_v48 = vld [vmem:[#allocation137_spill] sm:$0xff] }
 0x495   :  { %v3080_v20 = vpop.f32.mrf.mxu1  ;;  %v3121_v26 = vpop.f32.mrf.mxu0 }
 0x496   :  { %v3081_v49 = vadd.f32 %v3080_v20, %v2916_v40  ;;  %v3208_v53 = vadd.f32 %v3079_v37, %v6875_v18  ;;  %v3122_v24 = vadd.f32 %v3121_v26, %v2957_v47  ;;  %v3210_v16 = vadd.f32 %v3120_v25, %v6871_v51  ;;  %v9399_v20 = vld [vmem:[#allocation129_spill] sm:$0xff]  ;;  %v9402_v40 = vld [vmem:[#allocation132_spill] sm:$0xff]  ;;  %v9404_v47 = vld [vmem:[#allocation134_spill] sm:$0xff] }
 0x497   :  { %v3082_v17 = vpop.f32.mrf.mxu1  ;;  %v3123_v14 = vpop.f32.mrf.mxu0  ;;  %v9406_v37 = vld [vmem:[#allocation136_spill] sm:$0xff]  ;;  %v9411_v26 = vld [vmem:[#allocation141_spill] sm:$0xff] }
 0x498   :  { %v3209_v15 = vadd.f32 %v3081_v49, %v6886_v11  ;;  %v3211_v35 = vadd.f32 %v3122_v24, %v6880_v50  ;;  %v3216_v32 = vpack.c.bf16 %v3208_v53, %v3208_v53  ;;  %v3218_v36 = vpack.c.bf16 %v3210_v16, %v3210_v16  ;;  %v9400_v49 = vld [vmem:[#allocation130_spill] sm:$0xff]  ;;  %v9401_v14 = vld [vmem:[#allocation131_spill] sm:$0xff]  ;;  %v9410_v25 = vld [vmem:[#allocation140_spill] sm:$0xff] }
 0x499   :  { %v3083_v27 = vpop.f32.mrf.mxu1  ;;  %v3124_v59 = vpop.f32.mrf.mxu0  ;;  %v9405_v16 = vld [vmem:[#allocation135_spill] sm:$0xff]  ;;  %v9412_v53 = vld [vmem:[#allocation142_spill] sm:$0xff]  ;;  %v9414_v17 = vld [vmem:[#allocation144_spill] sm:$0xff] }
 0x49a   :  { %v3217_v12 = vpack.c.bf16 %v3209_v15, %v3209_v15  ;;  %v3219_v19 = vpack.c.bf16 %v3211_v35, %v3211_v35  ;;  %v9403_v15 = vld [vmem:[#allocation133_spill] sm:$0xff]  ;;  %v9413_v24 = vld [vmem:[#allocation143_spill] sm:$0xff]  ;;  %v9416_v27 = vld [vmem:[#allocation146_spill] sm:$0xff] }
 0x49b   :  { %v9415_v35 = vld [vmem:[#allocation145_spill] sm:$0xff]  ;;  %v9418_v59 = vld [vmem:[#allocation148_spill] sm:$0xff] }
 0x49c   :  { %3302 = vmatprep.mubr.bf16.mxu0 %v3217_v12  ;;  %3343 = vmatprep.mubr.bf16.mxu1 %v3219_v19  ;;  %v9417_v12 = vld [vmem:[#allocation147_spill] sm:$0xff]  ;;  %v9419_v19 = vld [vmem:[#allocation149_spill] sm:$0xff] }
 0x49d   :  { %3303 = vmatmul.mubr.bf16.vlgmr.msra.gmra.mxu0 %v3216_v32  ;;  %3344 = vmatmul.mubr.bf16.vlgmr.msra.gmra.mxu1 %v3218_v36 }
 0x49e   :  { %3353 = vmatpush1.bf16.msra.mxu0 %v6897_v46  ;;  %3394 = vmatpush1.bf16.msra.mxu1 %v6902_v21  ;;  %v9408_v46 = vld [vmem:[#allocation138_spill] sm:$0xff]  ;;  %v9409_v21 = vld [vmem:[#allocation139_spill] sm:$0xff] }
 0x49f   :  { %3354 = vmatprep.subr.bf16.mxu0 %v9399_v20  ;;  %3395 = vmatprep.subr.bf16.mxu1 %v9400_v49  ;;  %v9420_v20 = vld [vmem:[#allocation150_spill] sm:$0xff] }
 0x4a2   :  { %3355 = vmatpush1.bf16.msra.mxu0 %v9401_v14  ;;  %3396 = vmatpush1.bf16.msra.mxu1 %v9402_v40 }
 0x4a3   :  { %3356 = vmatprep.subr.bf16.mxu0 %v9403_v15  ;;  %3397 = vmatprep.subr.bf16.mxu1 %v9404_v47  ;;  %v9421_v15 = vld [vmem:[#allocation151_spill] sm:$0xff] }
 0x4a6   :  { %3357 = vmatpush1.bf16.msra.mxu0 %v9405_v16  ;;  %3398 = vmatpush1.bf16.msra.mxu1 %v9406_v37  ;;  %v9422_v16 = vld [vmem:[#allocation152_spill] sm:$0xff] }
 0x4a7   :  { %3358 = vmatprep.subr.bf16.mxu0 %v9407_v48  ;;  %3399 = vmatprep.subr.bf16.mxu1 %v9408_v46  ;;  %v9423_v48 = vld [vmem:[#allocation153_spill] sm:$0xff] }
 0x4aa   :  { %3359 = vmatpush1.bf16.msra.mxu0 %v9409_v21  ;;  %3400 = vmatpush1.bf16.msra.mxu1 %v9410_v25 }
 0x4ab   :  { %3360 = vmatprep.subr.bf16.mxu0 %v9411_v26  ;;  %3401 = vmatprep.subr.bf16.mxu1 %v9412_v53 }
 0x4ae   :  { %3361 = vmatpush1.bf16.msra.mxu0 %v9413_v24  ;;  %3402 = vmatpush1.bf16.msra.mxu1 %v9414_v17  ;;  %v9424_v17 = vld [vmem:[#allocation154_spill] sm:$0xff] }
 0x4af   :  { %3362 = vmatprep.subr.bf16.mxu0 %v9415_v35  ;;  %3403 = vmatprep.subr.bf16.mxu1 %v9416_v27  ;;  %v9426_v27 = vld [vmem:[#allocation156_spill] sm:$0xff] }
 0x4b2   :  { %3363 = vmatpush1.bf16.msra.mxu0 %v9417_v12  ;;  %3404 = vmatpush1.bf16.msra.mxu1 %v9418_v59  ;;  %v9428_v59 = vld [vmem:[#allocation158_spill] sm:$0xff] }
 0x4b3   :  { %v3160_v32 = vpop.f32.mrf.mxu1  ;;  %3364 = vmatprep.subr.bf16.mxu0 %v9419_v19  ;;  %v3201_v36 = vpop.f32.mrf.mxu0  ;;  %3405 = vmatprep.subr.bf16.mxu1 %v9420_v20  ;;  %v9429_v19 = vld [vmem:[#allocation159_spill] sm:$0xff]  ;;  %v9430_v20 = vld [vmem:[#allocation160_spill] sm:$0xff] }
 0x4b5   :  { %v3162_v49 = vpop.f32.mrf.mxu1  ;;  %v3203_v40 = vpop.f32.mrf.mxu0 }
 0x4b6   :  { %v3163_v14 = vadd.f32 %v3162_v49, %v2998_v38  ;;  %3365 = vmatpush1.bf16.msra.mxu0 %v9421_v15  ;;  %v3204_v47 = vadd.f32 %v3203_v40, %v3039_v3  ;;  %3406 = vmatpush1.bf16.msra.mxu1 %v9422_v16  ;;  %v9425_v3 = vld [vmem:[#allocation155_spill] sm:$0xff]  ;;  %v9432_v40 = vld [vmem:[#allocation162_spill] sm:$0xff]  ;;  %v9435_v16 = vld [vmem:[#allocation165_spill] sm:$0xff] }
 0x4b7   :  { %v3164_v37 = vpop.f32.mrf.mxu1  ;;  %3366 = vmatprep.subr.bf16.mxu0 %v9423_v48  ;;  %v3205_v21 = vpop.f32.mrf.mxu0  ;;  %3407 = vmatprep.subr.bf16.mxu1 %v7068_v29  ;;  %v9427_v29 = vld [vmem:[#allocation157_spill] sm:$0xff]  ;;  %v9433_v15 = vld [vmem:[#allocation163_spill] sm:$0xff] }
 0x4b8   :  { %v3213_v46 = vadd.f32 %v3163_v14, %v7060_v58  ;;  %v3215_v25 = vadd.f32 %v3204_v47, %v7063_v10  ;;  %v9431_v14 = vld [vmem:[#allocation161_spill] sm:$0xff]  ;;  %v9434_v47 = vld [vmem:[#allocation164_spill] sm:$0xff]  ;;  %v9436_v37 = vld [vmem:[#allocation166_spill] sm:$0xff] }
 0x4b9   :  { %v3165_v26 = vpop.f32.mrf.mxu1  ;;  %v3206_v24 = vpop.f32.mrf.mxu0  ;;  %v9437_v48 = vld [vmem:[#allocation167_spill] sm:$0xff]  ;;  %v9439_v21 = vld [vmem:[#allocation169_spill] sm:$0xff] }
 0x4ba   :  { %v3221_v53 = vpack.c.bf16 %v3213_v46, %v3213_v46  ;;  %3367 = vmatpush1.bf16.msra.mxu0 %v7076_v13  ;;  %v3223_v38 = vpack.c.bf16 %v3215_v25, %v3215_v25  ;;  %3408 = vmatpush1.bf16.msra.mxu1 %v9424_v17  ;;  %v9438_v46 = vld [vmem:[#allocation168_spill] sm:$0xff]  ;;  %v9440_v25 = vld [vmem:[#allocation170_spill] sm:$0xff]  ;;  %v9441_v26 = vld [vmem:[#allocation171_spill] sm:$0xff] }
 0x4bb   :  { %3368 = vmatprep.subr.bf16.mxu0 %v9425_v3  ;;  %v7527_v35 = vpop.f32.mrf.mxu1  ;;  %3409 = vmatprep.subr.bf16.mxu1 %v9426_v27  ;;  %v9443_v24 = vld [vmem:[#allocation173_spill] sm:$0xff]  ;;  %v9445_v17 = vld [vmem:[#allocation175_spill] sm:$0xff]  ;;  %v9446_v3 = vld [vmem:[#allocation176_spill] sm:$0xff]  ;;  %v3161_v27 = vadd.f32 %v3160_v32, %v7486_v52 }
 0x4bc   :  { %3384 = vmatprep.mubr.bf16.mxu0 %v3221_v53  ;;  %3425 = vmatprep.mubr.bf16.mxu1 %v3223_v38  ;;  %v9442_v53 = vld [vmem:[#allocation172_spill] sm:$0xff]  ;;  %v9444_v38 = vld [vmem:[#allocation174_spill] sm:$0xff]  ;;  %v9455_v32 = vld [vmem:[#allocation9_spill] sm:$0xff] }
 0x4bd   :  { %v7530_v12 = vpop.f32.mrf.mxu1 }
 0x4be   :  { %3369 = vmatpush2.bf16.msra.mxu0 %v9427_v29  ;;  %3410 = vmatpush2.bf16.msra.mxu1 %v9428_v59  ;;  %v9447_v29 = vld [vmem:[#allocation177_spill] sm:$0xff]  ;;  %v9448_v59 = vld [vmem:[#allocation178_spill] sm:$0xff] }
 0x4bf   :  { %3370 = vmatprep.subr.bf16.mxu0 %v9429_v19  ;;  %v3267_v13 = vpop.f32.mrf.mxu1  ;;  %3411 = vmatprep.subr.bf16.mxu1 %v9430_v20  ;;  %v3202_v19 = vadd.f32 %v3201_v36, %v7488_v4  ;;  %v9454_v4 = vld [vmem:[#allocation8_spill] sm:$0xff]  ;;  %v9456_v36 = vld [vmem:[#allocation10_spill] sm:$0xff]  ;;  %v9457_v20 = vld [vmem:[#allocation11_spill] sm:$0xff] }
 0x4c0   :  { %v3212_v13 = vadd.f32 %v3161_v27, %v7257_v34  ;;  %v9474_v27 = vld [vmem:[#allocation27_spill] sm:$0xff] }
 0x4c1   :  { %v3268_v49 = vpop.f32.mrf.mxu1 }
 0x4c2   :  { %3371 = vmatpush2.bf16.msra.mxu0 %v9431_v14  ;;  %3412 = vmatpush2.bf16.msra.mxu1 %v9432_v40  ;;  %v3220_v52 = vpack.c.bf16 %v3212_v13, %v3212_v13  ;;  %v9458_v49 = vld [vmem:[#allocation12_spill] sm:$0xff]  ;;  %v9459_v14 = vld [vmem:[#allocation13_spill] sm:$0xff]  ;;  %v9460_v40 = vld [vmem:[#allocation14_spill] sm:$0xff] }
 0x4c3   :  { %3372 = vmatprep.subr.bf16.mxu0 %v9433_v15  ;;  %3413 = vmatprep.subr.bf16.mxu1 %v9434_v47  ;;  %v9461_v15 = vld [vmem:[#allocation15_spill] sm:$0xff]  ;;  %v9462_v47 = vld [vmem:[#allocation16_spill] sm:$0xff] }
 0x4c4   :  { %v9478_v13 = vld [vmem:[#allocation35_spill] sm:$0xff] }
 0x4c6   :  { %3373 = vmatpush2.bf16.msra.mxu0 %v9435_v16  ;;  %3414 = vmatpush2.bf16.msra.mxu1 %v9436_v37  ;;  %v9463_v16 = vld [vmem:[#allocation17_spill] sm:$0xff]  ;;  %v9464_v37 = vld [vmem:[#allocation18_spill] sm:$0xff] }
 0x4c7   :  { %3374 = vmatprep.subr.bf16.mxu0 %v9437_v48  ;;  %3415 = vmatprep.subr.bf16.mxu1 %v9438_v46  ;;  %v9465_v48 = vld [vmem:[#allocation19_spill] sm:$0xff]  ;;  %v9466_v46 = vld [vmem:[#allocation20_spill] sm:$0xff] }
 0x4ca   :  { %3375 = vmatpush2.bf16.msra.mxu0 %v9439_v21  ;;  %3416 = vmatpush2.bf16.msra.mxu1 %v9440_v25  ;;  %v9467_v21 = vld [vmem:[#allocation21_spill] sm:$0xff]  ;;  %v9468_v25 = vld [vmem:[#allocation22_spill] sm:$0xff] }
 0x4cb   :  { %3376 = vmatprep.subr.bf16.mxu0 %v9441_v26  ;;  %3417 = vmatprep.subr.bf16.mxu1 %v9442_v53  ;;  %v9469_v26 = vld [vmem:[#allocation23_spill] sm:$0xff]  ;;  %v9470_v53 = vld [vmem:[#allocation30_spill] sm:$0xff] }
 0x4ce   :  { %3377 = vmatpush2.bf16.msra.mxu0 %v9443_v24  ;;  %3418 = vmatpush2.bf16.msra.mxu1 %v9444_v38  ;;  %v3438_v24 = vpack.c.bf16 %v9470_v53, %v9470_v53  ;;  %v9471_v38 = vld [vmem:[#allocation24_spill] sm:$0xff] }
 0x4cf   :  { %3378 = vmatprep.subr.bf16.mxu0 %v9445_v17  ;;  %3419 = vmatprep.subr.bf16.mxu1 %v7220_v31  ;;  %v3214_v31 = vadd.f32 %v3202_v19, %v7274_v2  ;;  %v9472_v17 = vld [vmem:[#allocation25_spill] sm:$0xff]  ;;  %v9477_v19 = vld [vmem:[#allocation34_spill] sm:$0xff]  ;;  %v9483_v53 = vld [vmem:[#allocation40_spill] sm:$0xff] }
 0x4d2   :  { %3379 = vmatpush2.bf16.msra.mxu0 %v9446_v3  ;;  %3420 = vmatpush2.bf16.msra.mxu1 %v9447_v29  ;;  %v9473_v3 = vld [vmem:[#allocation26_spill] sm:$0xff]  ;;  %v9475_v29 = vld [vmem:[#allocation28_spill] sm:$0xff] }
 0x4d3   :  { %3380 = vmatprep.subr.bf16.mxu0 %v9448_v59  ;;  %3421 = vmatprep.subr.bf16.mxu1 %v7246_v61  ;;  %v3222_v61 = vpack.c.bf16 %v3214_v31, %v3214_v31  ;;  %v9476_v59 = vld [vmem:[#allocation33_spill] sm:$0xff]  ;;  %v9479_v31 = vld [vmem:[#allocation36_spill] sm:$0xff] }
 0x4d6   :  { %3381 = vmatpush2.bf16.msra.mxu0 %v7252_v5  ;;  %3422 = vmatpush2.bf16.msra.mxu1 %v7264_v33  ;;  %v9449_v5 = vld [vmem:[#allocation3_spill] sm:$0xff]  ;;  %v9451_v33 = vld [vmem:[#allocation5_spill] sm:$0xff] }
 0x4d7   :  { %3382 = vmatprep.subr.bf16.mxu0 %v7269_v39  ;;  %3423 = vmatprep.subr.bf16.mxu1 %v7280_v30  ;;  %v4922_v39 = vld [vmem:[%s8752_s1 + $0x8] sm:$0xf]  ;;  %v9452_v30 = vld [vmem:[#allocation6_spill] sm:$0xff] }
 0x4da   :  { %3383 = vmatpush2.bf16.msra.mxu0 %v7286_v28  ;;  %3424 = vmatpush2.bf16.msra.mxu1 %v7294_v41  ;;  %v9450_v28 = vld [vmem:[#allocation4_spill] sm:$0xff]  ;;  %v9453_v41 = vld [vmem:[#allocation7_spill] sm:$0xff] }
 0x4db   :  { %4923 = vmatprep.subr.msk.bf16.mxu0 %vm1269_vm0, %v5965_v22  ;;  %4925 = vmatprep.subr.msk.bf16.mxu1 %vm1269_vm0, %v5967_v23 }
 0x4dd   :  { %3385 = vmatmul.mubr.bf16.vlgmr.msra.gmra.mxu0 %v3220_v52  ;;  %3426 = vmatmul.mubr.bf16.vlgmr.msra.gmra.mxu1 %v3222_v61  ;;  %v9480_v52 = vld [vmem:[#allocation37_spill] sm:$0xff]  ;;  %v9481_v61 = vld [vmem:[#allocation38_spill] sm:$0xff] }
 0x4de   :  { %3459 = vmatpush1.bf16.msra.mxu0 %v5985_v42  ;;  %3500 = vmatpush1.bf16.msra.mxu1 %v5988_v43 }
 0x4df   :  { %3476 = vmatprep.mubr.bf16.mxu0 %v9144_v60  ;;  %3517 = vmatprep.mubr.bf16.mxu1 %v9144_v60 }
 0x4e0   :  { %4927 = vmatprep.subr.msk.bf16.mxu0 %vm1269_vm0, %v5990_v44  ;;  %4929 = vmatprep.subr.msk.bf16.mxu1 %vm1269_vm0, %v5992_v45 }
 0x4e5   :  { %4924 = vmatmul.mubr.msk.bf16.vlgmr.msra.gmra.mxu0 %vm1265_vm1, %v4922_v39  ;;  %4926 = vmatmul.mubr.msk.bf16.vlgmr.msra.gmra.mxu1 %vm1265_vm1, %v4922_v39 }
 0x4e6   :  { %3541 = vmatpush1.bf16.msra.mxu0 %v6018_v54  ;;  %3582 = vmatpush1.bf16.msra.mxu1 %v6021_v55 }
 0x4e7   :  { %3558 = vmatprep.mubr.bf16.mxu0 %v9144_v60  ;;  %3599 = vmatprep.mubr.bf16.mxu1 %v9144_v60 }
 0x4e8   :  { %3608 = vmatprep.subr.bf16.mxu0 %v6023_v56  ;;  %3649 = vmatprep.subr.bf16.mxu1 %v6025_v57 }
 0x4ed   :  { %4928 = vmatmul.mubr.msk.bf16.vlgmr.msra.gmra.mxu0 %vm1265_vm1, %v4922_v39  ;;  %4930 = vmatmul.mubr.msk.bf16.vlgmr.msra.gmra.mxu1 %vm1265_vm1, %v4922_v39  ;;  %v9482_v39 = vld [vmem:[#allocation39_spill] sm:$0xff] }
 0x4ee   :  { %3609 = vmatpush1.bf16.msra.mxu0 %v6047_v62  ;;  %3650 = vmatpush1.bf16.msra.mxu1 %v6049_v63 }
 0x4ef   :  { %3610 = vmatprep.subr.bf16.mxu0 %v6051_v0  ;;  %3651 = vmatprep.subr.bf16.mxu1 %v6053_v1 }
 0x4f0   :  { %3640 = vmatprep.mubr.bf16.mxu0 %v9144_v60  ;;  %3681 = vmatprep.mubr.bf16.mxu1 %v9144_v60 }
 0x4f2   :  { %3611 = vmatpush1.bf16.msra.mxu0 %v6071_v6  ;;  %3652 = vmatpush1.bf16.msra.mxu1 %v6073_v7 }
 0x4f3   :  { %3612 = vmatprep.subr.bf16.mxu0 %v6077_v8  ;;  %3653 = vmatprep.subr.bf16.mxu1 %v6079_v9 }
 0x4f6   :  { %3613 = vmatpush1.bf16.msra.mxu0 %v9449_v5  ;;  %3654 = vmatpush1.bf16.msra.mxu1 %v9450_v28 }
 0x4f7   :  { %3614 = vmatprep.subr.bf16.mxu0 %v9451_v33  ;;  %3655 = vmatprep.subr.bf16.mxu1 %v9452_v30 }
 0x4fa   :  { %3615 = vmatpush1.bf16.msra.mxu0 %v9453_v41  ;;  %3656 = vmatpush1.bf16.msra.mxu1 %v9454_v4 }
 0x4fb   :  { %3616 = vmatprep.subr.bf16.mxu0 %v9455_v32  ;;  %3657 = vmatprep.subr.bf16.mxu1 %v9456_v36 }
 0x4fe   :  { %3617 = vmatpush1.bf16.msra.mxu0 %v9457_v20  ;;  %3658 = vmatpush1.bf16.msra.mxu1 %v9458_v49 }
 0x4ff   :  { %3618 = vmatprep.subr.bf16.mxu0 %v9459_v14  ;;  %3659 = vmatprep.subr.bf16.mxu1 %v9460_v40 }
 0x502   :  { %3619 = vmatpush1.bf16.msra.mxu0 %v9461_v15  ;;  %3660 = vmatpush1.bf16.msra.mxu1 %v9462_v47 }
 0x503   :  { %3620 = vmatprep.subr.bf16.mxu0 %v9463_v16  ;;  %3661 = vmatprep.subr.bf16.mxu1 %v9464_v37 }
 0x506   :  { %3621 = vmatpush1.bf16.msra.mxu0 %v9465_v48  ;;  %3662 = vmatpush1.bf16.msra.mxu1 %v9466_v46  ;;  %v9572_v46 = vld [vmem:[#allocation29_spill] sm:$0xff] }
 0x507   :  { %3622 = vmatprep.subr.bf16.mxu0 %v9467_v21  ;;  %3663 = vmatprep.subr.bf16.mxu1 %v9468_v25 }
 0x50a   :  { %3623 = vmatpush1.bf16.msra.mxu0 %v9469_v26  ;;  %3664 = vmatpush1.bf16.msra.mxu1 %v9471_v38 }
 0x50b   :  { %3690 = vmatprep.subr.bf16.mxu0 %v9472_v17  ;;  %3731 = vmatprep.subr.bf16.mxu1 %v9473_v3  ;;  %v9488_v3 = vld [vmem:[#allocation45_spill] sm:$0xff] }
 0x50d   :  { %3641 = vmatmul.mubr.bf16.vlgmr.msra.gmra.mxu0 %v3438_v24  ;;  %3682 = vmatmul.mubr.bf16.vlgmr.msra.gmra.mxu1 %v3438_v24 }
 0x50e   :  { %3691 = vmatpush1.bf16.msra.mxu0 %v9474_v27  ;;  %3732 = vmatpush1.bf16.msra.mxu1 %v9475_v29  ;;  %v9484_v29 = vld [vmem:[#allocation41_spill] sm:$0xff]  ;;  %v9487_v27 = vld [vmem:[#allocation44_spill] sm:$0xff] }
 0x50f   :  { %3692 = vmatprep.subr.bf16.mxu0 %v9476_v59  ;;  %3733 = vmatprep.subr.bf16.mxu1 %v9477_v19  ;;  %v9485_v59 = vld [vmem:[#allocation42_spill] sm:$0xff]  ;;  %v9486_v19 = vld [vmem:[#allocation43_spill] sm:$0xff] }
 0x510   :  { %3722 = vmatprep.mubr.bf16.mxu0 %v9144_v60  ;;  %3763 = vmatprep.mubr.bf16.mxu1 %v9144_v60 }
 0x512   :  { %3693 = vmatpush1.bf16.msra.mxu0 %v9478_v13  ;;  %3734 = vmatpush1.bf16.msra.mxu1 %v9479_v31  ;;  %v9489_v13 = vld [vmem:[#allocation46_spill] sm:$0xff]  ;;  %v9490_v31 = vld [vmem:[#allocation47_spill] sm:$0xff] }
 0x513   :  { %3694 = vmatprep.subr.bf16.mxu0 %v9480_v52  ;;  %3735 = vmatprep.subr.bf16.mxu1 %v9481_v61  ;;  %v9491_v52 = vld [vmem:[#allocation48_spill] sm:$0xff]  ;;  %v9492_v61 = vld [vmem:[#allocation49_spill] sm:$0xff] }
 0x516   :  { %3695 = vmatpush1.bf16.msra.mxu0 %v9482_v39  ;;  %3736 = vmatpush1.bf16.msra.mxu1 %v9483_v53  ;;  %v9493_v39 = vld [vmem:[#allocation50_spill] sm:$0xff]  ;;  %v9494_v53 = vld [vmem:[#allocation51_spill] sm:$0xff] }
 0x517   :  { %3696 = vmatprep.subr.bf16.mxu0 %v9484_v29  ;;  %3737 = vmatprep.subr.bf16.mxu1 %v9485_v59  ;;  %v9495_v29 = vld [vmem:[#allocation52_spill] sm:$0xff]  ;;  %v9496_v59 = vld [vmem:[#allocation53_spill] sm:$0xff] }
 0x51a   :  { %3697 = vmatpush1.bf16.msra.mxu0 %v9486_v19  ;;  %3738 = vmatpush1.bf16.msra.mxu1 %v9487_v27  ;;  %v9497_v19 = vld [vmem:[#allocation54_spill] sm:$0xff]  ;;  %v9498_v27 = vld [vmem:[#allocation55_spill] sm:$0xff] }
 0x51b   :  { %3698 = vmatprep.subr.bf16.mxu0 %v9488_v3  ;;  %3739 = vmatprep.subr.bf16.mxu1 %v9489_v13  ;;  %v9499_v3 = vld [vmem:[#allocation56_spill] sm:$0xff]  ;;  %v9500_v13 = vld [vmem:[#allocation57_spill] sm:$0xff] }
 0x51e   :  { %3699 = vmatpush1.bf16.msra.mxu0 %v9490_v31  ;;  %3740 = vmatpush1.bf16.msra.mxu1 %v9491_v52  ;;  %v9501_v31 = vld [vmem:[#allocation58_spill] sm:$0xff]  ;;  %v9502_v52 = vld [vmem:[#allocation59_spill] sm:$0xff] }
 0x51f   :  { %3700 = vmatprep.subr.bf16.mxu0 %v9492_v61  ;;  %3741 = vmatprep.subr.bf16.mxu1 %v9493_v39  ;;  %v9503_v61 = vld [vmem:[#allocation60_spill] sm:$0xff] }
 0x522   :  { %3701 = vmatpush1.bf16.msra.mxu0 %v9494_v53  ;;  %3742 = vmatpush1.bf16.msra.mxu1 %v9495_v29  ;;  %v7662_v29 = vld [vmem:[%s8753_s13 + $0x4] ss:$8 sps:$4 sm:$0xff]  }
 0x523   :  { %3702 = vmatprep.subr.bf16.mxu0 %v9496_v59  ;;  %3743 = vmatprep.subr.bf16.mxu1 %v9497_v19  ;;  %9504 = vst [vmem:[#allocation61_spill] sm:$0xff] %v7662_v29 }
 0x526   :  { %3703 = vmatpush1.bf16.msra.mxu0 %v9498_v27  ;;  %3744 = vmatpush1.bf16.msra.mxu1 %v9499_v3  ;;  %v7668_v27 = vld [vmem:[%s8754_s12 + $0x74] ss:$8 sps:$4 sm:$0xff]  }
 0x527   :  { %3704 = vmatprep.subr.bf16.mxu0 %v9500_v13  ;;  %3745 = vmatprep.subr.bf16.mxu1 %v9501_v31  ;;  %9505 = vst [vmem:[#allocation62_spill] sm:$0xff] %v7668_v27 }
 0x52a   :  { %3705 = vmatpush1.bf16.msra.mxu0 %v9502_v52  ;;  %3746 = vmatpush1.bf16.msra.mxu1 %v9503_v61  ;;  %v7674_v61 = vld [vmem:[%s8753_s13] ss:$8 sps:$4 sm:$0xff]   ;;  %v7949_v52 = vld [vmem:[%s8754_s12 + $0xb4] ss:$8 sps:$4 sm:$0xff]  }
 0x52b   :  { %3807 = vmatprep.subr.bf16.mxu0 %v7662_v29  ;;  %3834 = vmatprep.subr.bf16.mxu1 %v7668_v27  ;;  %9506 = vst [vmem:[#allocation63_spill] sm:$0xff] %v7674_v61  ;;  %v7681_v29 = vld [vmem:[%s8754_s12 + $0x174] ss:$8 sps:$4 sm:$0xff]   ;;  %v4931_v27 = vld [vmem:[%s8756_s2 + $0x8] sm:$0xf]  ;;  %9551 = vst [vmem:[#allocation108_spill] sm:$0xff] %v7949_v52 }
 0x52c   :  { %9507 = vst [vmem:[#allocation64_spill] sm:$0xff] %v7681_v29 }
 0x52d   :  { %3723 = vmatmul.mubr.bf16.vlgmr.msra.gmra.mxu0 %v3438_v24  ;;  %3764 = vmatmul.mubr.bf16.vlgmr.msra.gmra.mxu1 %v3438_v24  ;;  %v7687_v24 = vld [vmem:[%s8754_s12 + $0x70] ss:$8 sps:$4 sm:$0xff]  }
 0x52e   :  { %3808 = vmatpush1.bf16.msra.mxu0 %v7674_v61  ;;  %3825 = vmatprep.mubr.bf16.mxu0 %v9144_v60  ;;  %9508 = vst [vmem:[#allocation65_spill] sm:$0xff] %v7687_v24  ;;  %v7693_v61 = vld [vmem:[%s8754_s12 + $0x64] ss:$8 sps:$4 sm:$0xff]  }
 0x52f   :  { %3875 = vmatprep.subr.bf16.mxu0 %v7681_v29  ;;  %3835 = vmatpush1.bf16.msra.mxu1 %v7687_v24  ;;  %9509 = vst [vmem:[#allocation66_spill] sm:$0xff] %v7693_v61  ;;  %v7702_v29 = vld [vmem:[%s8754_s12 + $0x60] ss:$8 sps:$4 sm:$0xff]   ;;  %v7709_v24 = vld [vmem:[%s8754_s12 + $0x54] ss:$8 sps:$4 sm:$0xff]  }
 0x530   :  { %3836 = vmatprep.subr.bf16.mxu1 %v7693_v61  ;;  %9510 = vst [vmem:[#allocation67_spill] sm:$0xff] %v7702_v29  ;;  %9511 = vst [vmem:[#allocation68_spill] sm:$0xff] %v7709_v24  ;;  %v7715_v61 = vld [vmem:[%s8754_s12 + $0x170] ss:$8 sps:$4 sm:$0xff]  }
 0x531   :  { %9512 = vst [vmem:[#allocation69_spill] sm:$0xff] %v7715_v61 }
 0x533   :  { %3837 = vmatpush1.bf16.msra.mxu1 %v7702_v29  ;;  %v7721_v29 = vld [vmem:[%s8754_s12 + $0x164] ss:$8 sps:$4 sm:$0xff]  }
 0x534   :  { %3838 = vmatprep.subr.bf16.mxu1 %v7709_v24  ;;  %9513 = vst [vmem:[#allocation70_spill] sm:$0xff] %v7721_v29  ;;  %v7733_v24 = vld [vmem:[%s8754_s12 + $0x44] ss:$8 sps:$4 sm:$0xff]  }
 0x535   :  { %4932 = vmatmul.mubr.msk.bf16.vlgmr.msra.gmra.mxu0 %vm2010_vm2, %v4931_v27  ;;  %v7727_v27 = vld [vmem:[%s8754_s12 + $0x50] ss:$8 sps:$4 sm:$0xff]   ;;  %9515 = vst [vmem:[#allocation72_spill] sm:$0xff] %v7733_v24 }
 0x536   :  { %3876 = vmatpush1.bf16.msra.mxu0 %v7715_v61  ;;  %9514 = vst [vmem:[#allocation71_spill] sm:$0xff] %v7727_v27  ;;  %v7739_v61 = vld [vmem:[%s8754_s12 + $0x160] ss:$8 sps:$4 sm:$0xff]  }
 0x537   :  { %3877 = vmatprep.subr.bf16.mxu0 %v7721_v29  ;;  %3839 = vmatpush1.bf16.msra.mxu1 %v7727_v27  ;;  %9516 = vst [vmem:[#allocation73_spill] sm:$0xff] %v7739_v61  ;;  %v7745_v29 = vld [vmem:[%s8754_s12 + $0x154] ss:$8 sps:$4 sm:$0xff]   ;;  %v7751_v27 = vld [vmem:[%s8754_s12 + $0x40] ss:$8 sps:$4 sm:$0xff]  }
 0x538   :  { %3840 = vmatprep.subr.bf16.mxu1 %v7733_v24  ;;  %9517 = vst [vmem:[#allocation74_spill] sm:$0xff] %v7745_v29  ;;  %9518 = vst [vmem:[#allocation75_spill] sm:$0xff] %v7751_v27  ;;  %v7757_v24 = vld [vmem:[%s8754_s12 + $0x34] ss:$8 sps:$4 sm:$0xff]  }
 0x539   :  { %9519 = vst [vmem:[#allocation76_spill] sm:$0xff] %v7757_v24 }
 0x53a   :  { %3878 = vmatpush1.bf16.msra.mxu0 %v7739_v61  ;;  %v7763_v61 = vld [vmem:[%s8754_s12 + $0x150] ss:$8 sps:$4 sm:$0xff]  }
 0x53b   :  { %3879 = vmatprep.subr.bf16.mxu0 %v7745_v29  ;;  %3841 = vmatpush1.bf16.msra.mxu1 %v7751_v27  ;;  %9520 = vst [vmem:[#allocation77_spill] sm:$0xff] %v7763_v61  ;;  %v7769_v29 = vld [vmem:[%s8754_s12 + $0x144] ss:$8 sps:$4 sm:$0xff]   ;;  %v7775_v27 = vld [vmem:[%s8754_s12 + $0x30] ss:$8 sps:$4 sm:$0xff]  }
 0x53c   :  { %3842 = vmatprep.subr.bf16.mxu1 %v7757_v24  ;;  %9521 = vst [vmem:[#allocation78_spill] sm:$0xff] %v7769_v29  ;;  %9522 = vst [vmem:[#allocation79_spill] sm:$0xff] %v7775_v27  ;;  %v7781_v24 = vld [vmem:[%s8754_s12 + $0x24] ss:$8 sps:$4 sm:$0xff]  }
 0x53d   :  { %9523 = vst [vmem:[#allocation80_spill] sm:$0xff] %v7781_v24 }
 0x53e   :  { %3880 = vmatpush1.bf16.msra.mxu0 %v7763_v61  ;;  %v7787_v61 = vld [vmem:[%s8754_s12 + $0x140] ss:$8 sps:$4 sm:$0xff]  }
 0x53f   :  { %3881 = vmatprep.subr.bf16.mxu0 %v7769_v29  ;;  %3843 = vmatpush1.bf16.msra.mxu1 %v7775_v27  ;;  %9524 = vst [vmem:[#allocation81_spill] sm:$0xff] %v7787_v61  ;;  %v7793_v29 = vld [vmem:[%s8754_s12 + $0x134] ss:$8 sps:$4 sm:$0xff]   ;;  %v7799_v27 = vld [vmem:[%s8754_s12 + $0x20] ss:$8 sps:$4 sm:$0xff]  }
 0x540   :  { %3844 = vmatprep.subr.bf16.mxu1 %v7781_v24  ;;  %9525 = vst [vmem:[#allocation82_spill] sm:$0xff] %v7793_v29  ;;  %9526 = vst [vmem:[#allocation83_spill] sm:$0xff] %v7799_v27  ;;  %v7805_v24 = vld [vmem:[%s8754_s12 + $0x14] ss:$8 sps:$4 sm:$0xff]  }
 0x541   :  { %9527 = vst [vmem:[#allocation84_spill] sm:$0xff] %v7805_v24 }
 0x542   :  { %3882 = vmatpush1.bf16.msra.mxu0 %v7787_v61  ;;  %v7811_v61 = vld [vmem:[%s8754_s12 + $0x130] ss:$8 sps:$4 sm:$0xff]  }
 0x543   :  { %3883 = vmatprep.subr.bf16.mxu0 %v7793_v29  ;;  %3845 = vmatpush1.bf16.msra.mxu1 %v7799_v27  ;;  %9528 = vst [vmem:[#allocation85_spill] sm:$0xff] %v7811_v61  ;;  %v7817_v29 = vld [vmem:[%s8754_s12 + $0x124] ss:$8 sps:$4 sm:$0xff]   ;;  %v7823_v27 = vld [vmem:[%s8754_s12 + $0x10] ss:$8 sps:$4 sm:$0xff]  }
 0x544   :  { %3846 = vmatprep.subr.bf16.mxu1 %v7805_v24  ;;  %9529 = vst [vmem:[#allocation86_spill] sm:$0xff] %v7817_v29  ;;  %9530 = vst [vmem:[#allocation87_spill] sm:$0xff] %v7823_v27  ;;  %v7829_v24 = vld [vmem:[%s8754_s12 + $0x4] ss:$8 sps:$4 sm:$0xff]  }
 0x545   :  { %9531 = vst [vmem:[#allocation88_spill] sm:$0xff] %v7829_v24 }
 0x546   :  { %3884 = vmatpush1.bf16.msra.mxu0 %v7811_v61  ;;  %v7835_v61 = vld [vmem:[%s8754_s12 + $0x120] ss:$8 sps:$4 sm:$0xff]  }
 0x547   :  { %3885 = vmatprep.subr.bf16.mxu0 %v7817_v29  ;;  %3847 = vmatpush1.bf16.msra.mxu1 %v7823_v27  ;;  %9532 = vst [vmem:[#allocation89_spill] sm:$0xff] %v7835_v61  ;;  %v7841_v29 = vld [vmem:[%s8754_s12 + $0x114] ss:$8 sps:$4 sm:$0xff]   ;;  %v7847_v27 = vld [vmem:[%s8754_s12] ss:$8 sps:$4 sm:$0xff]  }
 0x548   :  { %3848 = vmatprep.subr.bf16.mxu1 %v7829_v24  ;;  %9533 = vst [vmem:[#allocation90_spill] sm:$0xff] %v7841_v29  ;;  %9534 = vst [vmem:[#allocation91_spill] sm:$0xff] %v7847_v27  ;;  %v7853_v24 = vld [vmem:[%s8754_s12 + $0xf4] ss:$8 sps:$4 sm:$0xff]  }
 0x549   :  { %9535 = vst [vmem:[#allocation92_spill] sm:$0xff] %v7853_v24 }
 0x54a   :  { %3886 = vmatpush1.bf16.msra.mxu0 %v7835_v61  ;;  %v7859_v61 = vld [vmem:[%s8754_s12 + $0x110] ss:$8 sps:$4 sm:$0xff]  }
 0x54b   :  { %3887 = vmatprep.subr.bf16.mxu0 %v7841_v29  ;;  %3849 = vmatpush1.bf16.msra.mxu1 %v7847_v27  ;;  %9536 = vst [vmem:[#allocation93_spill] sm:$0xff] %v7859_v61  ;;  %v7865_v29 = vld [vmem:[%s8754_s12 + $0x104] ss:$8 sps:$4 sm:$0xff]   ;;  %v7871_v27 = vld [vmem:[%s8754_s12 + $0xf0] ss:$8 sps:$4 sm:$0xff]  }
 0x54c   :  { %3850 = vmatprep.subr.bf16.mxu1 %v7853_v24  ;;  %9537 = vst [vmem:[#allocation94_spill] sm:$0xff] %v7865_v29  ;;  %9538 = vst [vmem:[#allocation95_spill] sm:$0xff] %v7871_v27  ;;  %v7877_v24 = vld [vmem:[%s8754_s12 + $0xe4] ss:$8 sps:$4 sm:$0xff]  }
 0x54d   :  { %9539 = vst [vmem:[#allocation96_spill] sm:$0xff] %v7877_v24 }
 0x54e   :  { %3888 = vmatpush1.bf16.msra.mxu0 %v7859_v61  ;;  %v7883_v61 = vld [vmem:[%s8754_s12 + $0x100] ss:$8 sps:$4 sm:$0xff]  }
 0x54f   :  { %3889 = vmatprep.subr.bf16.mxu0 %v7865_v29  ;;  %3851 = vmatpush2.bf16.msra.mxu1 %v7871_v27  ;;  %9540 = vst [vmem:[#allocation97_spill] sm:$0xff] %v7883_v61  ;;  %v7889_v29 = vld [vmem:[%s8754_s12 + $0x1f4] ss:$8 sps:$4 sm:$0xff]   ;;  %v7895_v27 = vld [vmem:[%s8754_s12 + $0xe0] ss:$8 sps:$4 sm:$0xff]  }
 0x550   :  { %3852 = vmatprep.subr.bf16.mxu1 %v7877_v24  ;;  %9541 = vst [vmem:[#allocation98_spill] sm:$0xff] %v7889_v29  ;;  %9542 = vst [vmem:[#allocation99_spill] sm:$0xff] %v7895_v27  ;;  %v7901_v24 = vld [vmem:[%s8754_s12 + $0xd4] ss:$8 sps:$4 sm:$0xff]  }
 0x551   :  { %9543 = vst [vmem:[#allocation100_spill] sm:$0xff] %v7901_v24 }
 0x552   :  { %3890 = vmatpush1.bf16.msra.mxu0 %v7883_v61  ;;  %v7907_v61 = vld [vmem:[%s8754_s12 + $0x1f0] ss:$8 sps:$4 sm:$0xff]  }
 0x553   :  { %3891 = vmatprep.subr.bf16.mxu0 %v7889_v29  ;;  %3853 = vmatpush2.bf16.msra.mxu1 %v7895_v27  ;;  %9544 = vst [vmem:[#allocation101_spill] sm:$0xff] %v7907_v61  ;;  %v7913_v29 = vld [vmem:[%s8754_s12 + $0x1e4] ss:$8 sps:$4 sm:$0xff]   ;;  %v7919_v27 = vld [vmem:[%s8754_s12 + $0xd0] ss:$8 sps:$4 sm:$0xff]  }
 0x554   :  { %3854 = vmatprep.subr.bf16.mxu1 %v7901_v24  ;;  %9545 = vst [vmem:[#allocation102_spill] sm:$0xff] %v7913_v29  ;;  %9546 = vst [vmem:[#allocation103_spill] sm:$0xff] %v7919_v27  ;;  %v7925_v24 = vld [vmem:[%s8754_s12 + $0xc4] ss:$8 sps:$4 sm:$0xff]  }
 0x555   :  { %9547 = vst [vmem:[#allocation104_spill] sm:$0xff] %v7925_v24 }
 0x556   :  { %3892 = vmatpush2.bf16.msra.mxu0 %v7907_v61  ;;  %v7931_v61 = vld [vmem:[%s8754_s12 + $0x1e0] ss:$8 sps:$4 sm:$0xff]  }
 0x557   :  { %3893 = vmatprep.subr.bf16.mxu0 %v7913_v29  ;;  %3855 = vmatpush2.bf16.msra.mxu1 %v7919_v27  ;;  %9548 = vst [vmem:[#allocation105_spill] sm:$0xff] %v7931_v61  ;;  %v7937_v29 = vld [vmem:[%s8754_s12 + $0x1d4] ss:$8 sps:$4 sm:$0xff]   ;;  %v7943_v27 = vld [vmem:[%s8754_s12 + $0xc0] ss:$8 sps:$4 sm:$0xff]  }
 0x558   :  { %3856 = vmatprep.subr.bf16.mxu1 %v7925_v24  ;;  %9549 = vst [vmem:[#allocation106_spill] sm:$0xff] %v7937_v29  ;;  %9550 = vst [vmem:[#allocation107_spill] sm:$0xff] %v7943_v27 }
 0x55a   :  { %3894 = vmatpush2.bf16.msra.mxu0 %v7931_v61 }
 0x55b   :  { %3895 = vmatprep.subr.bf16.mxu0 %v7937_v29  ;;  %3857 = vmatpush2.bf16.msra.mxu1 %v7943_v27  ;;  %v7955_v29 = vld [vmem:[%s8754_s12 + $0x1d0] ss:$8 sps:$4 sm:$0xff]   ;;  %v7961_v27 = vld [vmem:[%s8754_s12 + $0x1c4] ss:$8 sps:$4 sm:$0xff]  }
 0x55c   :  { %3858 = vmatprep.subr.bf16.mxu1 %v7949_v52  ;;  %9552 = vst [vmem:[#allocation109_spill] sm:$0xff] %v7955_v29  ;;  %9553 = vst [vmem:[#allocation110_spill] sm:$0xff] %v7961_v27  ;;  %v7967_v52 = vld [vmem:[%s8754_s12 + $0xb0] ss:$8 sps:$4 sm:$0xff]  }
 0x55d   :  { %v3304_v24 = vpop.f32.mrf.mxu0  ;;  %v3345_v61 = vpop.f32.mrf.mxu1  ;;  %9554 = vst [vmem:[#allocation111_spill] sm:$0xff] %v7967_v52 }
 0x55e   :  { %3896 = vmatpush2.bf16.msra.mxu0 %v7955_v29  ;;  %v7973_v29 = vld [vmem:[%s8754_s12 + $0xa4] ss:$8 sps:$4 sm:$0xff]  }
 0x55f   :  { %v3306_v31 = vpop.f32.mrf.mxu0  ;;  %3897 = vmatprep.subr.bf16.mxu0 %v7961_v27  ;;  %v3347_v13 = vpop.f32.mrf.mxu1  ;;  %3859 = vmatpush2.bf16.msra.mxu1 %v7967_v52  ;;  %9555 = vst [vmem:[#allocation112_spill] sm:$0xff] %v7973_v29  ;;  %v7979_v27 = vld [vmem:[%s8754_s12 + $0x1c0] ss:$8 sps:$4 sm:$0xff]  }
 0x560   :  { %3860 = vmatprep.subr.bf16.mxu1 %v7973_v29  ;;  %9556 = vst [vmem:[#allocation113_spill] sm:$0xff] %v7979_v27 }
 0x561   :  { %v3308_v3 = vpop.f32.mrf.mxu0  ;;  %v3349_v19 = vpop.f32.mrf.mxu1 }
 0x562   :  { %3898 = vmatpush2.bf16.msra.mxu0 %v7979_v27  ;;  %v7985_v3 = vld [vmem:[%s8754_s12 + $0x1b4] ss:$8 sps:$4 sm:$0xff]   ;;  %v7991_v19 = vld [vmem:[%s8754_s12 + $0xa0] ss:$8 sps:$4 sm:$0xff]  }
 0x563   :  { %v3309_v59 = vpop.f32.mrf.mxu0  ;;  %9557 = vst [vmem:[#allocation114_spill] sm:$0xff] %v7985_v3  ;;  %3899 = vmatprep.subr.bf16.mxu0 %v7985_v3  ;;  %v3350_v52 = vpop.f32.mrf.mxu1  ;;  %9558 = vst [vmem:[#allocation115_spill] sm:$0xff] %v7991_v19  ;;  %3861 = vmatpush2.bf16.msra.mxu1 %v7991_v19  ;;  %v7997_v27 = vld [vmem:[%s8754_s12 + $0x94] ss:$8 sps:$4 sm:$0xff]   ;;  %v8015_v19 = vld [vmem:[%s8754_s12 + $0x90] ss:$8 sps:$4 sm:$0xff]   ;;  %v3307_v3 = vadd.f32 %v3306_v31, %v7530_v12 }
 0x564   :  { %9559 = vst [vmem:[#allocation116_spill] sm:$0xff] %v7997_v27  ;;  %3862 = vmatprep.subr.bf16.mxu1 %v7997_v27  ;;  %v8003_v59 = vld [vmem:[%s8754_s12 + $0x1b0] ss:$8 sps:$4 sm:$0xff]   ;;  %v8009_v52 = vld [vmem:[%s8754_s12 + $0x1a4] ss:$8 sps:$4 sm:$0xff]   ;;  %9562 = vst [vmem:[#allocation119_spill] sm:$0xff] %v8015_v19 }
 0x565   :  { %9560 = vst [vmem:[#allocation117_spill] sm:$0xff] %v8003_v59  ;;  %9561 = vst [vmem:[#allocation118_spill] sm:$0xff] %v8009_v52  ;;  %v8021_v27 = vld [vmem:[%s8754_s12 + $0x84] ss:$8 sps:$4 sm:$0xff]   ;;  %v3348_v53 = vadd.f32 %v3347_v13, %v3307_v3 }
 0x566   :  { %3900 = vmatpush2.bf16.msra.mxu0 %v8003_v59  ;;  %9563 = vst [vmem:[#allocation120_spill] sm:$0xff] %v8021_v27  ;;  %v8027_v59 = vld [vmem:[%s8754_s12 + $0x1a0] ss:$8 sps:$4 sm:$0xff]  }
 0x567   :  { %3901 = vmatprep.subr.bf16.mxu0 %v8009_v52  ;;  %3863 = vmatpush2.bf16.msra.mxu1 %v8015_v19  ;;  %9564 = vst [vmem:[#allocation121_spill] sm:$0xff] %v8027_v59  ;;  %v8033_v52 = vld [vmem:[%s8754_s12 + $0x194] ss:$8 sps:$4 sm:$0xff]   ;;  %v8039_v19 = vld [vmem:[%s8754_s12 + $0x80] ss:$8 sps:$4 sm:$0xff]  }
 0x568   :  { %3864 = vmatprep.subr.bf16.mxu1 %v8021_v27  ;;  %9565 = vst [vmem:[#allocation122_spill] sm:$0xff] %v8033_v52  ;;  %9566 = vst [vmem:[#allocation123_spill] sm:$0xff] %v8039_v19  ;;  %v8045_v27 = vld [vmem:[%s8754_s12 + $0x274] ss:$8 sps:$4 sm:$0xff]  }
 0x569   :  { %9567 = vst [vmem:[#allocation124_spill] sm:$0xff] %v8045_v27 }
 0x56a   :  { %3902 = vmatpush2.bf16.msra.mxu0 %v8027_v59  ;;  %v8051_v59 = vld [vmem:[%s8754_s12 + $0x190] ss:$8 sps:$4 sm:$0xff]  }
 0x56b   :  { %3903 = vmatprep.subr.bf16.mxu0 %v8033_v52  ;;  %3865 = vmatpush2.bf16.msra.mxu1 %v8039_v19  ;;  %9568 = vst [vmem:[#allocation125_spill] sm:$0xff] %v8051_v59  ;;  %v8057_v52 = vld [vmem:[%s8754_s12 + $0x184] ss:$8 sps:$4 sm:$0xff]   ;;  %v8063_v19 = vld [vmem:[%s8754_s12 + $0x180] ss:$8 sps:$4 sm:$0xff]  }
 0x56c   :  { %3916 = vmatprep.subr.bf16.mxu1 %v8045_v27  ;;  %9569 = vst [vmem:[#allocation126_spill] sm:$0xff] %v8057_v52  ;;  %9570 = vst [vmem:[#allocation127_spill] sm:$0xff] %v8063_v19  ;;  %v8069_v27 = vld [vmem:[%s8754_s12 + $0x374] ss:$8 sps:$4 sm:$0xff]  }
 0x56d   :  { %9571 = vst [vmem:[#allocation128_spill] sm:$0xff] %v8069_v27 }
 0x56e   :  { %3904 = vmatpush2.bf16.msra.mxu0 %v8051_v59  ;;  %v3305_v59 = vadd.f32 %v3304_v24, %v7527_v35  ;;  %v9573_v35 = vld [vmem:[#allocation31_spill] sm:$0xff] }
 0x56f   :  { %3905 = vmatprep.subr.bf16.mxu0 %v8057_v52 }
 0x570   :  { %v3346_v29 = vadd.f32 %v3345_v61, %v3305_v59 }
 0x572   :  { %3906 = vmatpush2.bf16.msra.mxu0 %v8063_v19 }
 0x573   :  { %3957 = vmatprep.subr.bf16.mxu0 %v8069_v27 }
 0x59d   :  { %v3386_v52 = vpop.f32.mrf.mxu0  ;;  %v3427_v17 = vpop.f32.mrf.mxu1 }
 0x59e   :  { %v3387_v39 = vadd.f32 %v3386_v52, %v3346_v29 }
 0x59f   :  { %v3388_v38 = vpop.f32.mrf.mxu0  ;;  %v3429_v19 = vpop.f32.mrf.mxu1 }
 0x5a0   :  { %v3428_v26 = vadd.f32 %v3427_v17, %v3387_v39  ;;  %v3389_v25 = vadd.f32 %v3388_v38, %v3348_v53 }
 0x5a1   :  { %v3390_v21 = vpop.f32.mrf.mxu0  ;;  %v3431_v16 = vpop.f32.mrf.mxu1 }
 0x5a2   :  { %v3434_v48 = vadd.f32 %v3428_v26, %v9572_v46  ;;  %v3430_v37 = vadd.f32 %v3429_v19, %v3389_v25 }
 0x5a3   :  { %v3391_v47 = vpop.f32.mrf.mxu0  ;;  %v3432_v31 = vpop.f32.mrf.mxu1 }
 0x5a4   :  { %3436 = vst [vmem:[%s8759_s15 + $0x10] sm:$0xff] %v3434_v48  ;;  %v3435_v12 = vadd.f32 %v3430_v37, %v9573_v35 }
 0x5a5   :  { %v3478_v13 = vpop.f32.mrf.mxu0  ;;  %v3519_v38 = vpop.f32.mrf.mxu1 }
 0x5a6   :  { %3437 = vst [vmem:[%s8759_s15 + $0x18] sm:$0xff] %v3435_v12 }
 0x5a7   :  { %v3480_v17 = vpop.f32.mrf.mxu0  ;;  %v3521_v21 = vpop.f32.mrf.mxu1 }
 0x5a9   :  { %v3482_v29 = vpop.f32.mrf.mxu0  ;;  %v3523_v26 = vpop.f32.mrf.mxu1 }
 0x5ab   :  { %v3483_v25 = vpop.f32.mrf.mxu0  ;;  %v3524_v16 = vpop.f32.mrf.mxu1 }
 0x5ad   :  { %v8082_v47 = vpop.f32.mrf.mxu0  ;;  %v8084_v61 = vpop.f32.mrf.mxu1 }
 0x5af   :  { %v8086_v48 = vpop.f32.mrf.mxu0  ;;  %v8088_v37 = vpop.f32.mrf.mxu1 }
 0x5b1   :  { %v3564_v39 = vpop.f32.mrf.mxu0  ;;  %v3605_v53 = vpop.f32.mrf.mxu1 }
 0x5b3   :  { %v3565_v24 = vpop.f32.mrf.mxu0  ;;  %v3606_v3 = vpop.f32.mrf.mxu1 }
 0x5cd   :  { %v3642_v19 = vpop.f32.mrf.mxu0  ;;  %v3683_v52 = vpop.f32.mrf.mxu1 }
 0x5ce   :  { %v3643_v59 = vadd.f32 %v3642_v19, %v3478_v13  ;;  %v3684_v12 = vadd.f32 %v3683_v52, %v3519_v38  ;;  %v8139_v52 = vld [vmem:[%s8754_s12 + $0x354] ss:$8 sps:$4 sm:$0xff]  }
 0x5cf   :  { %v3644_v31 = vpop.f32.mrf.mxu0  ;;  %v3685_v26 = vpop.f32.mrf.mxu1 }
 0x5d0   :  { %v3645_v29 = vadd.f32 %v3644_v31, %v3480_v17  ;;  %v3772_v25 = vadd.f32 %v3643_v59, %v6875_v18  ;;  %v3686_v16 = vadd.f32 %v3685_v26, %v3521_v21  ;;  %v3774_v46 = vadd.f32 %v3684_v12, %v6871_v51  ;;  %v8121_v17 = vld [vmem:[%s8754_s12 + $0x260] ss:$8 sps:$4 sm:$0xff]   ;;  %v8133_v59 = vld [vmem:[%s8754_s12 + $0x254] ss:$8 sps:$4 sm:$0xff]   ;;  %v8145_v12 = vld [vmem:[%s8754_s12 + $0x250] ss:$8 sps:$4 sm:$0xff]  }
 0x5d1   :  { %v3646_v35 = vpop.f32.mrf.mxu0  ;;  %v3687_v15 = vpop.f32.mrf.mxu1  ;;  %v8127_v21 = vld [vmem:[%s8754_s12 + $0x360] ss:$8 sps:$4 sm:$0xff]   ;;  %v8151_v31 = vld [vmem:[%s8754_s12 + $0x350] ss:$8 sps:$4 sm:$0xff]   ;;  %v8163_v26 = vld [vmem:[%s8754_s12 + $0x344] ss:$8 sps:$4 sm:$0xff]  }
 0x5d2   :  { %v3773_v27 = vadd.f32 %v3645_v29, %v6886_v11  ;;  %v3775_v39 = vadd.f32 %v3686_v16, %v6880_v50  ;;  %v3780_v13 = vpack.c.bf16 %v3772_v25, %v3772_v25  ;;  %v3782_v38 = vpack.c.bf16 %v3774_v46, %v3774_v46  ;;  %v8097_v35 = vld [vmem:[%s8754_s12 + $0x270] ss:$8 sps:$4 sm:$0xff]   ;;  %v8109_v46 = vld [vmem:[%s8754_s12 + $0x264] ss:$8 sps:$4 sm:$0xff]   ;;  %9575 = vst [vmem:[#allocation129_spill] sm:$0xff] %v8163_v26 }
 0x5d3   :  { %v3647_v53 = vpop.f32.mrf.mxu0  ;;  %v3688_v3 = vpop.f32.mrf.mxu1  ;;  %v8103_v15 = vld [vmem:[%s8754_s12 + $0x370] ss:$8 sps:$4 sm:$0xff]   ;;  %v8157_v29 = vld [vmem:[%s8754_s12 + $0x244] ss:$8 sps:$4 sm:$0xff]   ;;  %v8169_v25 = vld [vmem:[%s8754_s12 + $0x240] ss:$8 sps:$4 sm:$0xff]  }
 0x5d4   :  { %v3781_v24 = vpack.c.bf16 %v3773_v27, %v3773_v27  ;;  %v3783_v19 = vpack.c.bf16 %v3775_v39, %v3775_v39  ;;  %v8115_v27 = vld [vmem:[%s8754_s12 + $0x364] ss:$8 sps:$4 sm:$0xff]   ;;  %9574 = vst [vmem:[#allocation2_spill] sm:$0xff] %v8157_v29  ;;  %9576 = vst [vmem:[#allocation130_spill] sm:$0xff] %v8169_v25  ;;  %v8175_v16 = vld [vmem:[%s8754_s12 + $0x340] ss:$8 sps:$4 sm:$0xff]  }
 0x5d5   :  { %9577 = vst [vmem:[#allocation131_spill] sm:$0xff] %v8175_v16  ;;  %v8181_v39 = vld [vmem:[%s8754_s12 + $0x234] ss:$8 sps:$4 sm:$0xff]   ;;  %v8199_v3 = vld [vmem:[%s8754_s12 + $0x330] ss:$8 sps:$4 sm:$0xff]  }
 0x5d6   :  { %3866 = vmatprep.mubr.bf16.mxu1 %v3781_v24  ;;  %3907 = vmatprep.mubr.bf16.mxu0 %v3783_v19  ;;  %9578 = vst [vmem:[#allocation132_spill] sm:$0xff] %v8181_v39  ;;  %v8187_v53 = vld [vmem:[%s8754_s12 + $0x334] ss:$8 sps:$4 sm:$0xff]   ;;  %v8193_v24 = vld [vmem:[%s8754_s12 + $0x230] ss:$8 sps:$4 sm:$0xff]   ;;  %9581 = vst [vmem:[#allocation135_spill] sm:$0xff] %v8199_v3 }
 0x5d7   :  { %3867 = vmatmul.mubr.bf16.vlgmr.msra.gmra.mxu1 %v3780_v13  ;;  %3908 = vmatmul.mubr.bf16.vlgmr.msra.gmra.mxu0 %v3782_v38  ;;  %9579 = vst [vmem:[#allocation133_spill] sm:$0xff] %v8187_v53  ;;  %9580 = vst [vmem:[#allocation134_spill] sm:$0xff] %v8193_v24  ;;  %v8205_v13 = vld [vmem:[%s8754_s12 + $0x224] ss:$8 sps:$4 sm:$0xff]   ;;  %v8217_v38 = vld [vmem:[%s8754_s12 + $0x220] ss:$8 sps:$4 sm:$0xff]  }
 0x5d8   :  { %3917 = vmatpush1.bf16.msra.mxu1 %v8097_v35  ;;  %3958 = vmatpush1.bf16.msra.mxu0 %v8103_v15  ;;  %9582 = vst [vmem:[#allocation136_spill] sm:$0xff] %v8205_v13  ;;  %v8211_v19 = vld [vmem:[%s8754_s12 + $0x324] ss:$8 sps:$4 sm:$0xff]   ;;  %9584 = vst [vmem:[#allocation138_spill] sm:$0xff] %v8217_v38 }
 0x5d9   :  { %3918 = vmatprep.subr.bf16.mxu1 %v8109_v46  ;;  %3959 = vmatprep.subr.bf16.mxu0 %v8115_v27  ;;  %9583 = vst [vmem:[#allocation137_spill] sm:$0xff] %v8211_v19 }
 0x5dc   :  { %3919 = vmatpush1.bf16.msra.mxu1 %v8121_v17  ;;  %3960 = vmatpush1.bf16.msra.mxu0 %v8127_v21 }
 0x5dd   :  { %3920 = vmatprep.subr.bf16.mxu1 %v8133_v59  ;;  %3961 = vmatprep.subr.bf16.mxu0 %v8139_v52 }
 0x5e0   :  { %3921 = vmatpush1.bf16.msra.mxu1 %v8145_v12  ;;  %3962 = vmatpush1.bf16.msra.mxu0 %v8151_v31 }
 0x5e1   :  { %3922 = vmatprep.subr.bf16.mxu1 %v8157_v29  ;;  %3963 = vmatprep.subr.bf16.mxu0 %v8163_v26  ;;  %v8273_v29 = vld [vmem:[%s8754_s12 + $0x200] ss:$8 sps:$4 sm:$0xff]  }
 0x5e4   :  { %3923 = vmatpush1.bf16.msra.mxu1 %v8169_v25  ;;  %3964 = vmatpush1.bf16.msra.mxu0 %v8175_v16  ;;  %v8246_v16 = vld [vmem:[%s8754_s12 + $0x210] ss:$8 sps:$4 sm:$0xff]  }
 0x5e5   :  { %3924 = vmatprep.subr.bf16.mxu1 %v8181_v39  ;;  %3965 = vmatprep.subr.bf16.mxu0 %v8187_v53  ;;  %9588 = vst [vmem:[#allocation142_spill] sm:$0xff] %v8246_v16  ;;  %v8253_v25 = vld [vmem:[%s8754_s12 + $0x310] ss:$8 sps:$4 sm:$0xff]  }
 0x5e6   :  { %9589 = vst [vmem:[#allocation143_spill] sm:$0xff] %v8253_v25 }
 0x5e8   :  { %3925 = vmatpush1.bf16.msra.mxu1 %v8193_v24  ;;  %3966 = vmatpush1.bf16.msra.mxu0 %v8199_v3  ;;  %v8223_v3 = vld [vmem:[%s8754_s12 + $0x320] ss:$8 sps:$4 sm:$0xff]  }
 0x5e9   :  { %3926 = vmatprep.subr.bf16.mxu1 %v8205_v13  ;;  %3967 = vmatprep.subr.bf16.mxu0 %v8211_v19  ;;  %9585 = vst [vmem:[#allocation139_spill] sm:$0xff] %v8223_v3  ;;  %v8231_v19 = vld [vmem:[%s8754_s12 + $0x214] ss:$8 sps:$4 sm:$0xff]  }
 0x5ea   :  { %9586 = vst [vmem:[#allocation140_spill] sm:$0xff] %v8231_v19 }
 0x5ec   :  { %3927 = vmatpush1.bf16.msra.mxu1 %v8217_v38  ;;  %3968 = vmatpush1.bf16.msra.mxu0 %v8223_v3  ;;  %v8239_v38 = vld [vmem:[%s8754_s12 + $0x314] ss:$8 sps:$4 sm:$0xff]  }
 0x5ed   :  { %v8226_v13 = vpop.f32.mrf.mxu0  ;;  %3928 = vmatprep.subr.bf16.mxu1 %v8231_v19  ;;  %v8234_v24 = vpop.f32.mrf.mxu1  ;;  %9587 = vst [vmem:[#allocation141_spill] sm:$0xff] %v8239_v38  ;;  %3969 = vmatprep.subr.bf16.mxu0 %v8239_v38 }
 0x5ef   :  { %v3726_v53 = vpop.f32.mrf.mxu0  ;;  %v3767_v39 = vpop.f32.mrf.mxu1 }
 0x5f0   :  { %v3727_v3 = vadd.f32 %v3726_v53, %v8086_v48  ;;  %3929 = vmatpush1.bf16.msra.mxu1 %v8246_v16  ;;  %v3768_v19 = vadd.f32 %v3767_v39, %v8088_v37  ;;  %3970 = vmatpush1.bf16.msra.mxu0 %v8253_v25  ;;  %v8259_v48 = vld [vmem:[%s8754_s12 + $0x204] ss:$8 sps:$4 sm:$0xff]  }
 0x5f1   :  { %v3728_v38 = vpop.f32.mrf.mxu0  ;;  %3930 = vmatprep.subr.bf16.mxu1 %v8259_v48  ;;  %v3769_v16 = vpop.f32.mrf.mxu1  ;;  %v8266_v37 = vld [vmem:[%s8754_s12 + $0x304] ss:$8 sps:$4 sm:$0xff]  }
 0x5f2   :  { %v3777_v53 = vadd.f32 %v3727_v3, %v7060_v58  ;;  %3971 = vmatprep.subr.bf16.mxu0 %v8266_v37  ;;  %v3779_v39 = vadd.f32 %v3768_v19, %v7063_v10  ;;  %v8279_v3 = vld [vmem:[%s8754_s12 + $0x300] ss:$8 sps:$4 sm:$0xff]   ;;  %v8285_v19 = vld [vmem:[%s8754_s12 + $0x2f4] ss:$8 sps:$4 sm:$0xff]  }
 0x5f3   :  { %v3729_v38 = vpop.f32.mrf.mxu0  ;;  %v3770_v26 = vpop.f32.mrf.mxu1  ;;  %9590 = vst [vmem:[#allocation144_spill] sm:$0xff] %v8285_v19 }
 0x5f4   :  { %v3785_v25 = vpack.c.bf16 %v3777_v53, %v3777_v53  ;;  %3931 = vmatpush1.bf16.msra.mxu1 %v8273_v29  ;;  %v3787_v16 = vpack.c.bf16 %v3779_v39, %v3779_v39  ;;  %3972 = vmatpush1.bf16.msra.mxu0 %v8279_v3  ;;  %v8293_v53 = vld [vmem:[%s8754_s12 + $0x3f4] ss:$8 sps:$4 sm:$0xff]   ;;  %v8301_v38 = vld [vmem:[%s8754_s12 + $0x2f0] ss:$8 sps:$4 sm:$0xff]  }
 0x5f5   :  { %3932 = vmatprep.subr.bf16.mxu1 %v8285_v19  ;;  %v8288_v26 = vpop.f32.mrf.mxu0  ;;  %9591 = vst [vmem:[#allocation145_spill] sm:$0xff] %v8293_v53  ;;  %3973 = vmatprep.subr.bf16.mxu0 %v8293_v53  ;;  %9592 = vst [vmem:[#allocation146_spill] sm:$0xff] %v8301_v38  ;;  %v8319_v19 = vld [vmem:[%s8754_s12 + $0x3e4] ss:$8 sps:$4 sm:$0xff]  }
 0x5f6   :  { %3948 = vmatprep.mubr.bf16.mxu1 %v3785_v25  ;;  %3989 = vmatprep.mubr.bf16.mxu0 %v3787_v16  ;;  %v8307_v25 = vld [vmem:[%s8754_s12 + $0x3f0] ss:$8 sps:$4 sm:$0xff]   ;;  %v8313_v16 = vld [vmem:[%s8754_s12 + $0x2e4] ss:$8 sps:$4 sm:$0xff]  }
 0x5f7   :  { %v8296_v39 = vpop.f32.mrf.mxu0  ;;  %9593 = vst [vmem:[#allocation147_spill] sm:$0xff] %v8307_v25  ;;  %9594 = vst [vmem:[#allocation148_spill] sm:$0xff] %v8313_v16 }
 0x5f8   :  { %3933 = vmatpush2.bf16.msra.mxu1 %v8301_v38  ;;  %3974 = vmatpush2.bf16.msra.mxu0 %v8307_v25  ;;  %v8325_v25 = vld [vmem:[%s8754_s12 + $0x2e0] ss:$8 sps:$4 sm:$0xff]  }
 0x5f9   :  { %3934 = vmatprep.subr.bf16.mxu1 %v8313_v16  ;;  %v3831_v53 = vpop.f32.mrf.mxu0  ;;  %3975 = vmatprep.subr.bf16.mxu0 %v8319_v19  ;;  %9595 = vst [vmem:[#allocation149_spill] sm:$0xff] %v8325_v25  ;;  %v8331_v16 = vld [vmem:[%s8754_s12 + $0x3e0] ss:$8 sps:$4 sm:$0xff]  }
 0x5fa   :  { %9596 = vst [vmem:[#allocation150_spill] sm:$0xff] %v8331_v16  ;;  %v8337_v53 = vld [vmem:[%s8754_s12 + $0x2d4] ss:$8 sps:$4 sm:$0xff]  }
 0x5fb   :  { %v3832_v38 = vpop.f32.mrf.mxu0  ;;  %9597 = vst [vmem:[#allocation151_spill] sm:$0xff] %v8337_v53 }
 0x5fc   :  { %3935 = vmatpush2.bf16.msra.mxu1 %v8325_v25  ;;  %3976 = vmatpush2.bf16.msra.mxu0 %v8331_v16  ;;  %v8343_v38 = vld [vmem:[%s8754_s12 + $0x3d4] ss:$8 sps:$4 sm:$0xff]   ;;  %v8349_v25 = vld [vmem:[%s8754_s12 + $0x2d0] ss:$8 sps:$4 sm:$0xff]  }
 0x5fd   :  { %3936 = vmatprep.subr.bf16.mxu1 %v8337_v53  ;;  %9598 = vst [vmem:[#allocation152_spill] sm:$0xff] %v8343_v38  ;;  %3977 = vmatprep.subr.bf16.mxu0 %v8343_v38  ;;  %9599 = vst [vmem:[#allocation153_spill] sm:$0xff] %v8349_v25  ;;  %v8355_v16 = vld [vmem:[%s8754_s12 + $0x3d0] ss:$8 sps:$4 sm:$0xff]   ;;  %v8361_v53 = vld [vmem:[%s8754_s12 + $0x2c4] ss:$8 sps:$4 sm:$0xff]  }
 0x5fe   :  { %9600 = vst [vmem:[#allocation154_spill] sm:$0xff] %v8355_v16  ;;  %9601 = vst [vmem:[#allocation155_spill] sm:$0xff] %v8361_v53  ;;  %v8367_v38 = vld [vmem:[%s8754_s12 + $0x3c4] ss:$8 sps:$4 sm:$0xff]  }
 0x5ff   :  { %9602 = vst [vmem:[#allocation156_spill] sm:$0xff] %v8367_v38 }
 0x600   :  { %3937 = vmatpush2.bf16.msra.mxu1 %v8349_v25  ;;  %3978 = vmatpush2.bf16.msra.mxu0 %v8355_v16  ;;  %v8373_v25 = vld [vmem:[%s8754_s12 + $0x2c0] ss:$8 sps:$4 sm:$0xff]  }
 0x601   :  { %3938 = vmatprep.subr.bf16.mxu1 %v8361_v53  ;;  %3979 = vmatprep.subr.bf16.mxu0 %v8367_v38  ;;  %9603 = vst [vmem:[#allocation157_spill] sm:$0xff] %v8373_v25  ;;  %v8379_v16 = vld [vmem:[%s8754_s12 + $0x3c0] ss:$8 sps:$4 sm:$0xff]   ;;  %v8385_v53 = vld [vmem:[%s8754_s12 + $0x2b4] ss:$8 sps:$4 sm:$0xff]  }
 0x602   :  { %9604 = vst [vmem:[#allocation158_spill] sm:$0xff] %v8379_v16  ;;  %9605 = vst [vmem:[#allocation159_spill] sm:$0xff] %v8385_v53  ;;  %v8391_v38 = vld [vmem:[%s8754_s12 + $0x3b4] ss:$8 sps:$4 sm:$0xff]  }
 0x603   :  { %9606 = vst [vmem:[#allocation160_spill] sm:$0xff] %v8391_v38 }
 0x604   :  { %3939 = vmatpush2.bf16.msra.mxu1 %v8373_v25  ;;  %3980 = vmatpush2.bf16.msra.mxu0 %v8379_v16  ;;  %v8397_v25 = vld [vmem:[%s8754_s12 + $0x2b0] ss:$8 sps:$4 sm:$0xff]  }
 0x605   :  { %3940 = vmatprep.subr.bf16.mxu1 %v8385_v53  ;;  %3981 = vmatprep.subr.bf16.mxu0 %v8391_v38  ;;  %9607 = vst [vmem:[#allocation161_spill] sm:$0xff] %v8397_v25  ;;  %v8403_v16 = vld [vmem:[%s8754_s12 + $0x3b0] ss:$8 sps:$4 sm:$0xff]   ;;  %v8409_v53 = vld [vmem:[%s8754_s12 + $0x2a4] ss:$8 sps:$4 sm:$0xff]  }
 0x606   :  { %9608 = vst [vmem:[#allocation162_spill] sm:$0xff] %v8403_v16  ;;  %9609 = vst [vmem:[#allocation163_spill] sm:$0xff] %v8409_v53  ;;  %v8415_v38 = vld [vmem:[%s8754_s12 + $0x3a4] ss:$8 sps:$4 sm:$0xff]  }
 0x607   :  { %9610 = vst [vmem:[#allocation164_spill] sm:$0xff] %v8415_v38 }
 0x608   :  { %3941 = vmatpush2.bf16.msra.mxu1 %v8397_v25  ;;  %3982 = vmatpush2.bf16.msra.mxu0 %v8403_v16  ;;  %v8421_v25 = vld [vmem:[%s8754_s12 + $0x2a0] ss:$8 sps:$4 sm:$0xff]   ;;  %v3725_v16 = vadd.f32 %v8226_v13, %v8082_v47  ;;  %v8443_v47 = vld [vmem:[%s8754_s12 + $0x394] ss:$8 sps:$4 sm:$0xff]   ;;  %v8449_v13 = vld [vmem:[%s8754_s12 + $0x290] ss:$8 sps:$4 sm:$0xff]  }
 0x609   :  { %3942 = vmatprep.subr.bf16.mxu1 %v8409_v53  ;;  %3983 = vmatprep.subr.bf16.mxu0 %v8415_v38  ;;  %9611 = vst [vmem:[#allocation165_spill] sm:$0xff] %v8421_v25  ;;  %v8429_v53 = vld [vmem:[%s8754_s12 + $0x3a0] ss:$8 sps:$4 sm:$0xff]   ;;  %v8435_v38 = vld [vmem:[%s8754_s12 + $0x294] ss:$8 sps:$4 sm:$0xff]   ;;  %9613 = vst [vmem:[#allocation167_spill] sm:$0xff] %v8443_v47 }
 0x60a   :  { %9612 = vst [vmem:[#allocation166_spill] sm:$0xff] %v8429_v53 }
 0x60c   :  { %3943 = vmatpush2.bf16.msra.mxu1 %v8421_v25  ;;  %3984 = vmatpush2.bf16.msra.mxu0 %v8429_v53  ;;  %v3766_v25 = vadd.f32 %v8234_v24, %v8084_v61  ;;  %v3776_v53 = vadd.f32 %v3725_v16, %v7257_v34  ;;  %v8456_v61 = vld [vmem:[%s8754_s12 + $0x390] ss:$8 sps:$4 sm:$0xff]   ;;  %v8462_v24 = vld [vmem:[%s8754_s12 + $0x284] ss:$8 sps:$4 sm:$0xff]  }
 0x60d   :  { %3944 = vmatprep.subr.bf16.mxu1 %v8435_v38  ;;  %3985 = vmatprep.subr.bf16.mxu0 %v8443_v47  ;;  %9614 = vst [vmem:[#allocation168_spill] sm:$0xff] %v8456_v61  ;;  %9615 = vst [vmem:[#allocation169_spill] sm:$0xff] %v8462_v24  ;;  %v8469_v16 = vld [vmem:[%s8754_s12 + $0x384] ss:$8 sps:$4 sm:$0xff]  }
 0x60e   :  { %v3778_v47 = vadd.f32 %v3766_v25, %v7274_v2  ;;  %v3784_v34 = vpack.c.bf16 %v3776_v53, %v3776_v53  ;;  %v9645_v53 = vld [vmem:[#allocation47_spill] sm:$0xff] }
 0x610   :  { %3945 = vmatpush2.bf16.msra.mxu1 %v8449_v13  ;;  %3986 = vmatpush2.bf16.msra.mxu0 %v8456_v61  ;;  %v8475_v61 = vld [vmem:[%s8754_s12 + $0x280] ss:$8 sps:$4 sm:$0xff]   ;;  %v3786_v25 = vpack.c.bf16 %v3778_v47, %v3778_v47  ;;  %v9646_v47 = vld [vmem:[#allocation48_spill] sm:$0xff] }
 0x611   :  { %3946 = vmatprep.subr.bf16.mxu1 %v8462_v24  ;;  %3987 = vmatprep.subr.bf16.mxu0 %v8469_v16  ;;  %v8481_v24 = vld [vmem:[%s8754_s12 + $0x380] ss:$8 sps:$4 sm:$0xff]  }
 0x614   :  { %3947 = vmatpush2.bf16.msra.mxu1 %v8475_v61  ;;  %3988 = vmatpush2.bf16.msra.mxu0 %v8481_v24 }
 0x615   :  { %4934 = vmatprep.subr.msk.bf16.mxu1 %vm1269_vm0, %v5965_v22  ;;  %4936 = vmatprep.subr.msk.bf16.mxu0 %vm1269_vm0, %v5967_v23  ;;  %v4933_v22 = vld [vmem:[%s8752_s1 + $0xc] sm:$0xf] }
 0x616   :  { %v9616_v23 = vld [vmem:[#allocation15_spill] sm:$0xff] }
 0x617   :  { %3949 = vmatmul.mubr.bf16.vlgmr.msra.gmra.mxu1 %v3784_v34  ;;  %3990 = vmatmul.mubr.bf16.vlgmr.msra.gmra.mxu0 %v3786_v25  ;;  %v9632_v34 = vld [vmem:[#allocation34_spill] sm:$0xff]  ;;  %v9647_v25 = vld [vmem:[#allocation49_spill] sm:$0xff] }
 0x618   :  { %4023 = vmatpush1.bf16.msra.mxu1 %v5985_v42  ;;  %4064 = vmatpush1.bf16.msra.mxu0 %v5988_v43  ;;  %v9617_v42 = vld [vmem:[#allocation16_spill] sm:$0xff]  ;;  %v9618_v43 = vld [vmem:[#allocation17_spill] sm:$0xff] }
 0x619   :  { %4040 = vmatprep.mubr.bf16.mxu1 %v9144_v60  ;;  %4081 = vmatprep.mubr.bf16.mxu0 %v9144_v60 }
 0x61a   :  { %4938 = vmatprep.subr.msk.bf16.mxu1 %vm1269_vm0, %v5990_v44  ;;  %4940 = vmatprep.subr.msk.bf16.mxu0 %vm1269_vm0, %v5992_v45  ;;  %v9619_v44 = vld [vmem:[#allocation18_spill] sm:$0xff]  ;;  %v9620_v45 = vld [vmem:[#allocation19_spill] sm:$0xff] }
 0x61f   :  { %4935 = vmatmul.mubr.msk.bf16.vlgmr.msra.gmra.mxu1 %vm1265_vm1, %v4933_v22  ;;  %4937 = vmatmul.mubr.msk.bf16.vlgmr.msra.gmra.mxu0 %vm1265_vm1, %v4933_v22 }
 0x620   :  { %4105 = vmatpush1.bf16.msra.mxu1 %v6018_v54  ;;  %4146 = vmatpush1.bf16.msra.mxu0 %v6021_v55  ;;  %v9621_v54 = vld [vmem:[#allocation20_spill] sm:$0xff]  ;;  %v9622_v55 = vld [vmem:[#allocation21_spill] sm:$0xff] }
 0x621   :  { %4122 = vmatprep.mubr.bf16.mxu1 %v9144_v60  ;;  %4163 = vmatprep.mubr.bf16.mxu0 %v9144_v60 }
 0x622   :  { %4172 = vmatprep.subr.bf16.mxu1 %v6023_v56  ;;  %4213 = vmatprep.subr.bf16.mxu0 %v6025_v57  ;;  %v9623_v56 = vld [vmem:[#allocation22_spill] sm:$0xff]  ;;  %v9624_v57 = vld [vmem:[#allocation23_spill] sm:$0xff] }
 0x627   :  { %4939 = vmatmul.mubr.msk.bf16.vlgmr.msra.gmra.mxu1 %vm1265_vm1, %v4933_v22  ;;  %4941 = vmatmul.mubr.msk.bf16.vlgmr.msra.gmra.mxu0 %vm1265_vm1, %v4933_v22  ;;  %v9648_v22 = vld [vmem:[#allocation50_spill] sm:$0xff] }
 0x628   :  { %4173 = vmatpush1.bf16.msra.mxu1 %v6047_v62  ;;  %4214 = vmatpush1.bf16.msra.mxu0 %v6049_v63  ;;  %v9625_v62 = vld [vmem:[#allocation32_spill] sm:$0xff] }
 0x629   :  { %4174 = vmatprep.subr.bf16.mxu1 %v6051_v0  ;;  %4215 = vmatprep.subr.bf16.mxu0 %v6053_v1  ;;  %v4002_v63 = vpack.c.bf16 %v9625_v62, %v9625_v62  ;;  %v9626_v0 = vld [vmem:[#allocation24_spill] sm:$0xff]  ;;  %v9627_v1 = vld [vmem:[#allocation25_spill] sm:$0xff] }
 0x62a   :  { %4204 = vmatprep.mubr.bf16.mxu1 %v9144_v60  ;;  %4245 = vmatprep.mubr.bf16.mxu0 %v9144_v60  ;;  %v9658_v62 = vld [vmem:[#allocation60_spill] sm:$0xff] }
 0x62c   :  { %4175 = vmatpush1.bf16.msra.mxu1 %v6071_v6  ;;  %4216 = vmatpush1.bf16.msra.mxu0 %v6073_v7  ;;  %v9628_v6 = vld [vmem:[#allocation26_spill] sm:$0xff]  ;;  %v9629_v7 = vld [vmem:[#allocation27_spill] sm:$0xff] }
 0x62d   :  { %4176 = vmatprep.subr.bf16.mxu1 %v6077_v8  ;;  %4217 = vmatprep.subr.bf16.mxu0 %v6079_v9  ;;  %v9630_v8 = vld [vmem:[#allocation28_spill] sm:$0xff]  ;;  %v9631_v9 = vld [vmem:[#allocation33_spill] sm:$0xff] }
 0x630   :  { %4177 = vmatpush1.bf16.msra.mxu1 %v9449_v5  ;;  %4218 = vmatpush1.bf16.msra.mxu0 %v9450_v28  ;;  %v9633_v5 = vld [vmem:[#allocation35_spill] sm:$0xff]  ;;  %v9634_v28 = vld [vmem:[#allocation36_spill] sm:$0xff] }
 0x631   :  { %4178 = vmatprep.subr.bf16.mxu1 %v9451_v33  ;;  %4219 = vmatprep.subr.bf16.mxu0 %v9452_v30  ;;  %v9635_v33 = vld [vmem:[#allocation37_spill] sm:$0xff]  ;;  %v9636_v30 = vld [vmem:[#allocation38_spill] sm:$0xff] }
 0x634   :  { %4179 = vmatpush1.bf16.msra.mxu1 %v9453_v41  ;;  %4220 = vmatpush1.bf16.msra.mxu0 %v9454_v4  ;;  %v9637_v41 = vld [vmem:[#allocation39_spill] sm:$0xff]  ;;  %v9638_v4 = vld [vmem:[#allocation40_spill] sm:$0xff] }
 0x635   :  { %4180 = vmatprep.subr.bf16.mxu1 %v9455_v32  ;;  %4221 = vmatprep.subr.bf16.mxu0 %v9456_v36  ;;  %v9639_v32 = vld [vmem:[#allocation41_spill] sm:$0xff]  ;;  %v9640_v36 = vld [vmem:[#allocation42_spill] sm:$0xff] }
 0x638   :  { %4181 = vmatpush1.bf16.msra.mxu1 %v9457_v20  ;;  %4222 = vmatpush1.bf16.msra.mxu0 %v9458_v49  ;;  %v9641_v20 = vld [vmem:[#allocation43_spill] sm:$0xff]  ;;  %v9642_v49 = vld [vmem:[#allocation44_spill] sm:$0xff] }
 0x639   :  { %4182 = vmatprep.subr.bf16.mxu1 %v9459_v14  ;;  %4223 = vmatprep.subr.bf16.mxu0 %v9460_v40  ;;  %v9643_v14 = vld [vmem:[#allocation45_spill] sm:$0xff]  ;;  %v9644_v40 = vld [vmem:[#allocation46_spill] sm:$0xff] }
 0x63c   :  { %4183 = vmatpush1.bf16.msra.mxu1 %v9616_v23  ;;  %4224 = vmatpush1.bf16.msra.mxu0 %v9617_v42  ;;  %v9649_v23 = vld [vmem:[#allocation51_spill] sm:$0xff]  ;;  %v9650_v42 = vld [vmem:[#allocation52_spill] sm:$0xff] }
 0x63d   :  { %4184 = vmatprep.subr.bf16.mxu1 %v9618_v43  ;;  %4225 = vmatprep.subr.bf16.mxu0 %v9619_v44  ;;  %v9651_v43 = vld [vmem:[#allocation53_spill] sm:$0xff]  ;;  %v9652_v44 = vld [vmem:[#allocation54_spill] sm:$0xff] }
 0x640   :  { %4185 = vmatpush1.bf16.msra.mxu1 %v9620_v45  ;;  %4226 = vmatpush1.bf16.msra.mxu0 %v9621_v54  ;;  %v9653_v45 = vld [vmem:[#allocation55_spill] sm:$0xff]  ;;  %v9654_v54 = vld [vmem:[#allocation56_spill] sm:$0xff] }
 0x641   :  { %4186 = vmatprep.subr.bf16.mxu1 %v9622_v55  ;;  %4227 = vmatprep.subr.bf16.mxu0 %v9623_v56  ;;  %v9655_v55 = vld [vmem:[#allocation57_spill] sm:$0xff]  ;;  %v9656_v56 = vld [vmem:[#allocation58_spill] sm:$0xff] }
 0x644   :  { %4187 = vmatpush1.bf16.msra.mxu1 %v9624_v57  ;;  %4228 = vmatpush1.bf16.msra.mxu0 %v9626_v0  ;;  %v9657_v57 = vld [vmem:[#allocation59_spill] sm:$0xff]  ;;  %v9659_v0 = vld [vmem:[#allocation61_spill] sm:$0xff] }
 0x645   :  { %4254 = vmatprep.subr.bf16.mxu1 %v9627_v1  ;;  %4295 = vmatprep.subr.bf16.mxu0 %v9628_v6  ;;  %v9660_v1 = vld [vmem:[#allocation62_spill] sm:$0xff]  ;;  %v9661_v6 = vld [vmem:[#allocation63_spill] sm:$0xff] }
 0x647   :  { %4205 = vmatmul.mubr.bf16.vlgmr.msra.gmra.mxu1 %v4002_v63  ;;  %4246 = vmatmul.mubr.bf16.vlgmr.msra.gmra.mxu0 %v4002_v63 }
 0x648   :  { %4255 = vmatpush1.bf16.msra.mxu1 %v9629_v7  ;;  %4296 = vmatpush1.bf16.msra.mxu0 %v9630_v8  ;;  %v9662_v7 = vld [vmem:[#allocation64_spill] sm:$0xff]  ;;  %v9663_v8 = vld [vmem:[#allocation65_spill] sm:$0xff] }
 0x649   :  { %4256 = vmatprep.subr.bf16.mxu1 %v9631_v9  ;;  %4297 = vmatprep.subr.bf16.mxu0 %v9632_v34  ;;  %v9664_v9 = vld [vmem:[#allocation66_spill] sm:$0xff]  ;;  %v4942_v34 = vld [vmem:[%s8756_s2 + $0xc] sm:$0xf] }
 0x64a   :  { %4286 = vmatprep.mubr.bf16.mxu1 %v9144_v60  ;;  %4327 = vmatprep.mubr.bf16.mxu0 %v9144_v60 }
 0x64c   :  { %4257 = vmatpush1.bf16.msra.mxu1 %v9633_v5  ;;  %4298 = vmatpush1.bf16.msra.mxu0 %v9634_v28  ;;  %v9665_v5 = vld [vmem:[#allocation67_spill] sm:$0xff]  ;;  %v9666_v28 = vld [vmem:[#allocation68_spill] sm:$0xff] }
 0x64d   :  { %4258 = vmatprep.subr.bf16.mxu1 %v9635_v33  ;;  %4299 = vmatprep.subr.bf16.mxu0 %v9636_v30  ;;  %v9668_v33 = vld [vmem:[#allocation70_spill] sm:$0xff]  ;;  %v9670_v30 = vld [vmem:[#allocation72_spill] sm:$0xff] }
 0x650   :  { %4259 = vmatpush1.bf16.msra.mxu1 %v9637_v41  ;;  %4300 = vmatpush1.bf16.msra.mxu0 %v9638_v4  ;;  %v9671_v41 = vld [vmem:[#allocation73_spill] sm:$0xff]  ;;  %v9672_v4 = vld [vmem:[#allocation74_spill] sm:$0xff] }
 0x651   :  { %4260 = vmatprep.subr.bf16.mxu1 %v9639_v32  ;;  %4301 = vmatprep.subr.bf16.mxu0 %v9640_v36  ;;  %v9673_v32 = vld [vmem:[#allocation75_spill] sm:$0xff]  ;;  %v9674_v36 = vld [vmem:[#allocation76_spill] sm:$0xff] }
 0x654   :  { %4261 = vmatpush1.bf16.msra.mxu1 %v9641_v20  ;;  %4302 = vmatpush1.bf16.msra.mxu0 %v9642_v49  ;;  %v9675_v20 = vld [vmem:[#allocation77_spill] sm:$0xff]  ;;  %v9676_v49 = vld [vmem:[#allocation78_spill] sm:$0xff] }
 0x655   :  { %4262 = vmatprep.subr.bf16.mxu1 %v9643_v14  ;;  %4303 = vmatprep.subr.bf16.mxu0 %v9644_v40  ;;  %v9677_v14 = vld [vmem:[#allocation79_spill] sm:$0xff]  ;;  %v9678_v40 = vld [vmem:[#allocation80_spill] sm:$0xff] }
 0x658   :  { %4263 = vmatpush1.bf16.msra.mxu1 %v9645_v53  ;;  %4304 = vmatpush1.bf16.msra.mxu0 %v9646_v47  ;;  %v9679_v53 = vld [vmem:[#allocation81_spill] sm:$0xff]  ;;  %v9680_v47 = vld [vmem:[#allocation82_spill] sm:$0xff] }
 0x659   :  { %4264 = vmatprep.subr.bf16.mxu1 %v9647_v25  ;;  %4305 = vmatprep.subr.bf16.mxu0 %v9648_v22  ;;  %v9681_v25 = vld [vmem:[#allocation83_spill] sm:$0xff]  ;;  %v9682_v22 = vld [vmem:[#allocation84_spill] sm:$0xff] }
 0x65c   :  { %4265 = vmatpush1.bf16.msra.mxu1 %v9649_v23  ;;  %4306 = vmatpush1.bf16.msra.mxu0 %v9650_v42  ;;  %v9683_v23 = vld [vmem:[#allocation85_spill] sm:$0xff]  ;;  %v9684_v42 = vld [vmem:[#allocation86_spill] sm:$0xff] }
 0x65d   :  { %4266 = vmatprep.subr.bf16.mxu1 %v9651_v43  ;;  %4307 = vmatprep.subr.bf16.mxu0 %v9652_v44  ;;  %v9685_v43 = vld [vmem:[#allocation87_spill] sm:$0xff]  ;;  %v9686_v44 = vld [vmem:[#allocation88_spill] sm:$0xff] }
 0x660   :  { %4267 = vmatpush1.bf16.msra.mxu1 %v9653_v45  ;;  %4308 = vmatpush1.bf16.msra.mxu0 %v9654_v54  ;;  %v9687_v45 = vld [vmem:[#allocation89_spill] sm:$0xff]  ;;  %v9688_v54 = vld [vmem:[#allocation90_spill] sm:$0xff] }
 0x661   :  { %4268 = vmatprep.subr.bf16.mxu1 %v9655_v55  ;;  %4309 = vmatprep.subr.bf16.mxu0 %v9656_v56  ;;  %v9689_v55 = vld [vmem:[#allocation91_spill] sm:$0xff]  ;;  %v9690_v56 = vld [vmem:[#allocation92_spill] sm:$0xff] }
 0x664   :  { %4269 = vmatpush1.bf16.msra.mxu1 %v9657_v57  ;;  %4310 = vmatpush1.bf16.msra.mxu0 %v9658_v62  ;;  %v9691_v57 = vld [vmem:[#allocation93_spill] sm:$0xff]  ;;  %v9692_v62 = vld [vmem:[#allocation94_spill] sm:$0xff] }
 0x665   :  { %4371 = vmatprep.subr.bf16.mxu1 %v9659_v0  ;;  %4398 = vmatprep.subr.bf16.mxu0 %v9660_v1  ;;  %v9693_v0 = vld [vmem:[#allocation95_spill] sm:$0xff]  ;;  %v9694_v1 = vld [vmem:[#allocation96_spill] sm:$0xff] }
 0x667   :  { %4287 = vmatmul.mubr.bf16.vlgmr.msra.gmra.mxu1 %v4002_v63  ;;  %4328 = vmatmul.mubr.bf16.vlgmr.msra.gmra.mxu0 %v4002_v63  ;;  %v9667_v63 = vld [vmem:[#allocation69_spill] sm:$0xff] }
 0x668   :  { %4372 = vmatpush1.bf16.msra.mxu1 %v9661_v6  ;;  %4389 = vmatprep.mubr.bf16.mxu1 %v9144_v60  ;;  %v9669_v60 = vld [vmem:[#allocation71_spill] sm:$0xff]  ;;  %v9695_v6 = vld [vmem:[#allocation97_spill] sm:$0xff] }
 0x669   :  { %4439 = vmatprep.subr.bf16.mxu1 %v9662_v7  ;;  %4399 = vmatpush1.bf16.msra.mxu0 %v9663_v8  ;;  %v9696_v7 = vld [vmem:[#allocation98_spill] sm:$0xff]  ;;  %v9697_v8 = vld [vmem:[#allocation99_spill] sm:$0xff] }
 0x66a   :  { %4400 = vmatprep.subr.bf16.mxu0 %v9664_v9  ;;  %v9698_v9 = vld [vmem:[#allocation100_spill] sm:$0xff] }
 0x66d   :  { %4401 = vmatpush1.bf16.msra.mxu0 %v9665_v5  ;;  %v9700_v5 = vld [vmem:[#allocation102_spill] sm:$0xff] }
 0x66e   :  { %4402 = vmatprep.subr.bf16.mxu0 %v9666_v28  ;;  %v9701_v28 = vld [vmem:[#allocation103_spill] sm:$0xff] }
 0x66f   :  { %4943 = vmatmul.mubr.msk.bf16.vlgmr.msra.gmra.mxu1 %vm2010_vm2, %v4942_v34  ;;  %v9699_v34 = vld [vmem:[#allocation101_spill] sm:$0xff] }
 0x670   :  { %4440 = vmatpush1.bf16.msra.mxu1 %v9667_v63  ;;  %v9702_v63 = vld [vmem:[#allocation104_spill] sm:$0xff] }
 0x671   :  { %4441 = vmatprep.subr.bf16.mxu1 %v9668_v33  ;;  %4403 = vmatpush1.bf16.msra.mxu0 %v9669_v60  ;;  %v9703_v33 = vld [vmem:[#allocation105_spill] sm:$0xff]  ;;  %v9704_v60 = vld [vmem:[#allocation106_spill] sm:$0xff] }
 0x672   :  { %4404 = vmatprep.subr.bf16.mxu0 %v9670_v30  ;;  %v9705_v30 = vld [vmem:[#allocation107_spill] sm:$0xff] }
 0x674   :  { %4442 = vmatpush1.bf16.msra.mxu1 %v9671_v41 }
 0x675   :  { %4443 = vmatprep.subr.bf16.mxu1 %v9672_v4  ;;  %4405 = vmatpush1.bf16.msra.mxu0 %v9673_v32  ;;  %v9706_v4 = vld [vmem:[#allocation108_spill] sm:$0xff] }
 0x676   :  { %4406 = vmatprep.subr.bf16.mxu0 %v9674_v36  ;;  %v9707_v36 = vld [vmem:[#allocation109_spill] sm:$0xff] }
 0x678   :  { %4444 = vmatpush1.bf16.msra.mxu1 %v9675_v20 }
 0x679   :  { %4445 = vmatprep.subr.bf16.mxu1 %v9676_v49  ;;  %4407 = vmatpush1.bf16.msra.mxu0 %v9677_v14  ;;  %v9708_v49 = vld [vmem:[#allocation110_spill] sm:$0xff] }
 0x67a   :  { %4408 = vmatprep.subr.bf16.mxu0 %v9678_v40  ;;  %v9709_v40 = vld [vmem:[#allocation111_spill] sm:$0xff] }
 0x67c   :  { %4446 = vmatpush1.bf16.msra.mxu1 %v9679_v53 }
 0x67d   :  { %4447 = vmatprep.subr.bf16.mxu1 %v9680_v47  ;;  %4409 = vmatpush1.bf16.msra.mxu0 %v9681_v25  ;;  %v9710_v47 = vld [vmem:[#allocation112_spill] sm:$0xff] }
 0x67e   :  { %4410 = vmatprep.subr.bf16.mxu0 %v9682_v22  ;;  %v9711_v22 = vld [vmem:[#allocation113_spill] sm:$0xff] }
 0x680   :  { %4448 = vmatpush1.bf16.msra.mxu1 %v9683_v23 }
 0x681   :  { %4449 = vmatprep.subr.bf16.mxu1 %v9684_v42  ;;  %4411 = vmatpush1.bf16.msra.mxu0 %v9685_v43  ;;  %v9712_v42 = vld [vmem:[#allocation114_spill] sm:$0xff] }
 0x682   :  { %4412 = vmatprep.subr.bf16.mxu0 %v9686_v44  ;;  %v9713_v44 = vld [vmem:[#allocation115_spill] sm:$0xff] }
 0x684   :  { %4450 = vmatpush1.bf16.msra.mxu1 %v9687_v45  ;;  %v9714_v45 = vld [vmem:[#allocation116_spill] sm:$0xff] }
 0x685   :  { %4451 = vmatprep.subr.bf16.mxu1 %v9688_v54  ;;  %4413 = vmatpush1.bf16.msra.mxu0 %v9689_v55  ;;  %v9715_v54 = vld [vmem:[#allocation117_spill] sm:$0xff]  ;;  %v9716_v55 = vld [vmem:[#allocation118_spill] sm:$0xff] }
 0x686   :  { %4414 = vmatprep.subr.bf16.mxu0 %v9690_v56  ;;  %v9717_v56 = vld [vmem:[#allocation119_spill] sm:$0xff] }
 0x688   :  { %4452 = vmatpush1.bf16.msra.mxu1 %v9691_v57  ;;  %v9718_v57 = vld [vmem:[#allocation120_spill] sm:$0xff] }
 0x689   :  { %4453 = vmatprep.subr.bf16.mxu1 %v9692_v62  ;;  %4415 = vmatpush2.bf16.msra.mxu0 %v9693_v0  ;;  %v9719_v62 = vld [vmem:[#allocation121_spill] sm:$0xff]  ;;  %v9720_v0 = vld [vmem:[#allocation122_spill] sm:$0xff] }
 0x68a   :  { %4416 = vmatprep.subr.bf16.mxu0 %v9694_v1  ;;  %v9721_v1 = vld [vmem:[#allocation123_spill] sm:$0xff] }
 0x68c   :  { %4454 = vmatpush1.bf16.msra.mxu1 %v9695_v6  ;;  %v9722_v6 = vld [vmem:[#allocation124_spill] sm:$0xff] }
 0x68d   :  { %4455 = vmatprep.subr.bf16.mxu1 %v9696_v7  ;;  %4417 = vmatpush2.bf16.msra.mxu0 %v9697_v8  ;;  %v9723_v7 = vld [vmem:[#allocation125_spill] sm:$0xff]  ;;  %v9724_v8 = vld [vmem:[#allocation126_spill] sm:$0xff] }
 0x68e   :  { %4418 = vmatprep.subr.bf16.mxu0 %v9698_v9  ;;  %v9725_v9 = vld [vmem:[#allocation127_spill] sm:$0xff] }
 0x690   :  { %4456 = vmatpush2.bf16.msra.mxu1 %v9699_v34  ;;  %v9726_v34 = vld [vmem:[#allocation128_spill] sm:$0xff] }
 0x691   :  { %4457 = vmatprep.subr.bf16.mxu1 %v9700_v5  ;;  %4419 = vmatpush2.bf16.msra.mxu0 %v9701_v28 }
 0x692   :  { %4420 = vmatprep.subr.bf16.mxu0 %v9702_v63 }
 0x694   :  { %4458 = vmatpush2.bf16.msra.mxu1 %v9703_v33 }
 0x695   :  { %4459 = vmatprep.subr.bf16.mxu1 %v9704_v60  ;;  %4421 = vmatpush2.bf16.msra.mxu0 %v9705_v30 }
 0x696   :  { %4422 = vmatprep.subr.bf16.mxu0 %v9706_v4 }
 0x697   :  { %v3868_v41 = vpop.f32.mrf.mxu1  ;;  %v3909_v32 = vpop.f32.mrf.mxu0 }
 0x698   :  { %4460 = vmatpush2.bf16.msra.mxu1 %v9707_v36  ;;  %v3869_v5 = vadd.f32 %v3868_v41, %v8288_v26  ;;  %v9728_v26 = vld [vmem:[#allocation31_spill] sm:$0xff] }
 0x699   :  { %v3870_v20 = vpop.f32.mrf.mxu1  ;;  %4461 = vmatprep.subr.bf16.mxu1 %v9708_v49  ;;  %v3911_v14 = vpop.f32.mrf.mxu0  ;;  %4423 = vmatpush2.bf16.msra.mxu0 %v9709_v40 }
 0x69a   :  { %4424 = vmatprep.subr.bf16.mxu0 %v9710_v47  ;;  %v3871_v28 = vadd.f32 %v3870_v20, %v8296_v39  ;;  %v3910_v63 = vadd.f32 %v3909_v32, %v3869_v5 }
 0x69b   :  { %v3872_v53 = vpop.f32.mrf.mxu1  ;;  %v3913_v25 = vpop.f32.mrf.mxu0 }
 0x69c   :  { %4462 = vmatpush2.bf16.msra.mxu1 %v9711_v22  ;;  %v3912_v60 = vadd.f32 %v3911_v14, %v3871_v28  ;;  %v9727_v25 = vld [vmem:[#allocation29_spill] sm:$0xff] }
 0x69d   :  { %v3873_v23 = vpop.f32.mrf.mxu1  ;;  %4463 = vmatprep.subr.bf16.mxu1 %v9712_v42  ;;  %v3914_v43 = vpop.f32.mrf.mxu0  ;;  %4425 = vmatpush2.bf16.msra.mxu0 %v9713_v44 }
 0x69e   :  { %4426 = vmatprep.subr.bf16.mxu0 %v9714_v45 }
 0x6a0   :  { %4464 = vmatpush2.bf16.msra.mxu1 %v9715_v54 }
 0x6a1   :  { %4465 = vmatprep.subr.bf16.mxu1 %v9716_v55  ;;  %4427 = vmatpush2.bf16.msra.mxu0 %v9717_v56 }
 0x6a2   :  { %4428 = vmatprep.subr.bf16.mxu0 %v9718_v57 }
 0x6a4   :  { %4466 = vmatpush2.bf16.msra.mxu1 %v9719_v62 }
 0x6a5   :  { %4467 = vmatprep.subr.bf16.mxu1 %v9720_v0  ;;  %4429 = vmatpush2.bf16.msra.mxu0 %v9721_v1 }
 0x6a6   :  { %4480 = vmatprep.subr.bf16.mxu0 %v9722_v6 }
 0x6a8   :  { %4468 = vmatpush2.bf16.msra.mxu1 %v9723_v7 }
 0x6a9   :  { %4469 = vmatprep.subr.bf16.mxu1 %v9724_v8 }
 0x6ac   :  { %4470 = vmatpush2.bf16.msra.mxu1 %v9725_v9 }
 0x6ad   :  { %4521 = vmatprep.subr.bf16.mxu1 %v9726_v34 }
 0x6d7   :  { %v3950_v33 = vpop.f32.mrf.mxu1  ;;  %v3991_v4 = vpop.f32.mrf.mxu0 }
 0x6d8   :  { %v3951_v30 = vadd.f32 %v3950_v33, %v3910_v63 }
 0x6d9   :  { %v3952_v36 = vpop.f32.mrf.mxu1  ;;  %v3993_v53 = vpop.f32.mrf.mxu0 }
 0x6da   :  { %v3992_v49 = vadd.f32 %v3991_v4, %v3951_v30  ;;  %v3953_v40 = vadd.f32 %v3952_v36, %v3912_v60 }
 0x6db   :  { %v3954_v47 = vpop.f32.mrf.mxu1  ;;  %v3995_v42 = vpop.f32.mrf.mxu0 }
 0x6dc   :  { %v3998_v22 = vadd.f32 %v3992_v49, %v9727_v25  ;;  %v3994_v23 = vadd.f32 %v3993_v53, %v3953_v40 }
 0x6dd   :  { %v3955_v43 = vpop.f32.mrf.mxu1  ;;  %v3996_v41 = vpop.f32.mrf.mxu0 }
 0x6de   :  { %4000 = vst [vmem:[%s8759_s15 + $0x20] sm:$0xff] %v3998_v22  ;;  %v3999_v39 = vadd.f32 %v3994_v23, %v9728_v26 }
 0x6df   :  { %v4042_v32 = vpop.f32.mrf.mxu1  ;;  %v4083_v20 = vpop.f32.mrf.mxu0 }
 0x6e0   :  { %4001 = vst [vmem:[%s8759_s15 + $0x28] sm:$0xff] %v3999_v39 }
 0x6e1   :  { %v4044_v14 = vpop.f32.mrf.mxu1  ;;  %v4085_v44 = vpop.f32.mrf.mxu0 }
 0x6e3   :  { %v4046_v45 = vpop.f32.mrf.mxu1  ;;  %v4087_v54 = vpop.f32.mrf.mxu0 }
 0x6e5   :  { %v4047_v55 = vpop.f32.mrf.mxu1  ;;  %v4088_v56 = vpop.f32.mrf.mxu0 }
 0x6e6   :  { %v9743_v55 = vld [vmem:[#allocation142_spill] sm:$0xff] }
 0x6e7   :  { %v8660_v57 = vpop.f32.mrf.mxu1  ;;  %v8662_v62 = vpop.f32.mrf.mxu0 }
 0x6e9   :  { %v4126_v0 = vpop.f32.mrf.mxu1  ;;  %v4167_v1 = vpop.f32.mrf.mxu0 }
 0x6eb   :  { %v4128_v6 = vpop.f32.mrf.mxu1  ;;  %v4169_v7 = vpop.f32.mrf.mxu0 }
 0x6ec   :  { %v9744_v6 = vld [vmem:[#allocation143_spill] sm:$0xff] }
 0x6ed   :  { %v4129_v8 = vpop.f32.mrf.mxu1  ;;  %v4170_v9 = vpop.f32.mrf.mxu0 }
 0x707   :  { %v4206_v34 = vpop.f32.mrf.mxu1  ;;  %v4247_v28 = vpop.f32.mrf.mxu0 }
 0x708   :  { %v4207_v5 = vadd.f32 %v4206_v34, %v4042_v32  ;;  %v4248_v63 = vadd.f32 %v4247_v28, %v4083_v20 }
 0x709   :  { %v4208_v33 = vpop.f32.mrf.mxu1  ;;  %v4249_v30 = vpop.f32.mrf.mxu0 }
 0x70a   :  { %v4209_v60 = vadd.f32 %v4208_v33, %v4044_v14  ;;  %v4336_v4 = vadd.f32 %v4207_v5, %v6875_v18  ;;  %v4250_v36 = vadd.f32 %v4249_v30, %v4085_v44  ;;  %v4338_v40 = vadd.f32 %v4248_v63, %v6871_v51  ;;  %v9730_v18 = vld [vmem:[#allocation129_spill] sm:$0xff]  ;;  %v9732_v51 = vld [vmem:[#allocation131_spill] sm:$0xff] }
 0x70b   :  { %v4210_v49 = vpop.f32.mrf.mxu1  ;;  %v4251_v47 = vpop.f32.mrf.mxu0  ;;  %v9742_v14 = vld [vmem:[#allocation141_spill] sm:$0xff] }
 0x70c   :  { %v4337_v53 = vadd.f32 %v4209_v60, %v6886_v11  ;;  %v4339_v22 = vadd.f32 %v4250_v36, %v6880_v50  ;;  %v4344_v39 = vpack.c.bf16 %v4336_v4, %v4336_v4  ;;  %v4346_v32 = vpack.c.bf16 %v4338_v40, %v4338_v40  ;;  %v9729_v11 = vld [vmem:[#allocation2_spill] sm:$0xff]  ;;  %v9750_v4 = vld [vmem:[#allocation149_spill] sm:$0xff]  ;;  %v9752_v36 = vld [vmem:[#allocation151_spill] sm:$0xff] }
 0x70d   :  { %v4211_v23 = vpop.f32.mrf.mxu1  ;;  %v4252_v43 = vpop.f32.mrf.mxu0  ;;  %v9731_v50 = vld [vmem:[#allocation130_spill] sm:$0xff]  ;;  %v9753_v49 = vld [vmem:[#allocation152_spill] sm:$0xff]  ;;  %v9754_v40 = vld [vmem:[#allocation153_spill] sm:$0xff] }
 0x70e   :  { %v4345_v42 = vpack.c.bf16 %v4337_v53, %v4337_v53  ;;  %v4347_v41 = vpack.c.bf16 %v4339_v22, %v4339_v22  ;;  %v9747_v60 = vld [vmem:[#allocation146_spill] sm:$0xff]  ;;  %v9756_v47 = vld [vmem:[#allocation155_spill] sm:$0xff]  ;;  %v9757_v22 = vld [vmem:[#allocation156_spill] sm:$0xff] }
 0x70f   :  { %v9755_v53 = vld [vmem:[#allocation154_spill] sm:$0xff]  ;;  %v9758_v23 = vld [vmem:[#allocation157_spill] sm:$0xff]  ;;  %v9761_v43 = vld [vmem:[#allocation160_spill] sm:$0xff] }
 0x710   :  { %4430 = vmatprep.mubr.bf16.mxu0 %v4345_v42  ;;  %4471 = vmatprep.mubr.bf16.mxu1 %v4347_v41  ;;  %v9760_v42 = vld [vmem:[#allocation159_spill] sm:$0xff]  ;;  %v9763_v41 = vld [vmem:[#allocation162_spill] sm:$0xff] }
 0x711   :  { %4431 = vmatmul.mubr.bf16.vlgmr.msra.gmra.mxu0 %v4344_v39  ;;  %4472 = vmatmul.mubr.bf16.vlgmr.msra.gmra.mxu1 %v4346_v32  ;;  %v9762_v39 = vld [vmem:[#allocation161_spill] sm:$0xff]  ;;  %v9764_v32 = vld [vmem:[#allocation163_spill] sm:$0xff] }
 0x712   :  { %4481 = vmatpush1.bf16.msra.mxu0 %v8097_v35  ;;  %4522 = vmatpush1.bf16.msra.mxu1 %v8103_v15  ;;  %v9733_v35 = vld [vmem:[#allocation132_spill] sm:$0xff]  ;;  %v9734_v15 = vld [vmem:[#allocation133_spill] sm:$0xff] }
 0x713   :  { %4482 = vmatprep.subr.bf16.mxu0 %v8109_v46  ;;  %4523 = vmatprep.subr.bf16.mxu1 %v8115_v27  ;;  %v9735_v46 = vld [vmem:[#allocation134_spill] sm:$0xff]  ;;  %v9736_v27 = vld [vmem:[#allocation135_spill] sm:$0xff] }
 0x716   :  { %4483 = vmatpush1.bf16.msra.mxu0 %v8121_v17  ;;  %4524 = vmatpush1.bf16.msra.mxu1 %v8127_v21  ;;  %v9737_v17 = vld [vmem:[#allocation136_spill] sm:$0xff]  ;;  %v9738_v21 = vld [vmem:[#allocation137_spill] sm:$0xff] }
 0x717   :  { %4484 = vmatprep.subr.bf16.mxu0 %v8133_v59  ;;  %4525 = vmatprep.subr.bf16.mxu1 %v8139_v52  ;;  %v9739_v59 = vld [vmem:[#allocation138_spill] sm:$0xff]  ;;  %v9740_v52 = vld [vmem:[#allocation139_spill] sm:$0xff] }
 0x71a   :  { %4485 = vmatpush1.bf16.msra.mxu0 %v8145_v12  ;;  %4526 = vmatpush1.bf16.msra.mxu1 %v8151_v31  ;;  %v9741_v31 = vld [vmem:[#allocation140_spill] sm:$0xff] }
 0x71b   :  { %4486 = vmatprep.subr.bf16.mxu0 %v9729_v11  ;;  %4527 = vmatprep.subr.bf16.mxu1 %v9730_v18  ;;  %v9765_v11 = vld [vmem:[#allocation164_spill] sm:$0xff]  ;;  %v9766_v18 = vld [vmem:[#allocation165_spill] sm:$0xff] }
 0x71e   :  { %4487 = vmatpush1.bf16.msra.mxu0 %v9731_v50  ;;  %4528 = vmatpush1.bf16.msra.mxu1 %v9732_v51  ;;  %v9767_v51 = vld [vmem:[#allocation166_spill] sm:$0xff] }
 0x71f   :  { %4488 = vmatprep.subr.bf16.mxu0 %v9733_v35  ;;  %4529 = vmatprep.subr.bf16.mxu1 %v9734_v15  ;;  %v9768_v15 = vld [vmem:[#allocation167_spill] sm:$0xff] }
 0x722   :  { %4489 = vmatpush1.bf16.msra.mxu0 %v9735_v46  ;;  %4530 = vmatpush1.bf16.msra.mxu1 %v9736_v27  ;;  %v9769_v46 = vld [vmem:[#allocation179_spill] sm:$0xff] }
 0x723   :  { %4490 = vmatprep.subr.bf16.mxu0 %v9737_v17  ;;  %4531 = vmatprep.subr.bf16.mxu1 %v9738_v21  ;;  %v9770_v17 = vld [vmem:[#allocation168_spill] sm:$0xff]  ;;  %v9771_v21 = vld [vmem:[#allocation169_spill] sm:$0xff] }
 0x726   :  { %4491 = vmatpush1.bf16.msra.mxu0 %v9739_v59  ;;  %4532 = vmatpush1.bf16.msra.mxu1 %v9740_v52 }
 0x727   :  { %v4288_v12 = vpop.f32.mrf.mxu1  ;;  %4492 = vmatprep.subr.bf16.mxu0 %v9741_v31  ;;  %v4329_v20 = vpop.f32.mrf.mxu0  ;;  %4533 = vmatprep.subr.bf16.mxu1 %v9742_v14 }
 0x728   :  { %v4289_v50 = vadd.f32 %v4288_v12, %v8660_v57  ;;  %v4330_v35 = vadd.f32 %v4329_v20, %v8662_v62 }
 0x729   :  { %v4290_v44 = vpop.f32.mrf.mxu1  ;;  %v4331_v54 = vpop.f32.mrf.mxu0 }
 0x72a   :  { %v4291_v45 = vadd.f32 %v4290_v44, %v4126_v0  ;;  %4493 = vmatpush1.bf16.msra.mxu0 %v9743_v55  ;;  %v4332_v56 = vadd.f32 %v4331_v54, %v4167_v1  ;;  %4534 = vmatpush1.bf16.msra.mxu1 %v9744_v6  ;;  %v9745_v1 = vld [vmem:[#allocation144_spill] sm:$0xff]  ;;  %v4340_v27 = vadd.f32 %v4289_v50, %v9769_v46 }
 0x72b   :  { %v4292_v7 = vpop.f32.mrf.mxu1  ;;  %4494 = vmatprep.subr.bf16.mxu0 %v8259_v48  ;;  %v4333_v9 = vpop.f32.mrf.mxu0  ;;  %4535 = vmatprep.subr.bf16.mxu1 %v8266_v37  ;;  %v9746_v48 = vld [vmem:[#allocation145_spill] sm:$0xff]  ;;  %v9748_v37 = vld [vmem:[#allocation147_spill] sm:$0xff]  ;;  %v4342_v59 = vadd.f32 %v4330_v35, %v7274_v2 }
 0x72c   :  { %v4341_v8 = vadd.f32 %v4291_v45, %v7060_v58  ;;  %v4343_v34 = vadd.f32 %v4332_v56, %v7063_v10  ;;  %v9749_v10 = vld [vmem:[#allocation148_spill] sm:$0xff]  ;;  %v4348_v57 = vpack.c.bf16 %v4340_v27, %v4340_v27 }
 0x72d   :  { %v4293_v5 = vpop.f32.mrf.mxu1  ;;  %v4334_v63 = vpop.f32.mrf.mxu0 }
 0x72e   :  { %v4349_v28 = vpack.c.bf16 %v4341_v8, %v4341_v8  ;;  %4495 = vmatpush1.bf16.msra.mxu0 %v8273_v29  ;;  %v4351_v0 = vpack.c.bf16 %v4343_v34, %v4343_v34  ;;  %4536 = vmatpush1.bf16.msra.mxu1 %v8279_v3  ;;  %v9751_v3 = vld [vmem:[#allocation150_spill] sm:$0xff] }
 0x72f   :  { %4496 = vmatprep.subr.bf16.mxu0 %v9745_v1  ;;  %v4391_v33 = vpop.f32.mrf.mxu1  ;;  %4537 = vmatprep.subr.bf16.mxu1 %v9746_v48 }
 0x730   :  { %4512 = vmatprep.mubr.bf16.mxu0 %v4349_v28  ;;  %4553 = vmatprep.mubr.bf16.mxu1 %v4351_v0 }
 0x731   :  { %v4393_v58 = vpop.f32.mrf.mxu1 }
 0x732   :  { %4497 = vmatpush2.bf16.msra.mxu0 %v9747_v60  ;;  %4538 = vmatpush2.bf16.msra.mxu1 %v9748_v37 }
 0x733   :  { %4498 = vmatprep.subr.bf16.mxu0 %v9749_v10  ;;  %v4395_v30 = vpop.f32.mrf.mxu1  ;;  %4539 = vmatprep.subr.bf16.mxu1 %v8319_v19  ;;  %v9759_v19 = vld [vmem:[#allocation158_spill] sm:$0xff] }
 0x735   :  { %v4396_v29 = vpop.f32.mrf.mxu1 }
 0x736   :  { %4499 = vmatpush2.bf16.msra.mxu0 %v9750_v4  ;;  %4540 = vmatpush2.bf16.msra.mxu1 %v9751_v3 }
 0x737   :  { %4500 = vmatprep.subr.bf16.mxu0 %v9752_v36  ;;  %4541 = vmatprep.subr.bf16.mxu1 %v9753_v49 }
 0x73a   :  { %4501 = vmatpush2.bf16.msra.mxu0 %v9754_v40  ;;  %4542 = vmatpush2.bf16.msra.mxu1 %v9755_v53 }
 0x73b   :  { %4502 = vmatprep.subr.bf16.mxu0 %v9756_v47  ;;  %4543 = vmatprep.subr.bf16.mxu1 %v9757_v22 }
 0x73e   :  { %4503 = vmatpush2.bf16.msra.mxu0 %v9758_v23  ;;  %4544 = vmatpush2.bf16.msra.mxu1 %v9759_v19 }
 0x73f   :  { %4504 = vmatprep.subr.bf16.mxu0 %v9760_v42  ;;  %4545 = vmatprep.subr.bf16.mxu1 %v9761_v43 }
 0x742   :  { %4505 = vmatpush2.bf16.msra.mxu0 %v9762_v39  ;;  %4546 = vmatpush2.bf16.msra.mxu1 %v9763_v41 }
 0x743   :  { %4506 = vmatprep.subr.bf16.mxu0 %v9764_v32  ;;  %4547 = vmatprep.subr.bf16.mxu1 %v9765_v11 }
 0x746   :  { %4507 = vmatpush2.bf16.msra.mxu0 %v9766_v18  ;;  %4548 = vmatpush2.bf16.msra.mxu1 %v9767_v51 }
 0x747   :  { %4508 = vmatprep.subr.bf16.mxu0 %v8435_v38  ;;  %4549 = vmatprep.subr.bf16.mxu1 %v9768_v15  ;;  %v4350_v38 = vpack.c.bf16 %v4342_v59, %v4342_v59 }
 0x74a   :  { %4509 = vmatpush2.bf16.msra.mxu0 %v8449_v13  ;;  %4550 = vmatpush2.bf16.msra.mxu1 %v9770_v17 }
 0x74b   :  { %4510 = vmatprep.subr.bf16.mxu0 %v9771_v21  ;;  %4551 = vmatprep.subr.bf16.mxu1 %v8469_v16 }
 0x74e   :  { %4511 = vmatpush2.bf16.msra.mxu0 %v8475_v61  ;;  %4552 = vmatpush2.bf16.msra.mxu1 %v8481_v24 }
 0x751   :  { %4513 = vmatmul.mubr.bf16.vlgmr.msra.gmra.mxu0 %v4348_v57  ;;  %4554 = vmatmul.mubr.bf16.vlgmr.msra.gmra.mxu1 %v4350_v38 }
 0x7d1   :  { %v4432_v62 = vpop.f32.mrf.mxu0  ;;  %v4473_v13 = vpop.f32.mrf.mxu1 }
 0x7d2   :  { %v4433_v45 = vadd.f32 %v4432_v62, %v4391_v33 }
 0x7d3   :  { %v4434_v52 = vpop.f32.mrf.mxu0  ;;  %v4475_v12 = vpop.f32.mrf.mxu1 }
 0x7d4   :  { %v4435_v2 = vadd.f32 %v4434_v52, %v4393_v58  ;;  %v4474_v54 = vadd.f32 %v4473_v13, %v4433_v45 }
 0x7d5   :  { %v4436_v31 = vpop.f32.mrf.mxu0  ;;  %v4477_v20 = vpop.f32.mrf.mxu1 }
 0x7d6   :  { %v4476_v55 = vadd.f32 %v4475_v12, %v4435_v2 }
 0x7d7   :  { %v4437_v14 = vpop.f32.mrf.mxu0  ;;  %v4478_v44 = vpop.f32.mrf.mxu1 }
 0x811   :  { %v4514_v16 = vpop.f32.mrf.mxu0  ;;  %v4555_v56 = vpop.f32.mrf.mxu1 }
 0x812   :  { %v4515_v61 = vadd.f32 %v4514_v16, %v4474_v54 }
 0x813   :  { %v4516_v6 = vpop.f32.mrf.mxu0  ;;  %v4557_v8 = vpop.f32.mrf.mxu1 }
 0x814   :  { %v4556_v24 = vadd.f32 %v4555_v56, %v4515_v61  ;;  %v4517_v7 = vadd.f32 %v4516_v6, %v4476_v55 }
 0x815   :  { %v4518_v9 = vpop.f32.mrf.mxu0  ;;  %v4559_v28 = vpop.f32.mrf.mxu1 }
 0x816   :  { %v4562_v34 = vadd.f32 %v4556_v24, %v9727_v25  ;;  %v4558_v5 = vadd.f32 %v4557_v8, %v4517_v7 }
 0x817   :  { %v4519_v63 = vpop.f32.mrf.mxu0  ;;  %v4560_v1 = vpop.f32.mrf.mxu1 }
 0x818   :  { %4564 = vst [vmem:[%s8759_s15 + $0x30] sm:$0xff] %v4562_v34  ;;  %v4563_v0 = vadd.f32 %v4558_v5, %v9728_v26 }
 0x81a   :  { %4565 = vst [vmem:[%s8759_s15 + $0x38] sm:$0xff] %v4563_v0 }

</bundles_post_ra>
